<compile_context>
chip_gen: v7x
topology: tpu7x:2x2x1
jax: 0.10.0
libtpu: 0.0.40
codegen_flags: <defaults>
</compile_context>

<pallas_src>
import math
import functools

import numpy as np
import jax
import jax.numpy as jnp
from jax import lax
from jax.experimental import pallas as pl
from jax.experimental.pallas import tpu as pltpu


# ---------------------------------------------------------------------------
# Pass 1: per-position projection + cosine normalization (hoisted out of the
# flash kv loop).
# ---------------------------------------------------------------------------
def _project_kernel(x_ref, wq_ref, bq_ref, wkv_ref, bkv_ref, qn_ref, knv_ref,
                    *, planes, planes_pad, inv_scale):
    x = x_ref[0].astype(jnp.float32)                               # (C, T)

    # --- query: 1x1 conv as channel-contracting matmul, then cosine norm ---
    q = lax.dot_general(x, wq_ref[...], (((0,), (0,)), ((), ())),
                        preferred_element_type=jnp.float32)        # (T, Ppad)
    q = q + bq_ref[...]
    # padded lanes of q are exactly zero (zero-padded weights/bias), so the
    # channel statistics just divide by the true planes count.
    mean_q = jnp.sum(q, axis=-1, keepdims=True) * (1.0 / planes)
    inv_nq = 1.0 / (jnp.sqrt(jnp.sum(q * q, axis=-1, keepdims=True)) + 1e-6)
    # fold 1/scale into the normalized query (one mul here instead of N^2 later)
    qn = (q - mean_q) * (inv_nq * inv_scale)
    if planes_pad > planes:
        # zero padded channels: the sim matmul depends on this (kn's padded
        # lanes are NOT zero) -- see invariant comment at top of file.
        lanes = lax.broadcasted_iota(jnp.int32, qn.shape, 1)
        qn = jnp.where(lanes < planes, qn, 0.0)
    qn_ref[0] = qn

    # --- fused key|value projection + key cosine norm ---
    kv = lax.dot_general(x, wkv_ref[...], (((0,), (0,)), ((), ())),
                         preferred_element_type=jnp.float32)       # (T, 2*Ppad)
    kv = kv + bkv_ref[...]
    k = kv[:, :planes_pad]
    v = kv[:, planes_pad:]                                         # padded lanes are 0
    mean_k = jnp.sum(k, axis=-1, keepdims=True) * (1.0 / planes)
    inv_nk = 1.0 / (jnp.sqrt(jnp.sum(k * k, axis=-1, keepdims=True)) + 1e-6)
    kn = (k - mean_k) * inv_nk
    knv_ref[0] = jnp.concatenate([kn, v], axis=-1)                 # (T, 2*Ppad)


# ---------------------------------------------------------------------------
# Pass 2: flash attention (fixed-max softmax) + output projection + residual.
# ---------------------------------------------------------------------------
def _flash_kernel(gamma_ref, qn_ref, knv_ref, xres_ref, wo_ref, o_ref,
                  l_s, acc_s, *, planes_pad, tile_k, n_valid, kv_resident):
    ki = pl.program_id(2)
    nk = pl.num_programs(2)

    @pl.when(ki == 0)
    def _init():
        l_s[...] = jnp.zeros_like(l_s)
        acc_s[...] = jnp.zeros_like(acc_s)

    if kv_resident:
        # whole per-batch [kn|v] slab is VMEM-resident; slice this step's tile.
        off = pl.multiple_of(ki * tile_k, tile_k)
        knv = knv_ref[0, pl.ds(off, tile_k), :]                    # (TK, 2*Ppad)
    else:
        knv = knv_ref[0]                                           # (TK, 2*Ppad)
    kn = knv[:, :planes_pad]
    v = knv[:, planes_pad:]

    # similarity tile; qn already carries the 1/scale factor and zeroed pad lanes.
    s = lax.dot_general(qn_ref[0], kn, (((1,), (1,)), ((), ())),
                        preferred_element_type=jnp.float32)        # (TQ, TK)

    # cosine scores are bounded (|s| <= 1/sqrt(planes) <= 1): fixed-max softmax,
    # no running max / rescale needed and no overflow risk.
    p = jnp.exp(s)
    if n_valid is not None:
        # mask key positions that are N-padding (tail of the padded position axis)
        col = ki * tile_k + lax.broadcasted_iota(jnp.int32, p.shape, 1)
        p = jnp.where(col < n_valid, p, 0.0)

    l_s[...] += jnp.sum(p, axis=-1, keepdims=True)
    acc_s[...] += jnp.dot(p, v, preferred_element_type=jnp.float32)

    @pl.when(ki == nk - 1)
    def _finalize():
        attn = acc_s[...] * (1.0 / l_s[...])                       # (TQ, Ppad)
        # conv_out as (C, Ppad) x (TQ, Ppad) contraction -> (C, TQ): output is
        # produced directly in channel-major layout, no transpose needed.
        out_cn = lax.dot_general(wo_ref[...], attn, (((1,), (1,)), ((), ())),
                                 preferred_element_type=jnp.float32)
        x_res = xres_ref[0].astype(jnp.float32)
        o_ref[0] = (x_res + gamma_ref[0] * out_cn).astype(o_ref.dtype)


def _pick_tile(n):
    # >=256 fills the 256x256 MXU on v6e/v7x and amortizes per-grid-step
    # overhead; 512 for large maps; 128 keeps padding waste low for tiny maps.
    if n >= 2048:
        return 512
    if n >= 256:
        return 256
    return 128


def nonlocal_cos_forward(x_nchw, params, kv_resident=None):
    """x_nchw: (B, C_in, H, W) float32. Returns same shape."""
    B, C, H, W = x_nchw.shape
    N = H * W
    P = params["wq"].shape[1]
    Ppad = ((P + 127) // 128) * 128
    inv_scale = 1.0 / math.sqrt(P)

    T = _pick_tile(N)
    Npad = ((N + T - 1) // T) * T
    nt = Npad // T

    # NCHW -> (B, C, N): free reshape; pad the position axis only when needed.
    x_cn = x_nchw.reshape(B, C, N)
    if Npad != N:
        x_cn = jnp.pad(x_cn, ((0, 0), (0, 0), (0, Npad - N)))

    # One-time (tiny) weight prep: pad planes to 128 lanes, fuse key|value.
    def pad_p(w):
        return jnp.pad(w, ((0, 0), (0, Ppad - P)))

    wq = pad_p(params["wq"])                                        # (C, Ppad)
    bq = jnp.pad(params["bq"], ((0, 0), (0, Ppad - P)))             # (1, Ppad)
    wkv = jnp.concatenate([pad_p(params["wk"]), pad_p(params["wv"])], axis=1)
    bkv = jnp.concatenate(
        [jnp.pad(params["bk"], ((0, 0), (0, Ppad - P))),
         jnp.pad(params["bv"], ((0, 0), (0, Ppad - P)))], axis=1)   # (1, 2*Ppad)
    wo = pad_p(params["wo"].T)                                      # (C, Ppad)

    cparams2d = pltpu.CompilerParams(
        dimension_semantics=("parallel", "parallel"),
        vmem_limit_bytes=64 * 1024 * 1024)

    # ---- Pass 1: projection + cosine normalization, once per position ----
    qn, knv = pl.pallas_call(
        functools.partial(_project_kernel, planes=P, planes_pad=Ppad,
                          inv_scale=inv_scale),
        out_shape=(jax.ShapeDtypeStruct((B, Npad, Ppad), jnp.float32),
                   jax.ShapeDtypeStruct((B, Npad, 2 * Ppad), jnp.float32)),
        grid=(B, nt),
        in_specs=[
            pl.BlockSpec((1, C, T), lambda b, t: (b, 0, t)),        # x tile
            pl.BlockSpec((C, Ppad), lambda b, t: (0, 0)),           # wq
            pl.BlockSpec((1, Ppad), lambda b, t: (0, 0)),           # bq
            pl.BlockSpec((C, 2 * Ppad), lambda b, t: (0, 0)),       # wk|wv fused
            pl.BlockSpec((1, 2 * Ppad), lambda b, t: (0, 0)),       # bk|bv fused
        ],
        out_specs=(pl.BlockSpec((1, T, Ppad), lambda b, t: (b, t, 0)),
                   pl.BlockSpec((1, T, 2 * Ppad), lambda b, t: (b, t, 0))),
        compiler_params=cparams2d,
    )(x_cn, wq, bq, wkv, bkv)

    # ---- Pass 2: flash attention + out-projection + residual ----
    knv_slab_bytes = Npad * 2 * Ppad * 4
    if kv_resident is None:
        # keep whole per-batch [kn|v] slab resident when it (double-buffered)
        # fits comfortably in VMEM -> kv axis never re-touches HBM per qi.
        kv_resident = (2 * knv_slab_bytes) <= (16 * 1024 * 1024)

    if kv_resident:
        knv_spec = pl.BlockSpec((1, Npad, 2 * Ppad), lambda b, qi, ki: (b, 0, 0))
    else:
        knv_spec = pl.BlockSpec((1, T, 2 * Ppad), lambda b, qi, ki: (b, ki, 0))

    n_valid = None if Npad == N else N
    kernel = functools.partial(_flash_kernel, planes_pad=Ppad, tile_k=T,
                               n_valid=n_valid, kv_resident=kv_resident)

    cost = pl.CostEstimate(
        flops=int(B * (4 * Npad * Npad * Ppad + 2 * C * Ppad * Npad)),
        transcendentals=int(B * Npad * Npad),
        bytes_accessed=int(4 * B * (Npad * Ppad + Npad * 2 * Ppad + 2 * C * Npad)))

    out_cn = pl.pallas_call(
        kernel,
        out_shape=jax.ShapeDtypeStruct((B, C, Npad), x_nchw.dtype),
        grid=(B, nt, nt),
        in_specs=[
            pl.BlockSpec(memory_space=pltpu.MemorySpace.SMEM),          # gamma (1,)
            pl.BlockSpec((1, T, Ppad), lambda b, qi, ki: (b, qi, 0)),   # qn tile (resident over ki)
            knv_spec,                                                   # [kn|v]
            pl.BlockSpec((1, C, T), lambda b, qi, ki: (b, 0, qi)),      # residual x tile
            pl.BlockSpec((C, Ppad), lambda b, qi, ki: (0, 0)),          # wo
        ],
        out_specs=pl.BlockSpec((1, C, T), lambda b, qi, ki: (b, 0, qi)),
        scratch_shapes=[
            pltpu.VMEM((T, 1), jnp.float32),      # running softmax denominator
            pltpu.VMEM((T, Ppad), jnp.float32),   # running weighted-value accumulator
        ],
        compiler_params=pltpu.CompilerParams(
            dimension_semantics=("parallel", "parallel", "arbitrary"),
            vmem_limit_bytes=64 * 1024 * 1024),
        cost_estimate=cost,
    )(params["gamma"], qn, knv, x_cn, wo)

    if Npad != N:
        out_cn = out_cn[:, :, :N]
    return out_cn.reshape(B, C, H, W)


# ---------------------------------------------------------------------------
# Pure-JAX reference (transcription of the PyTorch forward, NCHW layout).
# ---------------------------------------------------------------------------
def _reference(x, params, planes):
    B, C, H, W = x.shape
    N = H * W
    scale = math.sqrt(planes)
    xf = x.reshape(B, C, N)

    def conv1x1(inp, w, b=None):
        y = jnp.einsum('bcn,co->bon', inp, w)
        if b is not None:
            y = y + b.reshape(1, -1, 1)
        return y

    q = conv1x1(xf, params['wq'], params['bq'][0])
    k = conv1x1(xf, params['wk'], params['bk'][0])
    v = conv1x1(xf, params['wv'], params['bv'][0])

    mq = q.mean(1, keepdims=True)
    mk = k.mean(1, keepdims=True)
    vq = jnp.sqrt((q * q).sum(1, keepdims=True))
    vk = jnp.sqrt((k * k).sum(1, keepdims=True))
    qn = (q - mq) / (vq + 1e-6)
    kn = (k - mk) / (vk + 1e-6)

    sim = jnp.einsum('bpn,bpm->bnm', qn, kn) / scale
    sim = jax.nn.softmax(sim, axis=2)
    out = jnp.einsum('bnm,bpm->bnp', sim, v)       # (B, N, P)
    out = jnp.transpose(out, (0, 2, 1))            # (B, P, N)
    out = jnp.einsum('bpn,pc->bcn', out, params['wo'])
    out = params['gamma'][0] * out + xf
    return out.reshape(B, C, H, W)


def init_params(key, inplanes, planes):
    ks = jax.random.split(key, 4)
    # PyTorch: conv weights ~ N(0, 0.01), biases zero, gamma zero.
    # Weights stored as (C_in, C_out) == torch weight (C_out, C_in, 1, 1).T.
    params = {
        "wq": 0.01 * jax.random.normal(ks[0], (inplanes, planes), jnp.float32),
        "bq": jnp.zeros((1, planes), jnp.float32),
        "wk": 0.01 * jax.random.normal(ks[1], (inplanes, planes), jnp.float32),
        "bk": jnp.zeros((1, planes), jnp.float32),
        "wv": 0.01 * jax.random.normal(ks[2], (inplanes, planes), jnp.float32),
        "bv": jnp.zeros((1, planes), jnp.float32),
        "wo": 0.01 * jax.random.normal(ks[3], (planes, inplanes), jnp.float32),
        # Module inits gamma=0 (output would equal residual); use a nonzero
        # deterministic value so the attention path is actually exercised.
        "gamma": jnp.array([0.5], jnp.float32),
    }
    return params


if __name__ == "__main__":
    # H=W=18 -> N=324 (not a multiple of 128): exercises the N-padding / key
    # tail mask and the multi-step kv accumulation (Npad=512, tile=256).
    B, C_in, H, W = 2, 4, 18, 18
    planes = 8

    key = jax.random.PRNGKey(0)
    kx, kp = jax.random.split(key)
    x = jax.random.normal(kx, (B, C_in, H, W), jnp.float32)
    params = init_params(kp, C_in, planes)

    ref = _reference(x, params, planes)

    # Default path (projected K/V slab kept VMEM-resident for small maps).
    out = jax.block_until_ready(nonlocal_cos_forward(x, params))
    np.testing.assert_allclose(np.asarray(out), np.asarray(ref),
                               rtol=2e-4, atol=1e-5)

    # Streamed-KV path (used when the projected slab is too big for VMEM).
    out2 = jax.block_until_ready(nonlocal_cos_forward(x, params, kv_resident=False))
    np.testing.assert_allclose(np.asarray(out2), np.asarray(ref),
                               rtol=2e-4, atol=1e-5)

    print("KERNEL_OK")
</pallas_src>

<mosaic_0001>
module attributes {stable_mosaic.version = 11 : i64} {
  func.func @_project_kernel(%arg0: i32, %arg1: i32, %arg2: memref<1x4x256xf32, #tpu.memory_space<vmem>>, %arg3: memref<4x128xf32, #tpu.memory_space<vmem>>, %arg4: memref<1x128xf32, #tpu.memory_space<vmem>>, %arg5: memref<4x256xf32, #tpu.memory_space<vmem>>, %arg6: memref<1x256xf32, #tpu.memory_space<vmem>>, %arg7: memref<1x256x128xf32, #tpu.memory_space<vmem>>, %arg8: memref<1x256x256xf32, #tpu.memory_space<vmem>>) attributes {dimension_semantics = [#tpu.dimension_semantics<parallel>, #tpu.dimension_semantics<parallel>], iteration_bounds = array<i64: 2, 2>, scalar_prefetch = 0 : i64, scratch_operands = 0 : i64, tpu.core_type = #tpu.core_type<tc>, window_params = [{transform_indices = @transform_0, window_bounds = array<i64: 1, 4, 256>}, {pipeline_mode = #tpu.pipeline_mode<synchronous>, transform_indices = @transform_1, window_bounds = array<i64: 4, 128>}, {pipeline_mode = #tpu.pipeline_mode<synchronous>, transform_indices = @transform_2, window_bounds = array<i64: 1, 128>}, {pipeline_mode = #tpu.pipeline_mode<synchronous>, transform_indices = @transform_3, window_bounds = array<i64: 4, 256>}, {pipeline_mode = #tpu.pipeline_mode<synchronous>, transform_indices = @transform_4, window_bounds = array<i64: 1, 256>}, {transform_indices = @transform_5, window_bounds = array<i64: 1, 256, 128>}, {transform_indices = @transform_6, window_bounds = array<i64: 1, 256, 256>}]} {
    %c0 = arith.constant 0 : index
    %c0_0 = arith.constant 0 : index
    %c0_1 = arith.constant 0 : index
    %0 = vector.load %arg2[%c0, %c0_0, %c0_1] : memref<1x4x256xf32, #tpu.memory_space<vmem>>, vector<1x4x256xf32>
    %1 = vector.shape_cast %0 : vector<1x4x256xf32> to vector<4x256xf32>
    %c0_2 = arith.constant 0 : index
    %c0_3 = arith.constant 0 : index
    %2 = vector.load %arg3[%c0_2, %c0_3] : memref<4x128xf32, #tpu.memory_space<vmem>>, vector<4x128xf32>
    %cst = arith.constant dense<0.000000e+00> : vector<256x128xf32>
    %3 = tpu.matmul %1, %2, %cst {dimension_numbers = #tpu.dot_dimension_numbers<[0], [0], [1], [1], [0, 1, 1, 1], [], []>} : vector<4x256xf32>, vector<4x128xf32>, vector<256x128xf32> -> vector<256x128xf32>
    %c0_4 = arith.constant 0 : index
    %c0_5 = arith.constant 0 : index
    %4 = vector.load %arg4[%c0_4, %c0_5] : memref<1x128xf32, #tpu.memory_space<vmem>>, vector<1x128xf32>
    %5 = vector.broadcast %4 : vector<1x128xf32> to vector<256x128xf32>
    %6 = arith.addf %3, %5 : vector<256x128xf32>
    %cst_6 = arith.constant dense<0.000000e+00> : vector<256xf32>
    %7 = vector.multi_reduction <add>, %6, %cst_6 [1] : vector<256x128xf32> to vector<256xf32>
    %8 = vector.shape_cast %7 : vector<256xf32> to vector<256x1xf32>
    %cst_7 = arith.constant 1.250000e-01 : f32
    %9 = vector.broadcast %cst_7 : f32 to vector<256x1xf32>
    %10 = arith.mulf %8, %9 : vector<256x1xf32>
    %11 = arith.mulf %6, %6 : vector<256x128xf32>
    %cst_8 = arith.constant dense<0.000000e+00> : vector<256xf32>
    %12 = vector.multi_reduction <add>, %11, %cst_8 [1] : vector<256x128xf32> to vector<256xf32>
    %13 = vector.shape_cast %12 : vector<256xf32> to vector<256x1xf32>
    %14 = math.sqrt %13 : vector<256x1xf32>
    %cst_9 = arith.constant 9.99999997E-7 : f32
    %15 = vector.broadcast %cst_9 : f32 to vector<256x1xf32>
    %16 = arith.addf %14, %15 : vector<256x1xf32>
    %cst_10 = arith.constant 1.000000e+00 : f32
    %17 = vector.broadcast %cst_10 : f32 to vector<256x1xf32>
    %18 = arith.divf %17, %16 : vector<256x1xf32>
    %19 = vector.broadcast %10 : vector<256x1xf32> to vector<256x128xf32>
    %20 = arith.subf %6, %19 : vector<256x128xf32>
    %cst_11 = arith.constant 0.353553385 : f32
    %21 = vector.broadcast %cst_11 : f32 to vector<256x1xf32>
    %22 = arith.mulf %18, %21 : vector<256x1xf32>
    %23 = vector.broadcast %22 : vector<256x1xf32> to vector<256x128xf32>
    %24 = arith.mulf %20, %23 : vector<256x128xf32>
    %25 = tpu.iota {dimensions = array<i32: 1>} : vector<256x128xi32>
    %c8_i32 = arith.constant 8 : i32
    %26 = vector.broadcast %c8_i32 : i32 to vector<256x128xi32>
    %27 = arith.cmpi slt, %25, %26 : vector<256x128xi32>
    %cst_12 = arith.constant 0.000000e+00 : f32
    %28 = vector.broadcast %cst_12 : f32 to vector<256x128xf32>
    %29 = arith.select %27, %24, %28 : vector<256x128xi1>, vector<256x128xf32>
    %c0_13 = arith.constant 0 : index
    %c0_14 = arith.constant 0 : index
    %c0_15 = arith.constant 0 : index
    %30 = vector.load %arg7[%c0_13, %c0_14, %c0_15] : memref<1x256x128xf32, #tpu.memory_space<vmem>>, vector<1x256x128xf32>
    %31 = vector.shape_cast %30 : vector<1x256x128xf32> to vector<256x128xf32>
    %32 = vector.shape_cast %29 : vector<256x128xf32> to vector<1x256x128xf32>
    tpu.vector_store %arg7[%c0_13, %c0_14, %c0_15], %32 {strides = array<i32>} : memref<1x256x128xf32, #tpu.memory_space<vmem>>, vector<1x256x128xf32>,
    %c0_16 = arith.constant 0 : index
    %c0_17 = arith.constant 0 : index
    %33 = vector.load %arg5[%c0_16, %c0_17] : memref<4x256xf32, #tpu.memory_space<vmem>>, vector<4x256xf32>
    %cst_18 = arith.constant dense<0.000000e+00> : vector<256x256xf32>
    %34 = tpu.matmul %1, %33, %cst_18 {dimension_numbers = #tpu.dot_dimension_numbers<[0], [0], [1], [1], [0, 1, 1, 1], [], []>} : vector<4x256xf32>, vector<4x256xf32>, vector<256x256xf32> -> vector<256x256xf32>
    %c0_19 = arith.constant 0 : index
    %c0_20 = arith.constant 0 : index
    %35 = vector.load %arg6[%c0_19, %c0_20] : memref<1x256xf32, #tpu.memory_space<vmem>>, vector<1x256xf32>
    %36 = vector.broadcast %35 : vector<1x256xf32> to vector<256x256xf32>
    %37 = arith.addf %34, %36 : vector<256x256xf32>
    %38 = vector.extract_strided_slice %37 {offsets = [0, 0], sizes = [256, 128], strides = [1, 1]} : vector<256x256xf32> to vector<256x128xf32>
    %39 = vector.extract_strided_slice %37 {offsets = [0, 128], sizes = [256, 128], strides = [1, 1]} : vector<256x256xf32> to vector<256x128xf32>
    %cst_21 = arith.constant dense<0.000000e+00> : vector<256xf32>
    %40 = vector.multi_reduction <add>, %38, %cst_21 [1] : vector<256x128xf32> to vector<256xf32>
    %41 = vector.shape_cast %40 : vector<256xf32> to vector<256x1xf32>
    %cst_22 = arith.constant 1.250000e-01 : f32
    %42 = vector.broadcast %cst_22 : f32 to vector<256x1xf32>
    %43 = arith.mulf %41, %42 : vector<256x1xf32>
    %44 = arith.mulf %38, %38 : vector<256x128xf32>
    %cst_23 = arith.constant dense<0.000000e+00> : vector<256xf32>
    %45 = vector.multi_reduction <add>, %44, %cst_23 [1] : vector<256x128xf32> to vector<256xf32>
    %46 = vector.shape_cast %45 : vector<256xf32> to vector<256x1xf32>
    %47 = math.sqrt %46 : vector<256x1xf32>
    %cst_24 = arith.constant 9.99999997E-7 : f32
    %48 = vector.broadcast %cst_24 : f32 to vector<256x1xf32>
    %49 = arith.addf %47, %48 : vector<256x1xf32>
    %cst_25 = arith.constant 1.000000e+00 : f32
    %50 = vector.broadcast %cst_25 : f32 to vector<256x1xf32>
    %51 = arith.divf %50, %49 : vector<256x1xf32>
    %52 = vector.broadcast %43 : vector<256x1xf32> to vector<256x128xf32>
    %53 = arith.subf %38, %52 : vector<256x128xf32>
    %54 = vector.broadcast %51 : vector<256x1xf32> to vector<256x128xf32>
    %55 = arith.mulf %53, %54 : vector<256x128xf32>
    %56 = tpu.concatenate %55, %39 in 1 : vector<256x128xf32>, vector<256x128xf32> -> vector<256x256xf32>
    %c0_26 = arith.constant 0 : index
    %c0_27 = arith.constant 0 : index
    %c0_28 = arith.constant 0 : index
    %57 = vector.load %arg8[%c0_26, %c0_27, %c0_28] : memref<1x256x256xf32, #tpu.memory_space<vmem>>, vector<1x256x256xf32>
    %58 = vector.shape_cast %57 : vector<1x256x256xf32> to vector<256x256xf32>
    %59 = vector.shape_cast %56 : vector<256x256xf32> to vector<1x256x256xf32>
    tpu.vector_store %arg8[%c0_26, %c0_27, %c0_28], %59 {strides = array<i32>} : memref<1x256x256xf32, #tpu.memory_space<vmem>>, vector<1x256x256xf32>,
    return
  }
  func.func @transform_0(%arg0: i32, %arg1: i32) -> (i32, i32, i32) {
    %c0_i32 = arith.constant 0 : i32
    %c0_i32_0 = arith.constant 0 : i32
    return %arg0, %c0_i32, %arg1 : i32, i32, i32
  }
  func.func @transform_1(%arg0: i32, %arg1: i32) -> (i32, i32) {
    %c0_i32 = arith.constant 0 : i32
    %c0_i32_0 = arith.constant 0 : i32
    %c0_i32_1 = arith.constant 0 : i32
    return %c0_i32, %c0_i32_0 : i32, i32
  }
  func.func @transform_2(%arg0: i32, %arg1: i32) -> (i32, i32) {
    %c0_i32 = arith.constant 0 : i32
    %c0_i32_0 = arith.constant 0 : i32
    %c0_i32_1 = arith.constant 0 : i32
    return %c0_i32, %c0_i32_0 : i32, i32
  }
  func.func @transform_3(%arg0: i32, %arg1: i32) -> (i32, i32) {
    %c0_i32 = arith.constant 0 : i32
    %c0_i32_0 = arith.constant 0 : i32
    %c0_i32_1 = arith.constant 0 : i32
    return %c0_i32, %c0_i32_0 : i32, i32
  }
  func.func @transform_4(%arg0: i32, %arg1: i32) -> (i32, i32) {
    %c0_i32 = arith.constant 0 : i32
    %c0_i32_0 = arith.constant 0 : i32
    %c0_i32_1 = arith.constant 0 : i32
    return %c0_i32, %c0_i32_0 : i32, i32
  }
  func.func @transform_5(%arg0: i32, %arg1: i32) -> (i32, i32, i32) {
    %c0_i32 = arith.constant 0 : i32
    %c0_i32_0 = arith.constant 0 : i32
    return %arg0, %arg1, %c0_i32 : i32, i32, i32
  }
  func.func @transform_6(%arg0: i32, %arg1: i32) -> (i32, i32, i32) {
    %c0_i32 = arith.constant 0 : i32
    %c0_i32_0 = arith.constant 0 : i32
    return %arg0, %arg1, %c0_i32 : i32, i32, i32
  }
}

</mosaic_0001>

<bundles_post_ra>
// kernel: tpu_custom_call.1
= control target key start
LH: loop header
LB: loop body
LE: loop exit
PB: predicated region body
PF: predicated region fallthrough
CT: control target
= control target key end

     0   :  { %s5151_s0 = inlined_call_operand.hbm [shape: f32[2,4,512], index: 0, kind: input, shape index: {}]   ;;  %s5152_s1 = inlined_call_operand.hbm [shape: f32[4,128], index: 1, kind: input, shape index: {}]   ;;  %s5153_s2 = inlined_call_operand.hbm [shape: f32[1,128], index: 2, kind: input, shape index: {}]   ;;  %s5154_s3 = inlined_call_operand.hbm [shape: f32[4,256], index: 3, kind: input, shape index: {}]   ;;  %s5155_s4 = inlined_call_operand.hbm [shape: f32[1,256], index: 4, kind: input, shape index: {}]   ;;  %s5156_s5 = inlined_call_operand.hbm [shape: f32[2,512,128], index: 5, kind: output, shape index: {0}]   ;;  %s5157_s6 = inlined_call_operand.hbm [shape: f32[2,512,256], index: 6, kind: output, shape index: {1}]  }
   0x1   :  { %5208 = sst [smem:[#allocation51_spill]] %s5152_s1 }
   0x2   :  { %5209 = sst [smem:[#allocation52_spill]] %s5153_s2 }
   0x3   :  { %5210 = sst [smem:[#allocation53_spill]] %s5154_s3 }
   0x4   :  { %5211 = sst [smem:[#allocation54_spill]] %s5155_s4 }
   0x5   :  { %12 = vsyncpa [#allocation3], 0 }
   0x6   :  { %14 = vsyncpa [#allocation3 + $0x1], 0 }
   0x7   :  { %15 = vsyncpa [#allocation6], 0 }
   0x8   :  { %16 = vsyncpa [#allocation9], 0 }
   0x9   :  { %17 = vsyncpa [#allocation4], 0 }
   0xa   :  { %19 = vsyncpa [#allocation4 + $0x1], 0 }
   0xb   :  { %20 = vsyncpa [#allocation13], 0 }
   0xc   :  { %22 = vsyncpa [#allocation13 + $0x1], 0  ;;  %s3450_s21 = smov 0   ;;  %s3452_s22 = smov 0  }
   0xd   :  { %s3454_s23 = smov 0   ;;  %s3456_s24 = smov 0  }
   0xe   :  { %s3458_s25 = smov 0   ;;  %s3460_s26 = smov 0  }
   0xf   :  { %s3462_s27 = smov 0   ;;  %s3464_s28 = smov 0  }
  0x10 LB: > { %s5161_s29 = sadd.s32 4294967295, %s3401_s28   ;;  %p2550_p0 = scmp.ge.s32.totalorder %s3401_s28, 1  ;;  %s3401_s28 = sphi %s3464_s28, %s28_s28   ;;  %s3397_s27 = sphi %s3462_s27, %s5307_s27   ;;  %s3393_s26 = sphi %s3460_s26, %s5306_s26   ;;  %s3389_s25 = sphi %s3458_s25, %s5305_s25   ;;  %s3385_s24 = sphi %s3456_s24, %s5304_s24   ;;  %s3381_s23 = sphi %s3454_s23, %s5303_s23   ;;  %s3377_s22 = sphi %s3452_s22, %s5302_s22   ;;  %s3373_s21 = sphi %s3450_s21, %s5301_s21  }
  0x11   : > { %p3494_p1 = scmp.eq.s32.totalorder %s5161_s29, 0  ;;  %p213_p2 = scmp.lt.s32.totalorder %s3401_s28, 5 }
  0x12   : > { %s3403_s8 = smov [#allocation5]   ;;  %s3404_s10 = smov [#allocation8]  }
  0x13   : > { %s5212_s30 = scalar_select %p3494_p1, 1, 0 }
  0x14   : > { %p3499_p3 = pnand %p2550_p0, %p213_p2  ;;  %s226_s9 = sshll.u32 %s3403_s8, 4  ;;  %s227_s9 = int_to_ptr.vmem [resolvable:$true] %s226_s9 }
  0x15   : > { %s248_s11 = sshll.u32 %s3404_s10, 4  ;;  %s3405_s13 = smov [#allocation7]   ;;  %s3511_s11 = int_to_ptr.vmem [resolvable:$true] %s248_s11 }
  0x16   : > { %s5213_s7 = scalar_select %p3499_p3, 1, 0 }
  0x17   : > { %p2755_p4 = pneg %p3499_p3  ;;  %s237_s14 = sshll.u32 %s3405_s13, 4  ;;  %s3513_s14 = int_to_ptr.vmem [resolvable:$true] %s237_s14 }
  0x18   : > { %s5215_s1 = sld [smem:[#allocation51_spill]] }
  0x19   : > { %p3507_p5 = pnand %p2755_p4, %p3494_p1 }
  0x1b   : > { %p3523_p7 = pneg %p3507_p5 }
  0x1e   : > { %s3121_s17 = scalar_lea.hbm %s5215_s1, 64 }
  0x1f   : > { %p3122_p6 = scmp.ne.s32.totalorder %s5215_s1, %s3121_s17  ;;  %p3128_p10 = scmp.lt.u32.totalorder %s3121_s17, %s5215_s1 }
  0x21   : > { %p3124_p8 = pnand %p3523_p7, %p3122_p6 }
  0x23   : > { %p3125_p9 = pneg %p3124_p8 }
  0x25   : > { %p3130_p11 = pnand %p3128_p10, %p3125_p9 }
  0x27   : > { %3133 = shalt.err (!%p3130_p11)
}
  0x28   : > { %s3134_s13 = scalar_lea.vmem %s227_s9, 64  ;;  %p3142_p2 = scmp.lt.s32.totalorder %s227_s9, %s227_s9 }
  0x29   : > { %p3135_p12 = scmp.ne.s32.totalorder %s227_s9, %s3134_s13  ;;  %p3143_p4 = scmp.lt.s32.totalorder %s3134_s13, %s3134_s13 }
  0x2b   : > { %p3137_p13 = pnand %p3135_p12, %p3523_p7  ;;  %p3144_p3 = por %p3143_p4, %p3142_p2 }
  0x2d   : > { %p3138_p0 = pneg %p3137_p13 }
  0x2f   : > { %p3145_p1 = pnand %p3144_p3, %p3138_p0 }
  0x31   : > { %3148 = shalt.err (!%p3145_p1)
}
  0x32   : > { %2758 = dma.hbm_to_vmem [thread:$0]  (!%p3507_p5), %s5215_s1, 64, %s227_s9, [#allocation6]  }
  0x33   : > { %s5217_s3 = sld [smem:[#allocation53_spill]] }
  0x39   : > { %s3149_s19 = scalar_lea.hbm %s5217_s3, 128 }
  0x3a   : > { %p3150_p6 = scmp.ne.s32.totalorder %s5217_s3, %s3149_s19  ;;  %p3156_p1 = scmp.lt.u32.totalorder %s3149_s19, %s5217_s3 }
  0x3c   : > { %p3152_p8 = pnand %p3150_p6, %p3523_p7 }
  0x3e   : > { %p3153_p9 = pneg %p3152_p8 }
  0x40   : > { %p3158_p3 = pnand %p3156_p1, %p3153_p9 }
  0x42   : > { %3161 = shalt.err (!%p3158_p3)
}
  0x43   : > { %s3162_s9 = scalar_lea.vmem %s3511_s11, 128  ;;  %p3170_p13 = scmp.lt.s32.totalorder %s3511_s11, %s3511_s11 }
  0x44   : > { %p3163_p10 = scmp.ne.s32.totalorder %s3511_s11, %s3162_s9  ;;  %p3171_p0 = scmp.lt.s32.totalorder %s3162_s9, %s3162_s9 }
  0x46   : > { %p3165_p11 = pnand %p3163_p10, %p3523_p7  ;;  %p3172_p2 = por %p3171_p0, %p3170_p13 }
  0x48   : > { %p3166_p12 = pneg %p3165_p11 }
  0x4a   : > { %p3173_p4 = pnand %p3172_p2, %p3166_p12 }
  0x4c   : > { %3176 = shalt.err (!%p3173_p4)
}
  0x4d   : > { %2764 = dma.hbm_to_vmem [thread:$0]  (!%p3507_p5), %s5217_s3, 128, %s3511_s11, [#allocation9]  }
  0x4e   : > { %s5218_s2 = sld [smem:[#allocation52_spill]] }
  0x54   : > { %s3177_s18 = scalar_lea.hbm %s5218_s2, 16 }
  0x55   : > { %p3178_p6 = scmp.ne.s32.totalorder %s5218_s2, %s3177_s18  ;;  %p3184_p1 = scmp.lt.u32.totalorder %s3177_s18, %s5218_s2 }
  0x57   : > { %p3180_p8 = pnand %p3178_p6, %p3523_p7 }
  0x59   : > { %p3181_p9 = pneg %p3180_p8 }
  0x5b   : > { %p3186_p3 = pnand %p3184_p1, %p3181_p9 }
  0x5d   : > { %3189 = shalt.err (!%p3186_p3)
}
  0x5e   : > { %s3190_s11 = scalar_lea.vmem %s3513_s14, 16  ;;  %s3197_s9 = scalar_lea.vmem %s3513_s14, 32 }
  0x5f   : > { %p3191_p10 = scmp.ne.s32.totalorder %s3513_s14, %s3190_s11  ;;  %p3198_p13 = scmp.lt.s32.totalorder %s3513_s14, %s3513_s14 }
  0x60   : > { %p3199_p0 = scmp.lt.s32.totalorder %s3197_s9, %s3190_s11 }
  0x61   : > { %p3193_p11 = pnand %p3191_p10, %p3523_p7 }
  0x62   : > { %p3200_p2 = por %p3199_p0, %p3198_p13 }
  0x63   : > { %p3194_p12 = pneg %p3193_p11 }
  0x65   : > { %p3201_p4 = pnand %p3200_p2, %p3194_p12 }
  0x67   : > { %3204 = shalt.err (!%p3201_p4)
}
  0x68   : > { %2761 = dma.hbm_to_vmem [thread:$0]  (!%p3507_p5), %s5218_s2, 16, %s3513_s14, [#allocation6]  }
  0x69   : > { %s3406_s16 = smov [#allocation10]   ;;  %s5219_s4 = sld [smem:[#allocation54_spill]] }
  0x6a   : > { %s259_s17 = sshll.u32 %s3406_s16, 4  ;;  %s260_s17 = int_to_ptr.vmem [resolvable:$true] %s259_s17 }
  0x6f   : > { %s3205_s8 = scalar_lea.hbm %s5219_s4, 32 }
  0x70   : > { %p3206_p6 = scmp.ne.s32.totalorder %s5219_s4, %s3205_s8  ;;  %p3212_p1 = scmp.lt.u32.totalorder %s3205_s8, %s5219_s4 }
  0x72   : > { %p3208_p8 = pnand %p3206_p6, %p3523_p7 }
  0x74   : > { %p3209_p9 = pneg %p3208_p8 }
  0x76   : > { %p3214_p3 = pnand %p3212_p1, %p3209_p9 }
  0x78   : > { %3217 = shalt.err (!%p3214_p3)
}
  0x79   : > { %s3218_s14 = scalar_lea.vmem %s260_s17, 32  ;;  %p3226_p13 = scmp.lt.s32.totalorder %s260_s17, %s260_s17 }
  0x7a   : > { %p3219_p10 = scmp.ne.s32.totalorder %s260_s17, %s3218_s14  ;;  %p3227_p0 = scmp.lt.s32.totalorder %s3218_s14, %s3218_s14 }
  0x7c   : > { %p3221_p11 = pnand %p3219_p10, %p3523_p7  ;;  %p3228_p2 = por %p3227_p0, %p3226_p13 }
  0x7e   : > { %p3222_p12 = pneg %p3221_p11 }
  0x80   : > { %p3229_p4 = pnand %p3228_p2, %p3222_p12 }
  0x82   : > { %3232 = shalt.err (!%p3229_p4)
}
  0x83   : > { %2767 = dma.hbm_to_vmem [thread:$0]  (!%p3507_p5), %s5219_s4, 32, %s260_s17, [#allocation9]  }
  0x84   : > { %s2549_s20 = sadd.s32 4294967294, %s3401_s28   ;;  %s37_s16 = sadd.s32 1, %s3393_s26 }
  0x85   : > { %p38_p7 = scmp.ge.s32.totalorder %s37_s16, 2  ;;  %s40_s12 = sadd.s32 1, %s3397_s27 }
  0x86   : > { %s49_s18 = sadd.s32 1, %s3381_s23  ;;  %p56_p6 = scmp.ne.s32.totalorder %s3381_s23, %s3377_s22 }
  0x87   : > { %s5309_s16 = smov (%p38_p7, %s37_s16), 0  ;;  %s5311_s12 = smov (!%p38_p7, %s40_s12), %s3397_s27 }
  0x88   : > { %5220 = sst [smem:[#allocation19_spill]] %s5309_s16  ;;  %s45_s19 = ssub.s32 %s3393_s26, %s5309_s16 }
  0x89   : > { %p57_p8 = scmp.eq.s32.totalorder %s3401_s28, 0  ;;  %p42_p9 = scmp.ge.s32.totalorder %s5311_s12, 2 }
  0x8a   : > { %p62_p5 = scmp.ne.s32.totalorder %s3377_s22, %s3373_s21  ;;  %s5222_s8 = sadd.s32 4294967295, %s3401_s28  }
  0x8b   : > { %p3618_p1 = por %p57_p8, %p56_p6  ;;  %p172_p3 = scmp.eq.s32.totalorder %s5222_s8, 3 }
  0x8c   : > { %s5313_s12 = smov (%p42_p9, %s5311_s12), 0  ;;  %p5224_p10 = scmp.ne.s32.totalorder %s5212_s30, 0 }
  0x8d   : > { %5223 = sst [smem:[#allocation20_spill]] %s5313_s12  ;;  %p3632_p12 = por %p172_p3, %p56_p6 }
  0x8e   : > { %p3628_p11 = por %p5224_p10, %p62_p5  ;;  %s44_s11 = ssub.s32 %s3397_s27, %s5313_s12 }
  0x8f   : > { %s5226_s13 = scalar_select %p3632_p12, 1, 0 }
  0x90   : > { %p178_p13 = scmp.eq.s32.totalorder %s2549_s20, 3  ;;  %s46_s9 = sor.u32 %s45_s19, %s44_s11 }
  0x91   : > { %p2783_p0 = scmp.lt.s32.totalorder %s3401_s28, 4  ;;  %p47_p2 = scmp.eq.s32.totalorder %s46_s9, 0 }
  0x92   : > { %p3639_p4 = por %p178_p13, %p62_p5  ;;  %s270_s29 = sand.u32 1, %s3381_s23  }
  0x93   : > { %s2557_s15 = sshll.u32 %s3393_s26, 1  ;;  %s2556_s1 = sshll.u32 %s270_s29, 3 }
  0x94   : > { %s5227_s14 = scalar_select %p3639_p4, 1, 0 }
  0x95   : > { %s3646_s8 = scalar_select %p47_p2, %s3381_s23, %s49_s18  }
  0x96   : > { %s2558_s2 = sshll.u32 %s3397_s27, 2  ;;  %s274_s4 = scalar_lea.vmem [#allocation2], %s2556_s1 }
  0x97   : > { %s280_s3 = sadd.s32 %s2558_s2, %s2557_s15  ;;  %s284_s16 = sshll.u32 %s274_s4, 4  ;;  %s3649_s16 = int_to_ptr.vmem [resolvable:$true] %s284_s16 }
  0x98   : > { %s2559_s12 = sshll.u32 %s280_s3, 6  ;;  %p3660_p7 = pnand %p2783_p0, %p3618_p1 }
  0x99   : > { %s3654_s11 = scalar_lea.hbm %s5151_s0, %s2559_s12  ;;  %s271_s1 = scalar_lea.sflag [#allocation3], %s270_s29 }
  0x9a   : > { %s3233_s2 = scalar_lea.hbm %s3654_s11, 128  ;;  %p3235_p8 = pneg %p3660_p7 }
  0x9b   : > { %p3234_p6 = scmp.ne.s32.totalorder %s3654_s11, %s3233_s2  ;;  %s3238_s12 = scalar_lea.hbm %s5151_s0, 512 }
  0x9c   : > { %p3239_p1 = scmp.lt.u32.totalorder %s3654_s11, %s5151_s0  ;;  %p3240_p3 = scmp.lt.u32.totalorder %s3238_s12, %s3233_s2 }
  0x9d   : > { %p3236_p9 = pnand %p3235_p8, %p3234_p6  ;;  %p3242_p13 = scmp.lt.u32.totalorder %s3233_s2, %s3654_s11 }
  0x9e   : > { %p3241_p10 = por %p3240_p3, %p3239_p1 }
  0x9f   : > { %p3237_p5 = pneg %p3236_p9 }
  0xa0   : > { %p3243_p0 = por %p3242_p13, %p3241_p10 }
  0xa2   : > { %p3244_p2 = pnand %p3243_p0, %p3237_p5 }
  0xa4   : > { %3247 = shalt.err (!%p3244_p2)
}
  0xa5   : > { %s3248_s29 = scalar_lea.vmem %s3649_s16, 128  ;;  %s3407_s15 = smov [#allocation2]  }
  0xa6   : > { %p3249_p6 = scmp.ne.s32.totalorder %s3649_s16, %s3248_s29  ;;  %s3253_s20 = sshll.u32 %s3407_s15, 4  ;;  %s3254_s20 = int_to_ptr.vmem [resolvable:$false] %s3253_s20 }
  0xa7   : > { %s3255_s19 = scalar_lea.vmem %s3254_s20, 256  ;;  %p3256_p12 = scmp.lt.s32.totalorder %s3649_s16, %s3254_s20 }
  0xa8   : > { %p3251_p9 = pnand %p3249_p6, %p3235_p8  ;;  %p3257_p1 = scmp.lt.s32.totalorder %s3255_s19, %s3248_s29 }
  0xaa   : > { %p3252_p4 = pneg %p3251_p9  ;;  %p3258_p3 = por %p3257_p1, %p3256_p12 }
  0xac   : > { %p3259_p10 = pnand %p3258_p3, %p3252_p4 }
  0xae   : > { %3262 = shalt.err (!%p3259_p10)
}
  0xaf   : > { %2771 = dma.hbm_to_vmem [thread:$0]  (!%p3660_p7), %s3654_s11, 128, %s3649_s16, %s271_s1  }
  0xb0   : > { %p5229_p5 = scmp.ne.s32.totalorder %s5213_s7, 0 }
  0xb2   : > { %293 = sbr.rel (%p5229_p5) target bundleno = 1053 (0x41d), region = 40 }
  0xb9   : > { %s3692_s2 = sand.u32 1, %s3377_s22  }
  0xba   : > { %s2561_s3 = sshll.u32 %s3692_s2, 3  ;;  %s296_s4 = scalar_lea.sflag [#allocation3], %s3692_s2 }
  0xbb   : > { %s299_s12 = scalar_lea.vmem [#allocation2], %s2561_s3 }
  0xbc   : > { %3352 = dma.done.wait (%p3628_p11), %s296_s4, 128  }
  0xbd   : > { %3354 = vsyncadd (%p3628_p11), %s296_s4, 4294967168  ;;  %p5230_p12 = scmp.ne.s32.totalorder %s5212_s30, 0 }
  0xbf   : > { %3356 = dma.done.wait (%p5230_p12), [#allocation6], 80  }
  0xc0   : > { %3358 = vsyncadd (%p5230_p12), [#allocation6], 4294967216 }
  0xc1   : > { %3360 = dma.done.wait (%p5230_p12), [#allocation9], 160  }
  0xc2   : > { %3362 = vsyncadd (%p5230_p12), [#allocation9], 4294967136  ;;  %v352_v0 = vld [vmem:[%s299_s12] sm:$0xff]  ;;  %v353_v1 = vld [vmem:[#allocation5] sm:$0xf]  ;;  %vm525_vm0 = vcmask 1043456   ;;  %v5165_v47 = vlaneseq }
  0xc3   : > { %364 = vxpose.xlu0.b32.start.end [1/1] (short) %v352_v0, 128  ;;  %2681 = vmatprep.subr.msk.mxu0 %vm525_vm0, %v353_v1  ;;  %v1429_v2 = vld [vmem:[#allocation8] sm:$0xff]  ;;  %v3408_v4 = vmov 0.0   ;;  %v362_v5 = vcombine.high %v352_v0, %v352_v0  ;;  %vm428_vm1 = vcmask 31744   ;;  %v3842_v38 = vld [vmem:[#allocation7] ss:$0 sm:$0xff]  ;;  %s2567_s30 = sshll.u32 %s3692_s2, 9 }
  0xc4   : > { %2682 = vmatpush3.msk.msra.mxu0 %vm525_vm0, %v353_v1  ;;  %v1443_v3 = vcombine.high %v1429_v2, %v1429_v2  ;;  %1560 = vmatprep.mubr.f32.mxu1 %v3408_v4  ;;  %v1433_v50 = vshrl.u32 %v5165_v47, 7  ;;  %v1430_v54 = vld [vmem:[#allocation10] sm:$0x3]  ;;  %s3884_s7 = scalar_lea.vmem [#allocation12], %s2567_s30  ;;  %s2566_s16 = sshll.u32 %s3692_s2, 8 }
  0xc5   : > { %s4313_s10 = scalar_lea.vmem [#allocation11], %s2566_s16  ;;  %s2638_s11 = sshll.u32 %s3385_s24, 5 }
  0xc6   : > { %2731 = vmatprep.subr.msk.mxu1 %vm525_vm0, %v1443_v3  ;;  %2602 = vmatprep.subr.msk.mxu0 %vm525_vm0, %v1443_v3  ;;  %v1434_v53 = vsub.s32 0, %v1433_v50  ;;  %v1438_v55 = vsub.s32 1, %v1433_v50  ;;  %s2639_s18 = sshll.u32 %s3389_s25, 6  ;;  %s2366_s17 = sshll.u32 %s4313_s10, 4  ;;  %s4948_s17 = int_to_ptr.vmem [resolvable:$true] %s2366_s17 }
  0xc7   : > { %2732 = vmatpush1.msk.msra.mxu1 %vm525_vm0, %v1429_v2  ;;  %s4923_s1 = sadd.s32 %s2639_s18, %s2638_s11  ;;  %s2346_s19 = scalar_lea.sflag [#allocation4], %s3692_s2 }
  0xc8   : > { %v3867_v58 = vrot.slane %v1430_v54, %v1434_v53  ;;  %v3872_v60 = vrot.slane %v1430_v54, %v1438_v55  ;;  %s2640_s9 = sshll.u32 %s4923_s1, 7  ;;  %s3263_s3 = scalar_lea.vmem %s4948_s17, 4096 }
  0xc9   : > { %s4958_s20 = scalar_lea.hbm %s5156_s5, %s2640_s9  ;;  %p3264_p11 = scmp.ne.s32.totalorder %s4948_s17, %s3263_s3 }
  0xca   : > { %p5290_p4 = scmp.ne.s32.totalorder %s5226_s13, 0  ;;  %s3409_s4 = smov [#allocation11]  }
  0xcb   : > { %s3267_s12 = sshll.u32 %s3409_s4, 4  ;;  %s3268_s12 = int_to_ptr.vmem [resolvable:$false] %s3267_s12 }
  0xcc   : > { %p3265_p7 = pnand %p3264_p11, %p5290_p4  ;;  %s3269_s30 = scalar_lea.vmem %s3268_s12, 8192 }
  0xcd   : > { %p3270_p13 = scmp.lt.s32.totalorder %s4948_s17, %s3268_s12  ;;  %p3271_p0 = scmp.lt.s32.totalorder %s3269_s30, %s3263_s3 }
  0xce   : > { %p3266_p8 = pneg %p3265_p7 }
  0xcf   : > { %p3272_p2 = por %p3271_p0, %p3270_p13 }
  0xd1   : > { %p3273_p6 = pnand %p3272_p2, %p3266_p8 }
 0x100   : > { %396 = vxpose.xlu0.b32.start.end [1/1] (short) %v362_v5, 128 }
 0x143   : > { %v3714_v6 = vpop.trf.xlu0 }
 0x144   : > { %2683 = vmatprep.mubr.msk.f32.mxu0 %vm428_vm1, %v3714_v6 }
 0x147   : > { %v3718_v7 = vpop.trf.xlu0 }
 0x148   : > { %2684 = vmatmul.mubr.msk.f32.vlgmr.msra.gmra.mrb[0].mxu0 %vm428_vm1, %v3718_v7 }
 0x149   : > { %2603 = vmatpush1.msk.msra.mxu0 %vm525_vm0, %v1429_v2 }
 0x14b   : > { %v3723_v8 = vpop.trf.xlu0 }
 0x14c   : > { %2686 = vmatprep.mubr.msk.f32.mxu0 %vm428_vm1, %v3723_v8 }
 0x14f   : > { %v3727_v9 = vpop.trf.xlu0 }
 0x150   : > { %2687 = vmatmul.mubr.msk.f32.gmra.mrb[2].mxu0 %vm428_vm1, %v3727_v9 }
 0x153   : > { %v3731_v10 = vpop.trf.xlu0 }
 0x154   : > { %2689 = vmatprep.mubr.msk.f32.mxu0 %vm428_vm1, %v3731_v10 }
 0x157   : > { %v3735_v11 = vpop.trf.xlu0 }
 0x158   : > { %2690 = vmatmul.mubr.msk.f32.gmra.mrb[4].mxu0 %vm428_vm1, %v3735_v11 }
 0x15b   : > { %v3739_v12 = vpop.trf.xlu0 }
 0x15c   : > { %2692 = vmatprep.mubr.msk.f32.mxu0 %vm428_vm1, %v3739_v12 }
 0x15f   : > { %v3743_v13 = vpop.trf.xlu0 }
 0x160   : > { %2693 = vmatmul.mubr.msk.f32.gmra.mrb[6].mxu0 %vm428_vm1, %v3743_v13 }
 0x163   : > { %v388_v14 = vpop.trf.xlu0 }
 0x164   : > { %2612 = vmatmul.mubr.msk.f32.vlgmr.msra.gmra.mrb[0].mxu1 %vm428_vm1, %v388_v14  ;;  %2695 = vmatprep.mubr.msk.f32.mxu0 %vm428_vm1, %v388_v14 }
 0x165   : > { %1566 = vmatprep.mubr.f32.mxu1 %v3408_v4 }
 0x167   : > { %v389_v15 = vpop.trf.xlu0 }
 0x168   : > { %2613 = vmatmul.mubr.msk.f32.gmra.mrb[2].mxu1 %vm428_vm1, %v389_v15  ;;  %2696 = vmatmul.mubr.msk.f32.gmra.mrb[8].mxu0 %vm428_vm1, %v389_v15 }
 0x169   : > { %1572 = vmatprep.mubr.f32.mxu1 %v3408_v4 }
 0x16b   : > { %v390_v16 = vpop.trf.xlu0 }
 0x16c   : > { %2614 = vmatmul.mubr.msk.f32.gmra.mrb[4].mxu1 %vm428_vm1, %v390_v16  ;;  %2698 = vmatprep.mubr.msk.f32.mxu0 %vm428_vm1, %v390_v16 }
 0x16d   : > { %1578 = vmatprep.mubr.f32.mxu1 %v3408_v4 }
 0x16f   : > { %v391_v17 = vpop.trf.xlu0 }
 0x170   : > { %2615 = vmatmul.mubr.msk.f32.gmra.mrb[6].mxu1 %vm428_vm1, %v391_v17  ;;  %2699 = vmatmul.mubr.msk.f32.gmra.mrb[10].mxu0 %vm428_vm1, %v391_v17 }
 0x171   : > { %1584 = vmatprep.mubr.f32.mxu1 %v3408_v4 }
 0x173   : > { %v392_v18 = vpop.trf.xlu0 }
 0x174   : > { %2616 = vmatmul.mubr.msk.f32.gmra.mrb[8].mxu1 %vm428_vm1, %v392_v18  ;;  %2701 = vmatprep.mubr.msk.f32.mxu0 %vm428_vm1, %v392_v18 }
 0x175   : > { %1590 = vmatprep.mubr.f32.mxu1 %v3408_v4 }
 0x177   : > { %v393_v19 = vpop.trf.xlu0 }
 0x178   : > { %2617 = vmatmul.mubr.msk.f32.gmra.mrb[10].mxu1 %vm428_vm1, %v393_v19  ;;  %2702 = vmatmul.mubr.msk.f32.gmra.mrb[12].mxu0 %vm428_vm1, %v393_v19 }
 0x179   : > { %1596 = vmatprep.mubr.f32.mxu1 %v3408_v4 }
 0x17b   : > { %v394_v20 = vpop.trf.xlu0 }
 0x17c   : > { %2618 = vmatmul.mubr.msk.f32.gmra.mrb[12].mxu1 %vm428_vm1, %v394_v20  ;;  %2704 = vmatprep.mubr.msk.f32.mxu0 %vm428_vm1, %v394_v20 }
 0x17d   : > { %1602 = vmatprep.mubr.f32.mxu1 %v3408_v4 }
 0x17f   : > { %v395_v21 = vpop.trf.xlu0 }
 0x180   : > { %2619 = vmatmul.mubr.msk.f32.gmra.mrb[14].mxu1 %vm428_vm1, %v395_v21  ;;  %2705 = vmatmul.mubr.msk.f32.gmra.mrb[14].mxu0 %vm428_vm1, %v395_v21 }
 0x181   : > { %1608 = vmatprep.mubr.f32.mxu1 %v3408_v4 }
 0x183   : > { %v412_v22 = vpop.trf.xlu0 }
 0x184   : > { %2707 = vmatprep.mubr.msk.f32.mxu0 %vm428_vm1, %v412_v22  ;;  %2620 = vmatmul.mubr.msk.f32.gmra.mrb[16].mxu1 %vm428_vm1, %v412_v22 }
 0x185   : > { %1614 = vmatprep.mubr.f32.mxu1 %v3408_v4 }
 0x187   : > { %v413_v23 = vpop.trf.xlu0 }
 0x188   : > { %2708 = vmatmul.mubr.msk.f32.gmra.mrb[16].mxu0 %vm428_vm1, %v413_v23  ;;  %2621 = vmatmul.mubr.msk.f32.gmra.mrb[18].mxu1 %vm428_vm1, %v413_v23 }
 0x189   : > { %1620 = vmatprep.mubr.f32.mxu1 %v3408_v4 }
 0x18b   : > { %v414_v24 = vpop.trf.xlu0 }
 0x18c   : > { %2710 = vmatprep.mubr.msk.f32.mxu0 %vm428_vm1, %v414_v24  ;;  %2622 = vmatmul.mubr.msk.f32.gmra.mrb[20].mxu1 %vm428_vm1, %v414_v24 }
 0x18d   : > { %1626 = vmatprep.mubr.f32.mxu1 %v3408_v4 }
 0x18f   : > { %v415_v25 = vpop.trf.xlu0 }
 0x190   : > { %2711 = vmatmul.mubr.msk.f32.gmra.mrb[18].mxu0 %vm428_vm1, %v415_v25  ;;  %2623 = vmatmul.mubr.msk.f32.gmra.mrb[22].mxu1 %vm428_vm1, %v415_v25 }
 0x191   : > { %1632 = vmatprep.mubr.f32.mxu1 %v3408_v4 }
 0x193   : > { %v416_v26 = vpop.trf.xlu0 }
 0x194   : > { %2713 = vmatprep.mubr.msk.f32.mxu0 %vm428_vm1, %v416_v26  ;;  %2624 = vmatmul.mubr.msk.f32.gmra.mrb[24].mxu1 %vm428_vm1, %v416_v26 }
 0x195   : > { %1638 = vmatprep.mubr.f32.mxu1 %v3408_v4 }
 0x197   : > { %v417_v27 = vpop.trf.xlu0 }
 0x198   : > { %2714 = vmatmul.mubr.msk.f32.gmra.mrb[20].mxu0 %vm428_vm1, %v417_v27  ;;  %2625 = vmatmul.mubr.msk.f32.gmra.mrb[26].mxu1 %vm428_vm1, %v417_v27 }
 0x199   : > { %1644 = vmatprep.mubr.f32.mxu1 %v3408_v4 }
 0x19b   : > { %v418_v28 = vpop.trf.xlu0 }
 0x19c   : > { %2716 = vmatprep.mubr.msk.f32.mxu0 %vm428_vm1, %v418_v28  ;;  %2626 = vmatmul.mubr.msk.f32.gmra.mrb[28].mxu1 %vm428_vm1, %v418_v28 }
 0x19d   : > { %1650 = vmatprep.mubr.f32.mxu1 %v3408_v4 }
 0x19f   : > { %v419_v29 = vpop.trf.xlu0 }
 0x1a0   : > { %2717 = vmatmul.mubr.msk.f32.gmra.mrb[22].mxu0 %vm428_vm1, %v419_v29  ;;  %2627 = vmatmul.mubr.msk.f32.gmra.mrb[30].mxu1 %vm428_vm1, %v419_v29 }
 0x1a1   : > { %1656 = vmatprep.mubr.f32.mxu1 %v3408_v4 }
 0x1a3   : > { %v420_v30 = vpop.trf.xlu0 }
 0x1a4   : > { %2719 = vmatprep.mubr.msk.f32.mxu0 %vm428_vm1, %v420_v30  ;;  %2628 = vmatmul.mubr.msk.f32.gmra.mrb[32].mxu1 %vm428_vm1, %v420_v30 }
 0x1a5   : > { %1662 = vmatprep.mubr.f32.mxu1 %v3408_v4 }
 0x1a7   : > { %v421_v31 = vpop.trf.xlu0 }
 0x1a8   : > { %2720 = vmatmul.mubr.msk.f32.gmra.mrb[24].mxu0 %vm428_vm1, %v421_v31  ;;  %2629 = vmatmul.mubr.msk.f32.gmra.mrb[34].mxu1 %vm428_vm1, %v421_v31 }
 0x1a9   : > { %1668 = vmatprep.mubr.f32.mxu1 %v3408_v4 }
 0x1ab   : > { %v422_v32 = vpop.trf.xlu0 }
 0x1ac   : > { %2722 = vmatprep.mubr.msk.f32.mxu0 %vm428_vm1, %v422_v32  ;;  %2630 = vmatmul.mubr.msk.f32.gmra.mrb[36].mxu1 %vm428_vm1, %v422_v32 }
 0x1ad   : > { %1674 = vmatprep.mubr.f32.mxu1 %v3408_v4 }
 0x1af   : > { %v423_v33 = vpop.trf.xlu0 }
 0x1b0   : > { %2723 = vmatmul.mubr.msk.f32.gmra.mrb[26].mxu0 %vm428_vm1, %v423_v33  ;;  %2631 = vmatmul.mubr.msk.f32.gmra.mrb[38].mxu1 %vm428_vm1, %v423_v33 }
 0x1b1   : > { %1680 = vmatprep.mubr.f32.mxu1 %v3408_v4 }
 0x1b3   : > { %v424_v34 = vpop.trf.xlu0 }
 0x1b4   : > { %2725 = vmatprep.mubr.msk.f32.mxu0 %vm428_vm1, %v424_v34  ;;  %2632 = vmatmul.mubr.msk.f32.gmra.mrb[40].mxu1 %vm428_vm1, %v424_v34 }
 0x1b5   : > { %1686 = vmatprep.mubr.f32.mxu1 %v3408_v4 }
 0x1b7   : > { %v425_v35 = vpop.trf.xlu0 }
 0x1b8   : > { %2726 = vmatmul.mubr.msk.f32.gmra.mrb[28].mxu0 %vm428_vm1, %v425_v35  ;;  %2633 = vmatmul.mubr.msk.f32.gmra.mrb[42].mxu1 %vm428_vm1, %v425_v35 }
 0x1b9   : > { %1692 = vmatprep.mubr.f32.mxu1 %v3408_v4 }
 0x1bb   : > { %v426_v36 = vpop.trf.xlu0 }
 0x1bc   : > { %2728 = vmatprep.mubr.msk.f32.mxu0 %vm428_vm1, %v426_v36  ;;  %2634 = vmatmul.mubr.msk.f32.gmra.mrb[44].mxu1 %vm428_vm1, %v426_v36 }
 0x1bd   : > { %1698 = vmatprep.mubr.f32.mxu1 %v3408_v4 }
 0x1bf   : > { %v427_v37 = vpop.trf.xlu0 }
 0x1c0   : > { %2729 = vmatmul.mubr.msk.f32.gmra.mrb[30].mxu0 %vm428_vm1, %v427_v37  ;;  %2635 = vmatmul.mubr.msk.f32.gmra.mrb[46].mxu1 %vm428_vm1, %v427_v37 }
 0x1c1   : > { %1512 = vmatprep.mubr.f32.mxu0 %v3408_v4 }
 0x1c4   : > { %2604 = vmatmul.mubr.msk.f32.vlgmr.msra.gmra.mrb[32].mxu0 %vm428_vm1, %v3714_v6 }
 0x1c5   : > { %1518 = vmatprep.mubr.f32.mxu0 %v3408_v4 }
 0x1c8   : > { %2605 = vmatmul.mubr.msk.f32.gmra.mrb[34].mxu0 %vm428_vm1, %v3718_v7 }
 0x1c9   : > { %1524 = vmatprep.mubr.f32.mxu0 %v3408_v4 }
 0x1cc   : > { %2606 = vmatmul.mubr.msk.f32.gmra.mrb[36].mxu0 %vm428_vm1, %v3723_v8 }
 0x1cd   : > { %1530 = vmatprep.mubr.f32.mxu0 %v3408_v4 }
 0x1d0   : > { %2607 = vmatmul.mubr.msk.f32.gmra.mrb[38].mxu0 %vm428_vm1, %v3727_v9 }
 0x1d1   : > { %1536 = vmatprep.mubr.f32.mxu0 %v3408_v4 }
 0x1d4   : > { %2608 = vmatmul.mubr.msk.f32.gmra.mrb[40].mxu0 %vm428_vm1, %v3731_v10 }
 0x1d5   : > { %1542 = vmatprep.mubr.f32.mxu0 %v3408_v4 }
 0x1d8   : > { %2609 = vmatmul.mubr.msk.f32.gmra.mrb[42].mxu0 %vm428_vm1, %v3735_v11 }
 0x1d9   : > { %1548 = vmatprep.mubr.f32.mxu0 %v3408_v4 }
 0x1dc   : > { %2610 = vmatmul.mubr.msk.f32.gmra.mrb[44].mxu0 %vm428_vm1, %v3739_v12 }
 0x1dd   : > { %1554 = vmatprep.mubr.f32.mxu0 %v3408_v4 }
 0x1e0   : > { %2611 = vmatmul.mubr.msk.f32.gmra.mrb[46].mxu0 %vm428_vm1, %v3743_v13 }
 0x21b   : > { %v2685_v39 = vpop.f32.mrb[0].mxu0 }
 0x21c   : > { %v3845_v40 = vadd.f32 %v2685_v39, %v3842_v38  ;;  %v595_v41 = vpop.f32.mrb[1].mxu0 }
 0x21d   : > { %v3849_v42 = vadd.f32 %v3842_v38, %v595_v41 }
 0x21e   : > { %756 = vadd.xlane.f32.xlu1 %v3845_v40  ;;  %v851_v44 = vmul.f32 %v3845_v40, %v3845_v40 }
 0x21f   : > { %v850_v46 = vmul.f32 %v3849_v42, %v3849_v42 }
 0x222   : > { %754 = vadd.xlane.f32.xlu1 %v3849_v42 }
 0x223   : > { %v2688_v43 = vpop.f32.mrb[2].mxu0 }
 0x224   : > { %v605_v45 = vpop.f32.mrb[3].mxu0  ;;  %v3857_v48 = vadd.f32 %v2688_v43, %v3842_v38 }
 0x225   : > { %v3862_v52 = vadd.f32 %v3842_v38, %v605_v45 }
 0x226   : > { %884 = vadd.xlane.f32.xlu1 %v851_v44  ;;  %v853_v57 = vmul.f32 %v3857_v48, %v3857_v48 }
 0x227   : > { %v852_v63 = vmul.f32 %v3862_v52, %v3862_v52 }
 0x22a   : > { %882 = vadd.xlane.f32.xlu1 %v850_v46 }
 0x22b   : > { %v2691_v49 = vpop.f32.mrb[4].mxu0 }
 0x22c   : > { %v615_v51 = vpop.f32.mrb[5].mxu0  ;;  %v3881_v2 = vadd.f32 %v2691_v49, %v3842_v38 }
 0x22d   : > { %v3900_v11 = vadd.f32 %v3842_v38, %v615_v51 }
 0x22e   : > { %760 = vadd.xlane.f32.xlu1 %v3857_v48  ;;  %v855_v18 = vmul.f32 %v3881_v2, %v3881_v2 }
 0x22f   : > { %v854_v25 = vmul.f32 %v3900_v11, %v3900_v11 }
 0x232   : > { %758 = vadd.xlane.f32.xlu1 %v3862_v52 }
 0x233   : > { %v2694_v56 = vpop.f32.mrb[6].mxu0 }
 0x234   : > { %v3869_v59 = vpop.f32.mrb[7].mxu0  ;;  %v3929_v28 = vadd.f32 %v2694_v56, %v3842_v38 }
 0x235   : > { %v3948_v39 = vadd.f32 %v3842_v38, %v3869_v59 }
 0x236   : > { %888 = vadd.xlane.f32.xlu1 %v853_v57  ;;  %v857_v50 = vmul.f32 %v3929_v28, %v3929_v28 }
 0x237   : > { %v1562_v61 = vpop.f32.mrb[0].mxu1  ;;  %v856_v57 = vmul.f32 %v3948_v39, %v3948_v39 }
 0x238   : > { %v3875_v62 = vadd.f32 %v1562_v61, %v3867_v58  ;;  %v1564_v0 = vpop.f32.mrb[1].mxu1 }
 0x239   : > { %v1565_v1 = vadd.f32 %v1564_v0, %v3872_v60 }
 0x23a   : > { %886 = vadd.xlane.f32.xlu1 %v852_v63  ;;  %1721 = vadd.xlane.f32.xlu0 %v3875_v62 }
 0x23b   : > { %2298 = vst [vmem:[%s3884_s7 + $0x88] sm:$0xff] %v1565_v1  ;;  %v1568_v3 = vpop.f32.mrb[2].mxu1  ;;  %v3887_v4 = vpop.f32.mrb[8].mxu0  ;;  %v1809_v1 = vmul.f32 %v3875_v62, %v3875_v62 }
 0x23c   : > { %v3890_v5 = vadd.f32 %v1568_v3, %v3867_v58  ;;  %v1570_v6 = vpop.f32.mrb[3].mxu1  ;;  %v3892_v7 = vpop.f32.mrb[9].mxu0 }
 0x23d   : > { %v1571_v8 = vadd.f32 %v1570_v6, %v3872_v60 }
 0x23e   : > { %764 = vadd.xlane.f32.xlu1 %v3881_v2  ;;  %v1810_v9 = vmul.f32 %v3890_v5, %v3890_v5 }
 0x23f   : > { %2300 = vst [vmem:[%s3884_s7 + $0x98] sm:$0xff] %v1571_v8  ;;  %v1574_v10 = vpop.f32.mrb[4].mxu1 }
 0x240   : > { %1851 = vadd.xlane.f32.xlu0 %v1810_v9  ;;  %v3903_v12 = vadd.f32 %v1574_v10, %v3867_v58  ;;  %v1576_v13 = vpop.f32.mrb[5].mxu1 }
 0x241   : > { %v1577_v14 = vadd.f32 %v1576_v13, %v3872_v60 }
 0x242   : > { %762 = vadd.xlane.f32.xlu1 %v3900_v11 }
 0x243   : > { %2302 = vst [vmem:[%s3884_s7 + $0xa8] sm:$0xff] %v1577_v14  ;;  %v1580_v15 = vpop.f32.mrb[6].mxu1  ;;  %v3908_v16 = vpop.f32.mrb[10].mxu0  ;;  %v3984_v14 = vadd.f32 %v3887_v4, %v3842_v38 }
 0x244   : > { %v3911_v17 = vadd.f32 %v1580_v15, %v3867_v58  ;;  %1725 = vadd.xlane.f32.xlu0 %v3903_v12  ;;  %v1582_v19 = vpop.f32.mrb[7].mxu1  ;;  %v3916_v20 = vpop.f32.mrb[11].mxu0 }
 0x245   : > { %v1583_v21 = vadd.f32 %v1582_v19, %v3872_v60 }
 0x246   : > { %892 = vadd.xlane.f32.xlu1 %v855_v18  ;;  %v1812_v22 = vmul.f32 %v3911_v17, %v3911_v17 }
 0x247   : > { %2304 = vst [vmem:[%s3884_s7 + $0xb8] sm:$0xff] %v1583_v21  ;;  %v1586_v23 = vpop.f32.mrb[8].mxu1 }
 0x248   : > { %1855 = vadd.xlane.f32.xlu0 %v1812_v22  ;;  %v3923_v24 = vadd.f32 %v1586_v23, %v3867_v58  ;;  %v1588_v26 = vpop.f32.mrb[9].mxu1 }
 0x249   : > { %v1589_v27 = vadd.f32 %v1588_v26, %v3872_v60 }
 0x24a   : > { %5231 = vst [vmem:[#allocation21_spill] sm:$0xff] %v3923_v24  ;;  %890 = vadd.xlane.f32.xlu1 %v854_v25 }
 0x24b   : > { %2306 = vst [vmem:[%s3884_s7 + $0xc8] sm:$0xff] %v1589_v27  ;;  %v1592_v29 = vpop.f32.mrb[10].mxu1  ;;  %v3932_v30 = vpop.f32.mrb[12].mxu0 }
 0x24c   : > { %v3935_v31 = vadd.f32 %v1592_v29, %v3867_v58  ;;  %1729 = vadd.xlane.f32.xlu0 %v3923_v24  ;;  %v655_v32 = vpop.f32.mrb[13].mxu0  ;;  %v1594_v33 = vpop.f32.mrb[11].mxu1 }
 0x24d   : > { %v3939_v34 = vadd.f32 %v3842_v38, %v655_v32  ;;  %v1595_v35 = vadd.f32 %v1594_v33, %v3872_v60  ;;  %v4009_v33 = vadd.f32 %v3842_v38, %v3892_v7  ;;  %v859_v7 = vmul.f32 %v3984_v14, %v3984_v14 }
 0x24e   : > { %768 = vadd.xlane.f32.xlu1 %v3929_v28  ;;  %v1814_v36 = vmul.f32 %v3935_v31, %v3935_v31 }
 0x24f   : > { %5232 = vst [vmem:[#allocation22_spill] sm:$0xff] %v3939_v34  ;;  %2308 = vst [vmem:[%s3884_s7 + $0xd8] sm:$0xff] %v1595_v35  ;;  %v1598_v37 = vpop.f32.mrb[12].mxu1  ;;  %v862_v41 = vmul.f32 %v3939_v34, %v3939_v34 }
 0x250   : > { %1859 = vadd.xlane.f32.xlu0 %v1814_v36  ;;  %v1600_v43 = vpop.f32.mrb[13].mxu1  ;;  %v3958_v49 = vadd.f32 %v1598_v37, %v3867_v58 }
 0x251   : > { %v1601_v44 = vadd.f32 %v1600_v43, %v3872_v60 }
 0x252   : > { %766 = vadd.xlane.f32.xlu1 %v3948_v39  ;;  %5233 = vst [vmem:[#allocation23_spill] sm:$0xff] %v3958_v49 }
 0x253   : > { %2310 = vst [vmem:[%s3884_s7 + $0xe8] sm:$0xff] %v1601_v44  ;;  %v1604_v45 = vpop.f32.mrb[14].mxu1  ;;  %v3955_v46 = vpop.f32.mrb[14].mxu0 }
 0x254   : > { %906 = vadd.xlane.f32.xlu0 %v862_v41  ;;  %v3963_v51 = vadd.f32 %v1604_v45, %v3867_v58  ;;  %v665_v53 = vpop.f32.mrb[15].mxu0  ;;  %v1606_v54 = vpop.f32.mrb[15].mxu1 }
 0x255   : > { %v1607_v55 = vadd.f32 %v1606_v54, %v3872_v60  ;;  %v3971_v59 = vadd.f32 %v3842_v38, %v665_v53 }
 0x256   : > { %5234 = vst [vmem:[#allocation24_spill] sm:$0xff] %v3963_v51  ;;  %896 = vadd.xlane.f32.xlu1 %v857_v50  ;;  %v1816_v61 = vmul.f32 %v3963_v51, %v3963_v51 }
 0x257   : > { %2312 = vst [vmem:[%s3884_s7 + $0xf8] sm:$0xff] %v1607_v55  ;;  %v1610_v56 = vpop.f32.mrb[16].mxu1  ;;  %5235 = vst [vmem:[#allocation25_spill] sm:$0xff] %v3971_v59  ;;  %v864_v8 = vmul.f32 %v3971_v59, %v3971_v59 }
 0x258   : > { %1733 = vadd.xlane.f32.xlu0 %v3958_v49  ;;  %v1612_v63 = vpop.f32.mrb[17].mxu1  ;;  %v3997_v4 = vadd.f32 %v1610_v56, %v3867_v58 }
 0x259   : > { %v1613_v0 = vadd.f32 %v1612_v63, %v3872_v60 }
 0x25a   : > { %894 = vadd.xlane.f32.xlu1 %v856_v57  ;;  %5237 = vst [vmem:[#allocation27_spill] sm:$0xff] %v3997_v4  ;;  %v858_v57 = vmul.f32 %v4009_v33, %v4009_v33 }
 0x25b   : > { %v2709_v3 = vpop.f32.mrb[16].mxu0  ;;  %2314 = vst [vmem:[%s3884_s7 + $0x108] sm:$0xff] %v1613_v0  ;;  %v1616_v6 = vpop.f32.mrb[18].mxu1 }
 0x25c   : > { %1863 = vadd.xlane.f32.xlu0 %v1816_v61  ;;  %v675_v9 = vpop.f32.mrb[17].mxu0  ;;  %v1618_v10 = vpop.f32.mrb[19].mxu1  ;;  %v3988_v18 = vadd.f32 %v2709_v3, %v3842_v38  ;;  %v4013_v35 = vadd.f32 %v1616_v6, %v3867_v58 }
 0x25d   : > { %v1619_v13 = vadd.f32 %v1618_v10, %v3872_v60  ;;  %v4000_v25 = vadd.f32 %v3842_v38, %v675_v9 }
 0x25e   : > { %1849 = vadd.xlane.f32.xlu1 %v1809_v1  ;;  %5236 = vst [vmem:[#allocation26_spill] sm:$0xff] %v3988_v18  ;;  %5239 = vst [vmem:[#allocation29_spill] sm:$0xff] %v4013_v35  ;;  %v1818_v50 = vmul.f32 %v4013_v35, %v4013_v35  ;;  %v1811_v1 = vmul.f32 %v3903_v12, %v3903_v12 }
 0x25f   : > { %2316 = vst [vmem:[%s3884_s7 + $0x118] sm:$0xff] %v1619_v13  ;;  %v1622_v15 = vpop.f32.mrb[20].mxu1  ;;  %5238 = vst [vmem:[#allocation28_spill] sm:$0xff] %v4000_v25  ;;  %v866_v36 = vmul.f32 %v4000_v25, %v4000_v25 }
 0x260   : > { %910 = vadd.xlane.f32.xlu0 %v864_v8  ;;  %v1624_v19 = vpop.f32.mrb[21].mxu1  ;;  %v4046_v8 = vadd.f32 %v1622_v15, %v3867_v58 }
 0x261   : > { %v1625_v21 = vadd.f32 %v1624_v19, %v3872_v60 }
 0x262   : > { %772 = vadd.xlane.f32.xlu1 %v3984_v14 }
 0x263   : > { %v3992_v22 = vpop.f32.mrb[18].mxu0  ;;  %2318 = vst [vmem:[%s3884_s7 + $0x128] sm:$0xff] %v1625_v21  ;;  %v1628_v23 = vpop.f32.mrb[22].mxu1  ;;  %v4054_v21 = vadd.f32 %v3908_v16, %v3842_v38 }
 0x264   : > { %788 = vadd.xlane.f32.xlu0 %v3988_v18  ;;  %v685_v26 = vpop.f32.mrb[19].mxu0  ;;  %v1630_v27 = vpop.f32.mrb[23].mxu1  ;;  %v4061_v15 = vadd.f32 %v1628_v23, %v3867_v58 }
 0x265   : > { %v1631_v29 = vadd.f32 %v1630_v27, %v3872_v60  ;;  %v4025_v45 = vadd.f32 %v3842_v38, %v685_v26  ;;  %5241 = vst [vmem:[#allocation31_spill] sm:$0xff] %v4054_v21 }
 0x266   : > { %1723 = vadd.xlane.f32.xlu1 %v3890_v5  ;;  %v1820_v23 = vmul.f32 %v4061_v15, %v4061_v15 }
 0x267   : > { %2320 = vst [vmem:[%s3884_s7 + $0x138] sm:$0xff] %v1631_v29  ;;  %v4005_v32 = vpop.f32.mrb[24].mxu1  ;;  %5240 = vst [vmem:[#allocation30_spill] sm:$0xff] %v4025_v45  ;;  %v868_v61 = vmul.f32 %v4025_v45, %v4025_v45 }
 0x268   : > { %1737 = vadd.xlane.f32.xlu0 %v3997_v4  ;;  %v1636_v37 = vpop.f32.mrb[25].mxu1 }
 0x269   : > { %v1637_v41 = vadd.f32 %v1636_v37, %v3872_v60 }
 0x26a   : > { %770 = vadd.xlane.f32.xlu1 %v4009_v33 }
 0x26b   : > { %v4019_v43 = vpop.f32.mrb[20].mxu0  ;;  %2322 = vst [vmem:[%s3884_s7 + $0x148] sm:$0xff] %v1637_v41  ;;  %v1640_v44 = vpop.f32.mrb[26].mxu1 }
 0x26c   : > { %914 = vadd.xlane.f32.xlu0 %v866_v36  ;;  %v695_v53 = vpop.f32.mrb[21].mxu0  ;;  %v1642_v54 = vpop.f32.mrb[27].mxu1 }
 0x26d   : > { %v1643_v55 = vadd.f32 %v1642_v54, %v3872_v60  ;;  %v4049_v9 = vadd.f32 %v3842_v38, %v695_v53 }
 0x26e   : > { %900 = vadd.xlane.f32.xlu1 %v859_v7 }
 0x26f   : > { %2324 = vst [vmem:[%s3884_s7 + $0x158] sm:$0xff] %v1643_v55  ;;  %v4031_v56 = vpop.f32.mrb[28].mxu1  ;;  %v870_v27 = vmul.f32 %v4049_v9, %v4049_v9  ;;  %v4084_v55 = vadd.f32 %v3842_v38, %v3916_v20  ;;  %v861_v20 = vmul.f32 %v4054_v21, %v4054_v21 }
 0x270   : > { %1867 = vadd.xlane.f32.xlu0 %v1818_v50  ;;  %v1648_v63 = vpop.f32.mrb[29].mxu1 }
 0x271   : > { %v1649_v0 = vadd.f32 %v1648_v63, %v3872_v60  ;;  %5242 = vst [vmem:[#allocation32_spill] sm:$0xff] %v4084_v55 }
 0x272   : > { %898 = vadd.xlane.f32.xlu1 %v858_v57 }
 0x273   : > { %v4040_v3 = vpop.f32.mrb[22].mxu0  ;;  %2326 = vst [vmem:[%s3884_s7 + $0x168] sm:$0xff] %v1649_v0  ;;  %v4043_v6 = vpop.f32.mrb[30].mxu1 }
 0x274   : > { %918 = vadd.xlane.f32.xlu0 %v868_v61  ;;  %v705_v10 = vpop.f32.mrb[23].mxu0  ;;  %v1654_v13 = vpop.f32.mrb[31].mxu1 }
 0x275   : > { %v1655_v19 = vadd.f32 %v1654_v13, %v3872_v60  ;;  %v4073_v41 = vadd.f32 %v3842_v38, %v705_v10  ;;  %v4101_v13 = vadd.f32 %v1640_v44, %v3867_v58 }
 0x276   : > { %1853 = vadd.xlane.f32.xlu1 %v1811_v1 }
 0x277   : > { %2328 = vst [vmem:[%s3884_s7 + $0x178] sm:$0xff] %v1655_v19  ;;  %v4057_v26 = vpop.f32.mrb[32].mxu1  ;;  %v872_v61 = vmul.f32 %v4073_v41, %v4073_v41  ;;  %5243 = vst [vmem:[#allocation33_spill] sm:$0xff] %v4101_v13  ;;  %v1822_v44 = vmul.f32 %v4101_v13, %v4101_v13 }
 0x278   : > { %1741 = vadd.xlane.f32.xlu0 %v4046_v8  ;;  %v1660_v29 = vpop.f32.mrb[33].mxu1 }
 0x279   : > { %v1661_v36 = vadd.f32 %v1660_v29, %v3872_v60 }
 0x27a   : > { %776 = vadd.xlane.f32.xlu1 %v4054_v21 }
 0x27b   : > { %v4067_v16 = vpop.f32.mrb[24].mxu0  ;;  %2330 = vst [vmem:[%s3884_s7 + $0x188] sm:$0xff] %v1661_v36  ;;  %v4070_v37 = vpop.f32.mrb[34].mxu1 }
 0x27c   : > { %922 = vadd.xlane.f32.xlu0 %v870_v27  ;;  %v715_v7 = vpop.f32.mrb[25].mxu0  ;;  %v1666_v50 = vpop.f32.mrb[35].mxu1 }
 0x27d   : > { %v1667_v53 = vadd.f32 %v1666_v50, %v3872_v60  ;;  %v4087_v57 = vadd.f32 %v3842_v38, %v715_v7  ;;  %v860_v7 = vmul.f32 %v4084_v55, %v4084_v55 }
 0x27e   : > { %1727 = vadd.xlane.f32.xlu1 %v3911_v17 }
 0x27f   : > { %2332 = vst [vmem:[%s3884_s7 + $0x198] sm:$0xff] %v1667_v53  ;;  %v4080_v54 = vpop.f32.mrb[36].mxu1  ;;  %v874_v19 = vmul.f32 %v4087_v57, %v4087_v57 }
 0x280   : > { %1871 = vadd.xlane.f32.xlu0 %v1820_v23  ;;  %v1672_v63 = vpop.f32.mrb[37].mxu1 }
 0x281   : > { %v1673_v0 = vadd.f32 %v1672_v63, %v3872_v60  ;;  %v1813_v63 = vmul.f32 %v3923_v24, %v3923_v24 }
 0x282   : > { %774 = vadd.xlane.f32.xlu1 %v4084_v55 }
 0x283   : > { %v4093_v1 = vpop.f32.mrb[26].mxu0  ;;  %2334 = vst [vmem:[%s3884_s7 + $0x1a8] sm:$0xff] %v1673_v0  ;;  %v4096_v10 = vpop.f32.mrb[38].mxu1 }
 0x284   : > { %926 = vadd.xlane.f32.xlu0 %v872_v61  ;;  %v725_v27 = vpop.f32.mrb[27].mxu0  ;;  %v1678_v29 = vpop.f32.mrb[39].mxu1 }
 0x285   : > { %v1679_v36 = vadd.f32 %v1678_v29, %v3872_v60  ;;  %v4112_v50 = vadd.f32 %v3842_v38, %v725_v27 }
 0x286   : > { %904 = vadd.xlane.f32.xlu1 %v861_v20 }
 0x287   : > { %2336 = vst [vmem:[%s3884_s7 + $0x1b8] sm:$0xff] %v1679_v36  ;;  %v4107_v23 = vpop.f32.mrb[40].mxu1  ;;  %v876_v27 = vmul.f32 %v4112_v50, %v4112_v50 }
 0x288   : > { %930 = vadd.xlane.f32.xlu0 %v874_v19  ;;  %v1684_v53 = vpop.f32.mrb[41].mxu1 }
 0x289   : > { %v1685_v61 = vadd.f32 %v1684_v53, %v3872_v60  ;;  %v4132_v53 = vadd.f32 %v3932_v30, %v3842_v38 }
 0x28a   : > { %902 = vadd.xlane.f32.xlu1 %v860_v7 }
 0x28b   : > { %v4119_v0 = vpop.f32.mrb[28].mxu0  ;;  %2338 = vst [vmem:[%s3884_s7 + $0x1c8] sm:$0xff] %v1685_v61  ;;  %v4122_v20 = vpop.f32.mrb[42].mxu1  ;;  %5244 = vst [vmem:[#allocation34_spill] sm:$0xff] %v4132_v53 }
 0x28c   : > { %1875 = vadd.xlane.f32.xlu0 %v1822_v44  ;;  %v735_v19 = vpop.f32.mrb[29].mxu0  ;;  %v1690_v29 = vpop.f32.mrb[43].mxu1  ;;  %v4139_v44 = vadd.f32 %v4043_v6, %v3867_v58 }
 0x28d   : > { %v4127_v36 = vadd.f32 %v3842_v38, %v735_v19  ;;  %v1691_v7 = vadd.f32 %v1690_v29, %v3872_v60 }
 0x28e   : > { %1857 = vadd.xlane.f32.xlu1 %v1813_v63  ;;  %5245 = vst [vmem:[#allocation35_spill] sm:$0xff] %v4139_v44  ;;  %v1824_v6 = vmul.f32 %v4139_v44, %v4139_v44 }
 0x28f   : > { %2340 = vst [vmem:[%s3884_s7 + $0x1d8] sm:$0xff] %v1691_v7  ;;  %v4135_v61 = vpop.f32.mrb[44].mxu1  ;;  %v878_v47 = vmul.f32 %v4127_v36, %v4127_v36 }
 0x290   : > { %934 = vadd.xlane.f32.xlu0 %v876_v27  ;;  %v1696_v19 = vpop.f32.mrb[45].mxu1 }
 0x291   : > { %v1697_v13 = vadd.f32 %v1696_v19, %v3872_v60 }
 0x292   : > { %780 = vadd.xlane.f32.xlu1 %v4132_v53 }
 0x293   : > { %v4145_v30 = vpop.f32.mrb[30].mxu0  ;;  %2342 = vst [vmem:[%s3884_s7 + $0x1e8] sm:$0xff] %v1697_v13  ;;  %v4148_v63 = vpop.f32.mrb[46].mxu1 }
 0x294   : > { %938 = vadd.xlane.f32.xlu0 %v878_v47  ;;  %v745_v27 = vpop.f32.mrb[31].mxu0 }
 0x295   : > { %v4153_v29 = vadd.f32 %v3842_v38, %v745_v27  ;;  %v863_v27 = vmul.f32 %v4132_v53, %v4132_v53 }
 0x296   : > { %1731 = vadd.xlane.f32.xlu1 %v3935_v31 }
 0x297   : > { %v1514_v7 = vpop.f32.mrb[32].mxu0  ;;  %v880_v24 = vmul.f32 %v4153_v29, %v4153_v29 }
 0x298   : > { %1879 = vadd.xlane.f32.xlu0 %v1824_v6  ;;  %v1516_v19 = vpop.f32.mrb[33].mxu0  ;;  %v4165_v6 = vadd.f32 %v1514_v7, %v3867_v58 }
 0x299   : > { %v1517_v13 = vadd.f32 %v1516_v19, %v3872_v60  ;;  %v1815_v19 = vmul.f32 %v3958_v49, %v3958_v49 }
 0x29a   : > { %778 = vadd.xlane.f32.xlu1 %v3939_v34 }
 0x29b   : > { %2282 = vst [vmem:[%s3884_s7 + $0x8] sm:$0xff] %v1517_v13  ;;  %v1520_v47 = vpop.f32.mrb[34].mxu0  ;;  %v1702_v13 = vpop.f32.mrb[47].mxu1 }
 0x29c   : > { %v1522_v55 = vpop.f32.mrb[35].mxu0  ;;  %942 = vadd.xlane.f32.xlu0 %v880_v24  ;;  %v4168_v21 = vadd.f32 %v1520_v47, %v3867_v58  ;;  %v1703_v24 = vadd.f32 %v1702_v13, %v3872_v60  ;;  %v4183_v47 = vadd.f32 %v3955_v46, %v3842_v38 }
 0x29d   : > { %v1523_v44 = vadd.f32 %v1522_v55, %v3872_v60  ;;  %v4177_v55 = vadd.f32 %v4070_v37, %v3867_v58 }
 0x29e   : > { %5246 = vst [vmem:[#allocation36_spill] sm:$0xff] %v4168_v21  ;;  %908 = vadd.xlane.f32.xlu1 %v863_v27  ;;  %2344 = vst [vmem:[%s3884_s7 + $0x1f8] sm:$0xff] %v1703_v24 }
 0x29f   : > { %2284 = vst [vmem:[%s3884_s7 + $0x18] sm:$0xff] %v1523_v44  ;;  %v1526_v34 = vpop.f32.mrb[36].mxu0  ;;  %5247 = vst [vmem:[#allocation37_spill] sm:$0xff] %v4177_v55  ;;  %v1802_v44 = vmul.f32 %v4168_v21, %v4168_v21  ;;  %v1826_v37 = vmul.f32 %v4177_v55, %v4177_v55 }
 0x2a0   : > { %v1528_v53 = vpop.f32.mrb[37].mxu0  ;;  %1705 = vadd.xlane.f32.xlu0 %v4165_v6  ;;  %5248 = vst [vmem:[#allocation38_spill] sm:$0xff] %v4183_v47  ;;  %v4195_v24 = vadd.f32 %v1526_v34, %v3867_v58 }
 0x2a1   : > { %v1529_v7 = vadd.f32 %v1528_v53, %v3872_v60 }
 0x2a2   : > { %1861 = vadd.xlane.f32.xlu1 %v1815_v19  ;;  %5249 = vst [vmem:[#allocation39_spill] sm:$0xff] %v4195_v24 }
 0x2a3   : > { %2286 = vst [vmem:[%s3884_s7 + $0x28] sm:$0xff] %v1529_v7  ;;  %v1532_v27 = vpop.f32.mrb[38].mxu0 }
 0x2a4   : > { %v1534_v13 = vpop.f32.mrb[39].mxu0  ;;  %1835 = vadd.xlane.f32.xlu0 %v1802_v44  ;;  %v4198_v7 = vadd.f32 %v1532_v27, %v3867_v58 }
 0x2a5   : > { %v1535_v49 = vadd.f32 %v1534_v13, %v3872_v60 }
 0x2a6   : > { %784 = vadd.xlane.f32.xlu1 %v4183_v47  ;;  %5250 = vst [vmem:[#allocation40_spill] sm:$0xff] %v4198_v7  ;;  %v1804_v27 = vmul.f32 %v4198_v7, %v4198_v7 }
 0x2a7   : > { %2288 = vst [vmem:[%s3884_s7 + $0x38] sm:$0xff] %v1535_v49  ;;  %v1538_v53 = vpop.f32.mrb[40].mxu0 }
 0x2a8   : > { %v1540_v46 = vpop.f32.mrb[41].mxu0  ;;  %1883 = vadd.xlane.f32.xlu0 %v1826_v37  ;;  %v4207_v37 = vadd.f32 %v4096_v10, %v3867_v58  ;;  %v4224_v21 = vadd.f32 %v1538_v53, %v3867_v58 }
 0x2a9   : > { %v1541_v19 = vadd.f32 %v1540_v46, %v3872_v60 }
 0x2aa   : > { %1735 = vadd.xlane.f32.xlu1 %v3963_v51  ;;  %5251 = vst [vmem:[#allocation41_spill] sm:$0xff] %v4207_v37  ;;  %v865_v51 = vmul.f32 %v4183_v47, %v4183_v47  ;;  %v1828_v10 = vmul.f32 %v4207_v37, %v4207_v37 }
 0x2ab   : > { %2290 = vst [vmem:[%s3884_s7 + $0x48] sm:$0xff] %v1541_v19  ;;  %v4202_v44 = vpop.xlane.xlu1 %756  ;;  %v1544_v13 = vpop.f32.mrb[42].mxu0 }
 0x2ac   : > { %v1546_v49 = vpop.f32.mrb[43].mxu0  ;;  %1709 = vadd.xlane.f32.xlu0 %v4195_v24 }
 0x2ad   : > { %v1547_v34 = vadd.f32 %v1546_v49, %v3872_v60 }
 0x2ae   : > { %782 = vadd.xlane.f32.xlu1 %v3971_v59 }
 0x2af   : > { %2292 = vst [vmem:[%s3884_s7 + $0x58] sm:$0xff] %v1547_v34  ;;  %v4214_v46 = vpop.xlane.xlu1 %754  ;;  %v1550_v19 = vpop.f32.mrb[44].mxu0 }
 0x2b0   : > { %v1552_v55 = vpop.f32.mrb[45].mxu0  ;;  %1839 = vadd.xlane.f32.xlu0 %v1804_v27  ;;  %v4227_v27 = vadd.f32 %v1544_v13, %v3867_v58 }
 0x2b1   : > { %v1553_v49 = vadd.f32 %v1552_v55, %v3872_v60  ;;  %v4236_v55 = vadd.f32 %v4122_v20, %v3867_v58 }
 0x2b2   : > { %912 = vadd.xlane.f32.xlu1 %v865_v51  ;;  %5252 = vst [vmem:[#allocation42_spill] sm:$0xff] %v4227_v27  ;;  %v867_v51 = vmul.f32 %v3988_v18, %v3988_v18 }
 0x2b3   : > { %2294 = vst [vmem:[%s3884_s7 + $0x68] sm:$0xff] %v1553_v49  ;;  %v885_v59 = vpop.xlane.xlu1 %884  ;;  %v1556_v24 = vpop.f32.mrb[46].mxu0  ;;  %5253 = vst [vmem:[#allocation43_spill] sm:$0xff] %v4236_v55  ;;  %v1830_v13 = vmul.f32 %v4236_v55, %v4236_v55  ;;  %v4248_v49 = vadd.f32 %v3992_v22, %v3842_v38 }
 0x2b4   : > { %2864 = vrsqrt.f32 %v885_v59  ;;  %v1558_v34 = vpop.f32.mrb[47].mxu0  ;;  %1887 = vadd.xlane.f32.xlu0 %v1828_v10  ;;  %vm955_vm2 = vcmp.eq.f32.partialorder %v885_v59, inf  ;;  %vm957_vm3 = vcmp.eq.f32.partialorder %v885_v59, 0.0  ;;  %v4256_v55 = vadd.f32 %v1556_v24, %v3867_v58 }
 0x2b5   : > { %v1559_v7 = vadd.f32 %v1558_v34, %v3872_v60  ;;  %v1806_v60 = vmul.f32 %v4227_v27, %v4227_v27  ;;  %5254 = vst [vmem:[#allocation44_spill] sm:$0xff] %v4248_v49 }
 0x2b6   : > { %786 = vadd.xlane.f32.xlu1 %v4000_v25  ;;  %5256 = vst [vmem:[#allocation46_spill] sm:$0xff] %v4256_v55 }
 0x2b7   : > { %2296 = vst [vmem:[%s3884_s7 + $0x78] sm:$0xff] %v1559_v7  ;;  %v883_v37 = vpop.xlane.xlu1 %882  ;;  %v1817_v7 = vmul.f32 %v3997_v4, %v3997_v4  ;;  %v4253_v4 = vadd.f32 %v1550_v19, %v3867_v58 }
 0x2b8   : > { %2866 = vrsqrt.f32 %v883_v37  ;;  %1713 = vadd.xlane.f32.xlu0 %v4224_v21  ;;  %vm948_vm4 = vcmp.eq.f32.partialorder %v883_v37, inf  ;;  %v951_v27 = vand.u32 2147483648, %v883_v37  ;;  %vm950_vm5 = vcmp.eq.f32.partialorder %v883_v37, 0.0 }
 0x2b9   : > { %5255 = vst [vmem:[#allocation45_spill] sm:$0xff] %v4253_v4 }
 0x2ba   : > { %916 = vadd.xlane.f32.xlu1 %v867_v51  ;;  %v958_v51 = vand.u32 2147483648, %v885_v59 }
 0x2bb   : > { %v4240_v53 = vpop.xlane.xlu1 %760 }
 0x2bc   : > { %1843 = vadd.xlane.f32.xlu0 %v1806_v60 }
 0x2be   : > { %v2865_v10 = vpop.eup %2864  ;;  %1865 = vadd.xlane.f32.xlu1 %v1817_v7 }
 0x2bf   : > { %v954_v20 = vmul.f32 %v2865_v10, %v885_v59  ;;  %v4250_v34 = vpop.xlane.xlu1 %758 }
 0x2c0   : > { %1891 = vadd.xlane.f32.xlu0 %v1830_v13 }
 0x2c1   : > { %v956_v18 = vsel %vm955_vm2, %v885_v59, %v954_v20  ;;  %v4262_v59 = vadd.f32 %v4148_v63, %v3867_v58 }
 0x2c2   : > { %v2867_v60 = vpop.eup %2866  ;;  %v959_v47 = vsel %vm957_vm3, %v958_v51, %v956_v18  ;;  %792 = vadd.xlane.f32.xlu1 %v4248_v49  ;;  %v869_v51 = vmul.f32 %v4248_v49, %v4248_v49 }
 0x2c3   : > { %v1171_v22 = vadd.f32 1e-06, %v959_v47  ;;  %v947_v7 = vmul.f32 %v2867_v60, %v883_v37  ;;  %v889_v10 = vpop.xlane.xlu1 %888  ;;  %5257 = vst [vmem:[#allocation47_spill] sm:$0xff] %v4262_v59  ;;  %v1808_v47 = vmul.f32 %v4256_v55, %v4256_v55  ;;  %v1832_v20 = vmul.f32 %v4262_v59, %v4262_v59 }
 0x2c4   : > { %2868 = vrsqrt.f32 %v889_v10  ;;  %1717 = vadd.xlane.f32.xlu0 %v4253_v4  ;;  %v5258_v60 = vlaneseq  ;;  %vm969_vm6 = vcmp.eq.f32.partialorder %v889_v10, inf  ;;  %vm971_vm8 = vcmp.eq.f32.partialorder %v889_v10, 0.0 }
 0x2c5   : > { %2870 = vrcp.f32 %v1171_v22  ;;  %v949_v19 = vsel %vm948_vm4, %v883_v37, %v947_v7 }
 0x2c6   : > { %v952_v18 = vsel %vm950_vm5, %v951_v27, %v949_v19  ;;  %1739 = vadd.xlane.f32.xlu1 %v4013_v35  ;;  %v819_v27 = vmul.f32 0.125, %v4202_v44  ;;  %v4278_v22 = vand.u32 127, %v5258_v60 }
 0x2c7   : > { %v1170_v24 = vadd.f32 1e-06, %v952_v18  ;;  %v887_v13 = vpop.xlane.xlu1 %886  ;;  %v4269_v63 = vpop.xlane.xlu0 %1721  ;;  %v4284_v18 = vadd.f32 %v4019_v43, %v3842_v38 }
 0x2c8   : > { %2872 = vrsqrt.f32 %v887_v13  ;;  %1847 = vadd.xlane.f32.xlu0 %v1808_v47  ;;  %v4288_v47 = vadd.f32 %v4005_v32, %v3867_v58  ;;  %v1267_v59 = vsub.f32 %v3845_v40, %v819_v27  ;;  %vm1364_vm7 = vcmp.lt.s32.totalorder %v4278_v22, 8 }
 0x2c9   : > { %2874 = vrcp.f32 %v1170_v24  ;;  %v4292_v24 = vadd.f32 %v4031_v56, %v3867_v58  ;;  %vm962_vm9 = vcmp.eq.f32.partialorder %v887_v13, inf  ;;  %v965_v25 = vand.u32 2147483648, %v887_v13 }
 0x2ca   : > { %790 = vadd.xlane.f32.xlu1 %v4025_v45  ;;  %v972_v45 = vand.u32 2147483648, %v889_v10  ;;  %vm964_vm10 = vcmp.eq.f32.partialorder %v887_v13, 0.0 }
 0x2cb   : > { %v4272_v37 = vpop.xlane.xlu1 %764 }
 0x2cc   : > { %1895 = vadd.xlane.f32.xlu0 %v1832_v20  ;;  %v818_v20 = vmul.f32 0.125, %v4214_v46  ;;  %v4305_v46 = vadd.f32 %v4057_v26, %v3867_v58 }
 0x2cd   : > { %v4280_v7 = vpop.xlane.xlu0 %1851 }
 0x2ce   : > { %v2869_v19 = vpop.eup %2868  ;;  %920 = vadd.xlane.f32.xlu1 %v869_v51  ;;  %2876 = vrsqrt.f32 %v4280_v7  ;;  %v1266_v27 = vsub.f32 %v3849_v42, %v818_v20  ;;  %vm1962_vm11 = vcmp.eq.f32.partialorder %v4280_v7, inf  ;;  %vm1964_vm14 = vcmp.eq.f32.partialorder %v4280_v7, 0.0 }
 0x2cf   : > { %v2871_v44 = vpop.eup %2870  ;;  %v968_v60 = vmul.f32 %v2869_v19, %v889_v10  ;;  %v4296_v49 = vpop.xlane.xlu1 %762 }
 0x2d0   : > { %v1299_v43 = vmul.f32 0.35355338, %v2871_v44  ;;  %1745 = vadd.xlane.f32.xlu0 %v4288_v47 }
 0x2d1   : > { %v970_v32 = vsel %vm969_vm6, %v889_v10, %v968_v60  ;;  %v4301_v51 = vpop.xlane.xlu0 %1725 }
 0x2d2   : > { %v2873_v56 = vpop.eup %2872  ;;  %v1331_v19 = vmul.f32 %v1299_v43, %v1267_v59  ;;  %v973_v55 = vsel %vm971_vm8, %v972_v45, %v970_v32  ;;  %796 = vadd.xlane.f32.xlu1 %v4284_v18  ;;  %v4321_v43 = vadd.f32 %v4080_v54, %v3867_v58 }
 0x2d3   : > { %v2875_v40 = vpop.eup %2874  ;;  %v1173_v44 = vadd.f32 1e-06, %v973_v55  ;;  %v961_v35 = vmul.f32 %v2873_v56, %v887_v13  ;;  %v893_v10 = vpop.xlane.xlu1 %892  ;;  %v4336_v56 = vadd.f32 %v4107_v23, %v3867_v58  ;;  %v4349_v23 = vadd.f32 %v4135_v61, %v3867_v58 }
 0x2d4   : > { %v1366_v60 = vsel %vm1364_vm7, %v1331_v19, 0.0  ;;  %v1298_v4 = vmul.f32 0.35355338, %v2875_v40  ;;  %2878 = vrsqrt.f32 %v893_v10  ;;  %1749 = vadd.xlane.f32.xlu0 %v4292_v24  ;;  %v1819_v19 = vmul.f32 %v4046_v8, %v4046_v8 }
 0x2d5   : > { %1398 = vst [vmem:[%s4313_s10 + $0x8] sm:$0xff] %v1366_v60  ;;  %2880 = vrcp.f32 %v1173_v44  ;;  %v963_v45 = vsel %vm962_vm9, %v887_v13, %v961_v35  ;;  %v4316_v42 = vpop.xlane.xlu0 %1855  ;;  %v871_v35 = vmul.f32 %v4284_v18, %v4284_v18  ;;  %5259 = vst [vmem:[#allocation48_spill] sm:$0xff] %v4336_v56  ;;  %v820_v40 = vmul.f32 0.125, %v4250_v34 }
 0x2d6   : > { %v1330_v26 = vmul.f32 %v1298_v4, %v1266_v27  ;;  %v966_v55 = vsel %vm964_vm10, %v965_v25, %v963_v45  ;;  %794 = vadd.xlane.f32.xlu1 %v4049_v9  ;;  %v821_v25 = vmul.f32 0.125, %v4240_v53  ;;  %v4344_v44 = vadd.f32 %v4040_v3, %v3842_v38  ;;  %5261 = vst [vmem:[#allocation50_spill] sm:$0xff] %v4349_v23 }
 0x2d7   : > { %v1172_v59 = vadd.f32 1e-06, %v966_v55  ;;  %v891_v20 = vpop.xlane.xlu1 %890  ;;  %vm983_vm12 = vcmp.eq.f32.partialorder %v893_v10, inf  ;;  %v986_v3 = vand.u32 2147483648, %v893_v10  ;;  %vm985_vm13 = vcmp.eq.f32.partialorder %v893_v10, 0.0 }
 0x2d8   : > { %v1365_v32 = vsel %vm1364_vm7, %v1330_v26, 0.0  ;;  %2882 = vrsqrt.f32 %v891_v20  ;;  %1753 = vadd.xlane.f32.xlu0 %v4305_v46  ;;  %v2877_v54 = vpop.eup %2876  ;;  %5260 = vst [vmem:[#allocation49_spill] sm:$0xff] %v4344_v44  ;;  %v1269_v60 = vsub.f32 %v3857_v48, %v821_v25  ;;  %v1268_v48 = vsub.f32 %v3862_v52, %v820_v40 }
 0x2d9   : > { %1397 = vst [vmem:[%s4313_s10] sm:$0xff] %v1365_v32  ;;  %2884 = vrcp.f32 %v1172_v59  ;;  %v4329_v4 = vpop.xlane.xlu0 %1729  ;;  %v1961_v45 = vmul.f32 %v2877_v54, %v4280_v7  ;;  %vm976_vm15 = vcmp.eq.f32.partialorder %v891_v20, inf  ;;  %vm978_vm0 = vcmp.eq.f32.partialorder %v891_v20, 0.0 }
 0x2da   : > { %924 = vadd.xlane.f32.xlu1 %v871_v35  ;;  %v1965_v35 = vand.u32 2147483648, %v4280_v7  ;;  %2886 = vrsqrt.f32 %v4316_v42  ;;  %vm1976_vm5 = vcmp.eq.f32.partialorder %v4316_v42, inf  ;;  %vm1978_vm6 = vcmp.eq.f32.partialorder %v4316_v42, 0.0 }
 0x2db   : > { %v4332_v13 = vpop.xlane.xlu1 %768 }
 0x2dc   : > { %1757 = vadd.xlane.f32.xlu0 %v4321_v43 }
 0x2dd   : > { %v4352_v55 = vpop.xlane.xlu0 %1859 }
 0x2de   : > { %v2879_v27 = vpop.eup %2878  ;;  %1869 = vadd.xlane.f32.xlu1 %v1819_v19  ;;  %v1963_v19 = vsel %vm1962_vm11, %v4280_v7, %v1961_v45  ;;  %v823_v7 = vmul.f32 0.125, %v4272_v37 }
 0x2df   : > { %v2881_v53 = vpop.eup %2880  ;;  %v982_v26 = vmul.f32 %v2879_v27, %v893_v10  ;;  %v4354_v59 = vpop.xlane.xlu1 %766 }
 0x2e0   : > { %v1301_v34 = vmul.f32 0.35355338, %v2881_v53  ;;  %1761 = vadd.xlane.f32.xlu0 %v4336_v56  ;;  %v1271_v37 = vsub.f32 %v3881_v2, %v823_v7 }
 0x2e1   : > { %v984_v32 = vsel %vm983_vm12, %v893_v10, %v982_v26  ;;  %vm1990_vm12 = vcmp.eq.f32.partialorder %v4352_v55, inf }
 0x2e2   : > { %v2883_v58 = vpop.eup %2882  ;;  %v1333_v61 = vmul.f32 %v1301_v34, %v1269_v60  ;;  %v987_v25 = vsel %vm985_vm13, %v986_v3, %v984_v32  ;;  %800 = vadd.xlane.f32.xlu1 %v4344_v44  ;;  %v979_v60 = vand.u32 2147483648, %v891_v20  ;;  %v4368_v34 = vpop.xlane.xlu0 %906  ;;  %v1966_v3 = vsel %vm1964_vm14, %v1965_v35, %v1963_v19 }
 0x2e3   : > { %v2885_v54 = vpop.eup %2884  ;;  %v1175_v27 = vadd.f32 1e-06, %v987_v25  ;;  %v975_v53 = vmul.f32 %v2883_v58, %v891_v20  ;;  %v897_v52 = vpop.xlane.xlu1 %896  ;;  %v873_v35 = vmul.f32 %v4344_v44, %v4344_v44  ;;  %vm1992_vm13 = vcmp.eq.f32.partialorder %v4352_v55, 0.0 }
 0x2e4   : > { %v1368_v10 = vsel %vm1364_vm7, %v1333_v61, 0.0  ;;  %v1300_v40 = vmul.f32 0.35355338, %v2885_v54  ;;  %1765 = vadd.xlane.f32.xlu0 %v4349_v23  ;;  %v2130_v54 = vadd.f32 1e-06, %v1966_v3  ;;  %v2887_v19 = vpop.eup %2886  ;;  %vm997_vm1 = vcmp.eq.f32.partialorder %v897_v52, inf }
 0x2e5   : > { %1400 = vst [vmem:[%s4313_s10 + $0x18] sm:$0xff] %v1368_v10  ;;  %2888 = vrcp.f32 %v1175_v27  ;;  %v977_v26 = vsel %vm976_vm15, %v891_v20, %v975_v53  ;;  %v4387_v27 = vadd.f32 %v4067_v16, %v3842_v38  ;;  %v822_v53 = vmul.f32 0.125, %v4296_v49 }
 0x2e6   : > { %v1332_v45 = vmul.f32 %v1300_v40, %v1268_v48  ;;  %v980_v32 = vsel %vm978_vm0, %v979_v60, %v977_v26  ;;  %2890 = vrsqrt.f32 %v897_v52  ;;  %1743 = vadd.xlane.f32.xlu1 %v4061_v15  ;;  %v4377_v20 = vpop.xlane.xlu0 %1733  ;;  %v1975_v49 = vmul.f32 %v2887_v19, %v4316_v42 }
 0x2e7   : > { %v1174_v58 = vadd.f32 1e-06, %v980_v32  ;;  %v895_v61 = vpop.xlane.xlu1 %894  ;;  %v875_v38 = vmul.f32 %v4387_v27, %v4387_v27  ;;  %vm999_vm2 = vcmp.eq.f32.partialorder %v897_v52, 0.0  ;;  %vm1032_vm14 = vcmp.eq.f32.partialorder %v4368_v34, inf }
 0x2e8   : > { %v1367_v25 = vsel %vm1364_vm7, %v1332_v45, 0.0  ;;  %2892 = vrsqrt.f32 %v895_v61  ;;  %v1270_v45 = vsub.f32 %v3900_v11, %v822_v53  ;;  %vm990_vm3 = vcmp.eq.f32.partialorder %v895_v61, inf }
 0x2e9   : > { %1399 = vst [vmem:[%s4313_s10 + $0x10] sm:$0xff] %v1367_v25  ;;  %2894 = vrcp.f32 %v1174_v58  ;;  %v1000_v25 = vand.u32 2147483648, %v897_v52  ;;  %vm992_vm4 = vcmp.eq.f32.partialorder %v895_v61, 0.0 }
 0x2ea   : > { %798 = vadd.xlane.f32.xlu1 %v4073_v41  ;;  %v4394_v32 = vpop.xlane.xlu0 %1863 }
 0x2eb   : > { %v4379_v48 = vpop.xlane.xlu1 %1849 }
 0x2ec   : > { %2896 = vrsqrt.f32 %v4379_v48  ;;  %vm1955_vm8 = vcmp.eq.f32.partialorder %v4379_v48, inf  ;;  %vm1957_vm9 = vcmp.eq.f32.partialorder %v4379_v48, 0.0 }
 0x2ed   : > { %2898 = vrcp.f32 %v2130_v54 }
 0x2ee   : > { %928 = vadd.xlane.f32.xlu1 %v873_v35 }
 0x2ef   : > { %v2889_v10 = vpop.eup %2888  ;;  %v4390_v40 = vpop.xlane.xlu1 %772 }
 0x2f0   : > { %v2891_v60 = vpop.eup %2890  ;;  %v1303_v26 = vmul.f32 0.35355338, %v2889_v10 }
 0x2f1   : > { %v996_v3 = vmul.f32 %v2891_v60, %v897_v52  ;;  %v993_v60 = vand.u32 2147483648, %v895_v61 }
 0x2f2   : > { %v2893_v16 = vpop.eup %2892  ;;  %v1335_v58 = vmul.f32 %v1303_v26, %v1271_v37  ;;  %804 = vadd.xlane.f32.xlu1 %v4387_v27 }
 0x2f3   : > { %v2895_v54 = vpop.eup %2894  ;;  %v998_v2 = vsel %vm997_vm1, %v897_v52, %v996_v3  ;;  %v989_v7 = vmul.f32 %v2893_v16, %v895_v61  ;;  %v1724_v11 = vpop.xlane.xlu1 %1723  ;;  %vm1034_vm1 = vcmp.eq.f32.partialorder %v4368_v34, 0.0 }
 0x2f4   : > { %v1370_v35 = vsel %vm1364_vm7, %v1335_v58, 0.0  ;;  %v1302_v53 = vmul.f32 0.35355338, %v2895_v54  ;;  %v1001_v10 = vsel %vm999_vm2, %v1000_v25, %v998_v2  ;;  %v1778_v19 = vmul.f32 0.125, %v1724_v11  ;;  %v4408_v2 = vpop.xlane.xlu0 %910 }
 0x2f5   : > { %1402 = vst [vmem:[%s4313_s10 + $0x28] sm:$0xff] %v1370_v35  ;;  %v1177_v37 = vadd.f32 1e-06, %v1001_v10  ;;  %v991_v26 = vsel %vm990_vm3, %v895_v61, %v989_v7  ;;  %v1979_v58 = vand.u32 2147483648, %v4316_v42  ;;  %v1977_v35 = vsel %vm1976_vm5, %v4316_v42, %v1975_v49 }
 0x2f6   : > { %v2897_v44 = vpop.eup %2896  ;;  %v1334_v52 = vmul.f32 %v1302_v53, %v1270_v45  ;;  %v994_v3 = vsel %vm992_vm4, %v993_v60, %v991_v26  ;;  %802 = vadd.xlane.f32.xlu1 %v4087_v57  ;;  %v1958_v45 = vand.u32 2147483648, %v4379_v48  ;;  %v2226_v11 = vsub.f32 %v3890_v5, %v1778_v19  ;;  %v4430_v19 = vld [vmem:[#allocation7] ss:$0 sm:$0xff] }
 0x2f7   : > { %v2899_v16 = vpop.eup %2898  ;;  %2900 = vrcp.f32 %v1177_v37  ;;  %v1176_v25 = vadd.f32 1e-06, %v994_v3  ;;  %v1954_v54 = vmul.f32 %v2897_v44, %v4379_v48  ;;  %v4410_v61 = vpop.xlane.xlu1 %770  ;;  %v1980_v26 = vsel %vm1978_vm6, %v1979_v58, %v1977_v35 }
 0x2f8   : > { %v1369_v7 = vsel %vm1364_vm7, %v1334_v52, 0.0  ;;  %v2258_v10 = vmul.f32 %v2899_v16, %v2226_v11  ;;  %v1821_v5 = vmul.f32 %v4288_v47, %v4288_v47  ;;  %v4428_v49 = vpop.xlane.xlu0 %788  ;;  %v2132_v42 = vadd.f32 1e-06, %v1980_v26 }
 0x2f9   : > { %1401 = vst [vmem:[%s4313_s10 + $0x20] sm:$0xff] %v1369_v7  ;;  %2902 = vrcp.f32 %v1176_v25  ;;  %v1956_v44 = vsel %vm1955_vm8, %v4379_v48, %v1954_v54  ;;  %v4434_v48 = vadd.f32 %v4430_v19, %v4093_v1  ;;  %v824_v3 = vmul.f32 0.125, %v4354_v59 }
 0x2fa   : > { %v1959_v53 = vsel %vm1957_vm9, %v1958_v45, %v1956_v44  ;;  %932 = vadd.xlane.f32.xlu1 %v875_v38  ;;  %2299 = vst [vmem:[%s3884_s7 + $0x90] sm:$0xff] %v2258_v10  ;;  %v825_v38 = vmul.f32 0.125, %v4332_v13  ;;  %v1777_v58 = vmul.f32 0.125, %v4269_v63  ;;  %vm2004_vm4 = vcmp.eq.f32.partialorder %v4394_v32, inf }
 0x2fb   : > { %v2129_v60 = vadd.f32 1e-06, %v1959_v53  ;;  %v901_v37 = vpop.xlane.xlu1 %900  ;;  %v1272_v45 = vsub.f32 %v3948_v39, %v824_v3  ;;  %v877_v39 = vmul.f32 %v4434_v48, %v4434_v48  ;;  %vm1046_vm6 = vcmp.eq.f32.partialorder %v4408_v2, inf }
 0x2fc   : > { %2904 = vrsqrt.f32 %v901_v37  ;;  %v1273_v25 = vsub.f32 %v3929_v28, %v825_v38  ;;  %v4443_v13 = vpop.xlane.xlu0 %1737  ;;  %v2225_v28 = vsub.f32 %v3875_v62, %v1777_v58  ;;  %vm1011_vm10 = vcmp.eq.f32.partialorder %v901_v37, inf }
 0x2fd   : > { %2906 = vrcp.f32 %v2129_v60  ;;  %v1014_v38 = vand.u32 2147483648, %v901_v37  ;;  %vm1013_vm11 = vcmp.eq.f32.partialorder %v901_v37, 0.0  ;;  %vm2006_vm9 = vcmp.eq.f32.partialorder %v4394_v32, 0.0 }
 0x2fe   : > { %2908 = vrsqrt.f32 %v4368_v34  ;;  %1873 = vadd.xlane.f32.xlu1 %v1821_v5 }
 0x2ff   : > { %2910 = vrsqrt.f32 %v4352_v55  ;;  %v899_v52 = vpop.xlane.xlu1 %898 }
 0x300   : > { %2912 = vrsqrt.f32 %v899_v52  ;;  %v4461_v3 = vpop.xlane.xlu0 %914  ;;  %vm1004_vm15 = vcmp.eq.f32.partialorder %v899_v52, inf  ;;  %vm1006_vm0 = vcmp.eq.f32.partialorder %v899_v52, 0.0 }
 0x301   : > { %v2901_v16 = vpop.eup %2900  ;;  %2914 = vrcp.f32 %v2132_v42 }
 0x302   : > { %v1305_v54 = vmul.f32 0.35355338, %v2901_v16  ;;  %808 = vadd.xlane.f32.xlu1 %v4434_v48 }
 0x303   : > { %v2903_v1 = vpop.eup %2902  ;;  %v4445_v7 = vpop.xlane.xlu1 %1853 }
 0x304   : > { %v1337_v11 = vmul.f32 %v1305_v54, %v1273_v25  ;;  %v1304_v59 = vmul.f32 0.35355338, %v2903_v1  ;;  %2916 = vrsqrt.f32 %v4445_v7  ;;  %v4465_v25 = vadd.f32 %v4430_v19, %v4119_v0 }
 0x305   : > { %vm1969_vm2 = vcmp.eq.f32.partialorder %v4445_v7, inf  ;;  %vm1971_vm3 = vcmp.eq.f32.partialorder %v4445_v7, 0.0 }
 0x306   : > { %v2905_v35 = vpop.eup %2904  ;;  %v1372_v63 = vsel %vm1364_vm7, %v1337_v11, 0.0  ;;  %v1336_v44 = vmul.f32 %v1304_v59, %v1272_v45  ;;  %806 = vadd.xlane.f32.xlu1 %v4112_v50 }
 0x307   : > { %v2907_v53 = vpop.eup %2906  ;;  %1404 = vst [vmem:[%s4313_s10 + $0x38] sm:$0xff] %v1372_v63  ;;  %v1010_v10 = vmul.f32 %v2905_v35, %v901_v37  ;;  %v4454_v60 = vpop.xlane.xlu1 %776 }
 0x308   : > { %v2909_v26 = vpop.eup %2908  ;;  %v1371_v5 = vsel %vm1364_vm7, %v1336_v44, 0.0  ;;  %v2257_v62 = vmul.f32 %v2907_v53, %v2225_v28  ;;  %v1993_v53 = vand.u32 2147483648, %v4352_v55 }
 0x309   : > { %v2911_v42 = vpop.eup %2910  ;;  %1403 = vst [vmem:[%s4313_s10 + $0x30] sm:$0xff] %v1371_v5  ;;  %v1012_v16 = vsel %vm1011_vm10, %v901_v37, %v1010_v10  ;;  %v1031_v1 = vmul.f32 %v2909_v26, %v4368_v34  ;;  %v1007_v37 = vand.u32 2147483648, %v899_v52  ;;  %v1035_v10 = vand.u32 2147483648, %v4368_v34 }
 0x30a   : > { %v2913_v58 = vpop.eup %2912  ;;  %2297 = vst [vmem:[%s3884_s7 + $0x80] sm:$0xff] %v2257_v62  ;;  %v1015_v54 = vsel %vm1013_vm11, %v1014_v38, %v1012_v16  ;;  %936 = vadd.xlane.f32.xlu1 %v877_v39  ;;  %v1989_v0 = vmul.f32 %v2911_v42, %v4352_v55  ;;  %v4479_v62 = vpop.xlane.xlu0 %1867  ;;  %vm1048_vm10 = vcmp.eq.f32.partialorder %v4408_v2, 0.0 }
 0x30b   : > { %v1179_v45 = vadd.f32 1e-06, %v1015_v54  ;;  %v1003_v11 = vmul.f32 %v2913_v58, %v899_v52  ;;  %v1728_v59 = vpop.xlane.xlu1 %1727  ;;  %v2915_v28 = vpop.eup %2914  ;;  %v1033_v5 = vsel %vm1032_vm14, %v4368_v34, %v1031_v1  ;;  %vm1060_vm14 = vcmp.eq.f32.partialorder %v4461_v3, inf }
 0x30c   : > { %v1780_v35 = vmul.f32 0.125, %v1728_v59  ;;  %v1991_v58 = vsel %vm1990_vm12, %v4352_v55, %v1989_v0 }
 0x30d   : > { %2918 = vrcp.f32 %v1179_v45  ;;  %v1005_v63 = vsel %vm1004_vm15, %v899_v52, %v1003_v11  ;;  %v1036_v45 = vsel %vm1034_vm1, %v1035_v10, %v1033_v5  ;;  %v1823_v10 = vmul.f32 %v4292_v24, %v4292_v24 }
 0x30e   : > { %v2917_v44 = vpop.eup %2916  ;;  %v1008_v39 = vsel %vm1006_vm0, %v1007_v37, %v1005_v63  ;;  %v2228_v26 = vsub.f32 %v3911_v17, %v1780_v35  ;;  %812 = vadd.xlane.f32.xlu1 %v4465_v25  ;;  %2920 = vrsqrt.f32 %v4394_v32  ;;  %v1972_v17 = vand.u32 2147483648, %v4445_v7 }
 0x30f   : > { %v1178_v38 = vadd.f32 1e-06, %v1008_v39  ;;  %v1968_v52 = vmul.f32 %v2917_v44, %v4445_v7  ;;  %v4482_v42 = vpop.xlane.xlu1 %774  ;;  %v1994_v37 = vsel %vm1992_vm13, %v1993_v53, %v1991_v58  ;;  %v827_v35 = vmul.f32 0.125, %v4390_v40 }
 0x310   : > { %v2260_v16 = vmul.f32 %v2915_v28, %v2228_v26  ;;  %v4502_v28 = vpop.xlane.xlu0 %918  ;;  %v1182_v0 = vadd.f32 1e-06, %v1036_v45  ;;  %v2134_v44 = vadd.f32 1e-06, %v1994_v37  ;;  %v826_v40 = vmul.f32 0.125, %v4410_v61 }
 0x311   : > { %2922 = vrcp.f32 %v1178_v38  ;;  %v1970_v54 = vsel %vm1969_vm2, %v4445_v7, %v1968_v52  ;;  %v879_v7 = vmul.f32 %v4465_v25, %v4465_v25  ;;  %v1275_v55 = vsub.f32 %v3984_v14, %v827_v35 }
 0x312   : > { %2924 = vrsqrt.f32 %v4408_v2  ;;  %v1973_v1 = vsel %vm1971_vm3, %v1972_v17, %v1970_v54  ;;  %2303 = vst [vmem:[%s3884_s7 + $0xb0] sm:$0xff] %v2260_v16  ;;  %810 = vadd.xlane.f32.xlu1 %v4127_v36  ;;  %v4513_v26 = vadd.f32 %v4430_v19, %v4145_v30  ;;  %v1779_v5 = vmul.f32 0.125, %v4301_v51 }
 0x313   : > { %v2131_v11 = vadd.f32 1e-06, %v1973_v1  ;;  %v905_v59 = vpop.xlane.xlu1 %904  ;;  %v1274_v16 = vsub.f32 %v4009_v33, %v826_v40  ;;  %v4530_v1 = vmul.f32 %v4305_v46, %v4305_v46  ;;  %v2007_v40 = vand.u32 2147483648, %v4394_v32 }
 0x314   : > { %2926 = vrsqrt.f32 %v905_v59  ;;  %v4517_v14 = vpop.xlane.xlu0 %1741  ;;  %v2227_v19 = vsub.f32 %v3903_v12, %v1779_v5  ;;  %vm1025_vm5 = vcmp.eq.f32.partialorder %v905_v59, inf  ;;  %vm1027_vm8 = vcmp.eq.f32.partialorder %v905_v59, 0.0 }
 0x315   : > { %2928 = vrcp.f32 %v2131_v11  ;;  %vm1062_vm0 = vcmp.eq.f32.partialorder %v4461_v3, 0.0 }
 0x316   : > { %940 = vadd.xlane.f32.xlu1 %v879_v7 }
 0x317   : > { %v2919_v63 = vpop.eup %2918  ;;  %v4504_v34 = vpop.xlane.xlu1 %902 }
 0x318   : > { %v1307_v53 = vmul.f32 0.35355338, %v2919_v63  ;;  %2930 = vrsqrt.f32 %v4504_v34  ;;  %v2921_v39 = vpop.eup %2920  ;;  %v4541_v63 = vpop.xlane.xlu0 %922  ;;  %vm1018_vm11 = vcmp.eq.f32.partialorder %v4504_v34, inf  ;;  %vm1020_vm12 = vcmp.eq.f32.partialorder %v4504_v34, 0.0 }
 0x319   : > { %2932 = vrcp.f32 %v1182_v0  ;;  %v2003_v33 = vmul.f32 %v2921_v39, %v4394_v32  ;;  %v1028_v0 = vand.u32 2147483648, %v905_v59 }
 0x31a   : > { %2934 = vrsqrt.f32 %v4461_v3  ;;  %v1339_v38 = vmul.f32 %v1307_v53, %v1275_v55  ;;  %1877 = vadd.xlane.f32.xlu1 %v1823_v10  ;;  %v881_v10 = vmul.f32 %v4513_v26, %v4513_v26 }
 0x31b   : > { %v2923_v52 = vpop.eup %2922  ;;  %2936 = vrcp.f32 %v2134_v44  ;;  %v4519_v61 = vpop.xlane.xlu1 %1857  ;;  %v2005_v5 = vsel %vm2004_vm4, %v4394_v32, %v2003_v33  ;;  %vm1074_vm4 = vcmp.eq.f32.partialorder %v4502_v28, inf }
 0x31c   : > { %v2925_v17 = vpop.eup %2924  ;;  %v1374_v58 = vsel %vm1364_vm7, %v1339_v38, 0.0  ;;  %v1306_v30 = vmul.f32 0.35355338, %v2923_v52  ;;  %2938 = vrsqrt.f32 %v4519_v61  ;;  %vm1983_vm13 = vcmp.eq.f32.partialorder %v4519_v61, inf }
 0x31d   : > { %1406 = vst [vmem:[%s4313_s10 + $0x48] sm:$0xff] %v1374_v58  ;;  %v1045_v11 = vmul.f32 %v2925_v17, %v4408_v2  ;;  %v1986_v32 = vand.u32 2147483648, %v4519_v61  ;;  %vm1985_vm15 = vcmp.eq.f32.partialorder %v4519_v61, 0.0 }
 0x31e   : > { %v2927_v51 = vpop.eup %2926  ;;  %v1338_v54 = vmul.f32 %v1306_v30, %v1274_v16  ;;  %816 = vadd.xlane.f32.xlu1 %v4513_v26  ;;  %v1021_v30 = vand.u32 2147483648, %v4504_v34 }
 0x31f   : > { %v2929_v45 = vpop.eup %2928  ;;  %v1024_v37 = vmul.f32 %v2927_v51, %v905_v59  ;;  %v4535_v35 = vpop.xlane.xlu1 %780  ;;  %v1047_v58 = vsel %vm1046_vm6, %v4408_v2, %v1045_v11  ;;  %vm2018_vm6 = vcmp.eq.f32.partialorder %v4479_v62, inf }
 0x320   : > { %v1373_v12 = vsel %vm1364_vm7, %v1338_v54, 0.0  ;;  %v2259_v7 = vmul.f32 %v2929_v45, %v2227_v19  ;;  %v1801_v45 = vmul.f32 %v4165_v6, %v4165_v6 }
 0x321   : > { %1405 = vst [vmem:[%s4313_s10 + $0x40] sm:$0xff] %v1373_v12  ;;  %v1026_v44 = vsel %vm1025_vm5, %v905_v59, %v1024_v37  ;;  %v1049_v59 = vand.u32 2147483648, %v4408_v2  ;;  %v2008_v37 = vsel %vm2006_vm9, %v2007_v40, %v2005_v5  ;;  %vm2020_vm9 = vcmp.eq.f32.partialorder %v4479_v62, 0.0 }
 0x322   : > { %v2931_v55 = vpop.eup %2930  ;;  %2301 = vst [vmem:[%s3884_s7 + $0xa0] sm:$0xff] %v2259_v7  ;;  %v1029_v53 = vsel %vm1027_vm8, %v1028_v0, %v1026_v44  ;;  %814 = vadd.xlane.f32.xlu1 %v4153_v29  ;;  %v4568_v44 = vpop.xlane.xlu0 %1871  ;;  %vm1076_vm8 = vcmp.eq.f32.partialorder %v4502_v28, 0.0 }
 0x323   : > { %v2933_v39 = vpop.eup %2932  ;;  %v1181_v38 = vadd.f32 1e-06, %v1029_v53  ;;  %v1017_v52 = vmul.f32 %v2931_v55, %v4504_v34  ;;  %v1732_v17 = vpop.xlane.xlu1 %1731 }
 0x324   : > { %v2935_v16 = vpop.eup %2934  ;;  %v1782_v51 = vmul.f32 0.125, %v1732_v17  ;;  %v1310_v7 = vmul.f32 0.35355338, %v2933_v39  ;;  %v2136_v39 = vadd.f32 1e-06, %v2008_v37 }
 0x325   : > { %v2937_v19 = vpop.eup %2936  ;;  %2940 = vrcp.f32 %v1181_v38  ;;  %v1019_v54 = vsel %vm1018_vm11, %v4504_v34, %v1017_v52  ;;  %v1059_v0 = vmul.f32 %v2935_v16, %v4461_v3  ;;  %v1050_v38 = vsel %vm1048_vm10, %v1049_v59, %v1047_v58  ;;  %v5262_v52 = vld [vmem:[#allocation22_spill] sm:$0xff] }
 0x326   : > { %v2939_v33 = vpop.eup %2938  ;;  %v1022_v12 = vsel %vm1020_vm12, %v1021_v30, %v1019_v54  ;;  %v2230_v11 = vsub.f32 %v3935_v31, %v1782_v51  ;;  %944 = vadd.xlane.f32.xlu1 %v881_v10  ;;  %v1184_v2 = vadd.f32 1e-06, %v1050_v38  ;;  %v1063_v59 = vand.u32 2147483648, %v4461_v3 }
 0x327   : > { %v1180_v55 = vadd.f32 1e-06, %v1022_v12  ;;  %v1982_v34 = vmul.f32 %v2939_v33, %v4519_v61  ;;  %v779_v53 = vpop.xlane.xlu1 %778  ;;  %v1061_v30 = vsel %vm1060_vm14, %v4461_v3, %v1059_v0  ;;  %v5263_v12 = vld [vmem:[#allocation31_spill] sm:$0xff]  ;;  %v1781_v0 = vmul.f32 0.125, %v4329_v4 }
 0x328   : > { %v2262_v40 = vmul.f32 %v2937_v19, %v2230_v11  ;;  %v830_v31 = vmul.f32 0.125, %v779_v53  ;;  %v4585_v19 = vpop.xlane.xlu0 %926  ;;  %v1064_v37 = vsel %vm1062_vm0, %v1063_v59, %v1061_v30  ;;  %v828_v11 = vmul.f32 0.125, %v4482_v42 }
 0x329   : > { %2942 = vrcp.f32 %v1180_v55  ;;  %v1984_v10 = vsel %vm1983_vm13, %v4519_v61, %v1982_v34  ;;  %v829_v61 = vmul.f32 0.125, %v4454_v60  ;;  %v5264_v55 = vld [vmem:[#allocation36_spill] sm:$0xff]  ;;  %v1186_v3 = vadd.f32 1e-06, %v1064_v37 }
 0x32a   : > { %v1987_v5 = vsel %vm1985_vm15, %v1986_v32, %v1984_v10  ;;  %2307 = vst [vmem:[%s3884_s7 + $0xd0] sm:$0xff] %v2262_v40  ;;  %v1278_v17 = vsub.f32 %v5262_v52, %v830_v31  ;;  %1833 = vadd.xlane.f32.xlu1 %v1801_v45  ;;  %2944 = vrsqrt.f32 %v4502_v28  ;;  %v5265_v32 = vld [vmem:[#allocation32_spill] sm:$0xff]  ;;  %v5266_v10 = vld [vmem:[#allocation39_spill] sm:$0xff]  ;;  %v5267_v52 = vld [vmem:[#allocation21_spill] sm:$0xff]  ;;  %vm1088_vm10 = vcmp.eq.f32.partialorder %v4541_v63, inf }
 0x32b   : > { %v2133_v16 = vadd.f32 1e-06, %v1987_v5  ;;  %v909_v58 = vpop.xlane.xlu1 %908  ;;  %v1277_v60 = vsub.f32 %v5263_v12, %v829_v61  ;;  %v1276_v40 = vsub.f32 %v5265_v32, %v828_v11  ;;  %v1803_v4 = vmul.f32 %v5266_v10, %v5266_v10 }
 0x32c   : > { %v1342_v51 = vmul.f32 %v1310_v7, %v1278_v17  ;;  %2946 = vrsqrt.f32 %v909_v58  ;;  %v4598_v53 = vpop.xlane.xlu0 %930  ;;  %v2229_v17 = vsub.f32 %v5267_v52, %v1781_v0  ;;  %vm1039_vm1 = vcmp.eq.f32.partialorder %v909_v58, inf }
 0x32d   : > { %2948 = vrcp.f32 %v2133_v16  ;;  %v1827_v61 = vmul.f32 %v4321_v43, %v4321_v43  ;;  %v1042_v37 = vand.u32 2147483648, %v909_v58  ;;  %vm1041_vm2 = vcmp.eq.f32.partialorder %v909_v58, 0.0 }
 0x32e   : > { %v1377_v54 = vsel %vm1364_vm7, %v1342_v51, 0.0  ;;  %1881 = vadd.xlane.f32.xlu1 %v4530_v1  ;;  %2950 = vrcp.f32 %v1184_v2  ;;  %vm1090_vm11 = vcmp.eq.f32.partialorder %v4541_v63, 0.0 }
 0x32f   : > { %v2941_v45 = vpop.eup %2940  ;;  %2952 = vrcp.f32 %v2136_v39  ;;  %1409 = vst [vmem:[%s4313_s10 + $0x60] sm:$0xff] %v1377_v54  ;;  %v1862_v33 = vpop.xlane.xlu1 %1861 }
 0x330   : > { %v1309_v7 = vmul.f32 0.35355338, %v2941_v45  ;;  %2954 = vrsqrt.f32 %v1862_v33  ;;  %v4614_v11 = vpop.xlane.xlu0 %1875  ;;  %vm1997_vm3 = vcmp.eq.f32.partialorder %v1862_v33, inf  ;;  %v2000_v52 = vand.u32 2147483648, %v1862_v33 }
 0x331   : > { %2956 = vrsqrt.f32 %v4479_v62  ;;  %vm1999_vm5 = vcmp.eq.f32.partialorder %v1862_v33, 0.0 }
 0x332   : > { %v1341_v1 = vmul.f32 %v1309_v7, %v1277_v60  ;;  %1707 = vadd.xlane.f32.xlu1 %v5264_v55  ;;  %2958 = vrcp.f32 %v1186_v3 }
 0x333   : > { %v2943_v34 = vpop.eup %2942  ;;  %v4600_v38 = vpop.xlane.xlu1 %784  ;;  %2960 = vrsqrt.f32 %v4541_v63 }
 0x334   : > { %v1376_v42 = vsel %vm1364_vm7, %v1341_v1, 0.0  ;;  %v1308_v31 = vmul.f32 0.35355338, %v2943_v34  ;;  %v2945_v39 = vpop.eup %2944  ;;  %v5268_v34 = vld [vmem:[#allocation24_spill] sm:$0xff] }
 0x335   : > { %1408 = vst [vmem:[%s4313_s10 + $0x58] sm:$0xff] %v1376_v42  ;;  %v1073_v32 = vmul.f32 %v2945_v39, %v4502_v28  ;;  %v1805_v39 = vmul.f32 %v4224_v21, %v4224_v21 }
 0x336   : > { %v2947_v5 = vpop.eup %2946  ;;  %v1340_v2 = vmul.f32 %v1308_v31, %v1276_v40  ;;  %1837 = vadd.xlane.f32.xlu1 %v1803_v4 }
 0x337   : > { %v2949_v59 = vpop.eup %2948  ;;  %v1038_v16 = vmul.f32 %v2947_v5, %v909_v58  ;;  %v1736_v30 = vpop.xlane.xlu1 %1735 }
 0x338   : > { %v2951_v51 = vpop.eup %2950  ;;  %v1375_v54 = vsel %vm1364_vm7, %v1340_v2, 0.0  ;;  %v2261_v45 = vmul.f32 %v2949_v59, %v2229_v17  ;;  %v1784_v12 = vmul.f32 0.125, %v1736_v30 }
 0x339   : > { %v2953_v60 = vpop.eup %2952  ;;  %1407 = vst [vmem:[%s4313_s10 + $0x50] sm:$0xff] %v1375_v54  ;;  %v1040_v7 = vsel %vm1039_vm1, %v909_v58, %v1038_v16  ;;  %v1312_v4 = vmul.f32 0.35355338, %v2951_v51  ;;  %v5269_v16 = vld [vmem:[#allocation25_spill] sm:$0xff]  ;;  %v1077_v54 = vand.u32 2147483648, %v4502_v28 }
 0x33a   : > { %v2955_v0 = vpop.eup %2954  ;;  %2305 = vst [vmem:[%s3884_s7 + $0xc0] sm:$0xff] %v2261_v45  ;;  %v1043_v1 = vsel %vm1041_vm2, %v1042_v37, %v1040_v7  ;;  %v2232_v3 = vsub.f32 %v5268_v34, %v1784_v12  ;;  %1885 = vadd.xlane.f32.xlu1 %v1827_v61  ;;  %v5270_v61 = vld [vmem:[#allocation40_spill] sm:$0xff]  ;;  %v4629_v45 = vpop.xlane.xlu0 %934  ;;  %v1075_v12 = vsel %vm1074_vm4, %v4502_v28, %v1073_v32  ;;  %v831_v28 = vmul.f32 0.125, %v4535_v35 }
 0x33b   : > { %v1183_v40 = vadd.f32 1e-06, %v1043_v1  ;;  %v1996_v42 = vmul.f32 %v2955_v0, %v1862_v33  ;;  %v783_v31 = vpop.xlane.xlu1 %782  ;;  %v2957_v5 = vpop.eup %2956  ;;  %v2021_v0 = vand.u32 2147483648, %v4479_v62  ;;  %vm1102_vm2 = vcmp.eq.f32.partialorder %v4585_v19, inf }
 0x33c   : > { %v2264_v17 = vmul.f32 %v2953_v60, %v2232_v3  ;;  %v832_v58 = vmul.f32 0.125, %v783_v31  ;;  %v2017_v51 = vmul.f32 %v2957_v5, %v4479_v62  ;;  %v2959_v7 = vpop.eup %2958  ;;  %v1783_v5 = vmul.f32 0.125, %v4377_v20 }
 0x33d   : > { %2962 = vrcp.f32 %v1183_v40  ;;  %v1998_v2 = vsel %vm1997_vm3, %v1862_v33, %v1996_v42  ;;  %v1078_v40 = vsel %vm1076_vm8, %v1077_v54, %v1075_v12  ;;  %v2961_v32 = vpop.eup %2960  ;;  %v1314_v31 = vmul.f32 0.35355338, %v2959_v7 }
 0x33e   : > { %v2001_v59 = vsel %vm1999_vm5, %v2000_v52, %v1998_v2  ;;  %2311 = vst [vmem:[%s3884_s7 + $0xf0] sm:$0xff] %v2264_v17  ;;  %v1280_v30 = vsub.f32 %v5269_v16, %v832_v58  ;;  %1711 = vadd.xlane.f32.xlu1 %v5270_v61  ;;  %v2019_v34 = vsel %vm2018_vm6, %v4479_v62, %v2017_v51  ;;  %v4643_v52 = vpop.xlane.xlu0 %938  ;;  %v5271_v58 = vld [vmem:[#allocation28_spill] sm:$0xff]  ;;  %v1188_v62 = vadd.f32 1e-06, %v1078_v40 }
 0x33f   : > { %v2135_v37 = vadd.f32 1e-06, %v2001_v59  ;;  %v913_v33 = vpop.xlane.xlu1 %912  ;;  %v2022_v17 = vsel %vm2020_vm9, %v2021_v0, %v2019_v34  ;;  %v1087_v16 = vmul.f32 %v2961_v32, %v4541_v63  ;;  %vm2032_vm3 = vcmp.eq.f32.partialorder %v4568_v44, inf }
 0x340   : > { %v1344_v60 = vmul.f32 %v1312_v4, %v1280_v30  ;;  %2964 = vrsqrt.f32 %v913_v33  ;;  %v1829_v4 = vmul.f32 %v4336_v56, %v4336_v56  ;;  %v5272_v30 = vld [vmem:[#allocation34_spill] sm:$0xff]  ;;  %v2138_v12 = vadd.f32 1e-06, %v2022_v17 }
 0x341   : > { %2966 = vrcp.f32 %v2135_v37  ;;  %v5273_v37 = vld [vmem:[#allocation23_spill] sm:$0xff]  ;;  %v1089_v32 = vsel %vm1088_vm10, %v4541_v63, %v1087_v16  ;;  %vm1053_vm12 = vcmp.eq.f32.partialorder %v913_v33, inf  ;;  %vm1055_vm13 = vcmp.eq.f32.partialorder %v913_v33, 0.0 }
 0x342   : > { %v1379_v1 = vsel %vm1364_vm7, %v1344_v60, 0.0  ;;  %1841 = vadd.xlane.f32.xlu1 %v1805_v39  ;;  %v1279_v39 = vsub.f32 %v5272_v30, %v831_v28  ;;  %v2231_v20 = vsub.f32 %v5273_v37, %v1783_v5  ;;  %v5274_v60 = vld [vmem:[#allocation45_spill] sm:$0xff]  ;;  %v1091_v28 = vand.u32 2147483648, %v4541_v63 }
 0x343   : > { %1411 = vst [vmem:[%s4313_s10 + $0x70] sm:$0xff] %v1379_v1  ;;  %v787_v3 = vpop.xlane.xlu1 %786  ;;  %v1807_v7 = vmul.f32 %v5274_v60, %v5274_v60  ;;  %vm1104_vm4 = vcmp.eq.f32.partialorder %v4585_v19, 0.0  ;;  %vm2034_vm5 = vcmp.eq.f32.partialorder %v4568_v44, 0.0  ;;  %vm1116_vm6 = vcmp.eq.f32.partialorder %v4598_v53, inf }
 0x344   : > { %v834_v42 = vmul.f32 0.125, %v787_v3  ;;  %v5275_v3 = vld [vmem:[#allocation42_spill] sm:$0xff]  ;;  %v1092_v30 = vsel %vm1090_vm11, %v1091_v28, %v1089_v32  ;;  %vm1118_vm10 = vcmp.eq.f32.partialorder %v4598_v53, 0.0  ;;  %vm1130_vm11 = vcmp.eq.f32.partialorder %v4629_v45, inf }
 0x345   : > { %v5277_v28 = vld [vmem:[#allocation46_spill] sm:$0xff] }
 0x346   : > { %v1282_v2 = vsub.f32 %v5271_v58, %v834_v42  ;;  %1889 = vadd.xlane.f32.xlu1 %v1829_v4  ;;  %v4660_v42 = vpop.xlane.xlu0 %1879  ;;  %v1056_v58 = vand.u32 2147483648, %v913_v33 }
 0x347   : > { %v2963_v59 = vpop.eup %2962  ;;  %v917_v35 = vpop.xlane.xlu1 %916 }
 0x348   : > { %v1311_v51 = vmul.f32 0.35355338, %v2963_v59  ;;  %v1346_v54 = vmul.f32 %v1314_v31, %v1282_v2  ;;  %2968 = vrsqrt.f32 %v917_v35  ;;  %vm1067_vm14 = vcmp.eq.f32.partialorder %v917_v35, inf }
 0x349   : > { %2970 = vrcp.f32 %v1188_v62  ;;  %vm1069_vm15 = vcmp.eq.f32.partialorder %v917_v35, 0.0 }
 0x34a   : > { %v2965_v0 = vpop.eup %2964  ;;  %v1343_v1 = vmul.f32 %v1311_v51, %v1279_v39  ;;  %v1381_v34 = vsel %vm1364_vm7, %v1346_v54, 0.0  ;;  %1715 = vadd.xlane.f32.xlu1 %v5275_v3  ;;  %v1831_v39 = vmul.f32 %v4349_v23, %v4349_v23  ;;  %v4674_v51 = vpop.xlane.xlu0 %942 }
 0x34b   : > { %v2967_v40 = vpop.eup %2966  ;;  %v1052_v31 = vmul.f32 %v2965_v0, %v913_v33  ;;  %1413 = vst [vmem:[%s4313_s10 + $0x80] sm:$0xff] %v1381_v34  ;;  %v1866_v4 = vpop.xlane.xlu1 %1865 }
 0x34c   : > { %v1378_v5 = vsel %vm1364_vm7, %v1343_v1, 0.0  ;;  %v2263_v17 = vmul.f32 %v2967_v40, %v2231_v20  ;;  %2972 = vrsqrt.f32 %v1866_v4  ;;  %v5276_v40 = vld [vmem:[#allocation29_spill] sm:$0xff]  ;;  %vm2011_vm0 = vcmp.eq.f32.partialorder %v1866_v4, inf }
 0x34d   : > { %2974 = vrcp.f32 %v2138_v12  ;;  %1410 = vst [vmem:[%s4313_s10 + $0x68] sm:$0xff] %v1378_v5  ;;  %v1054_v2 = vsel %vm1053_vm12, %v913_v33, %v1052_v31  ;;  %v1190_v33 = vadd.f32 1e-06, %v1092_v30  ;;  %v2014_v30 = vand.u32 2147483648, %v1866_v4 }
 0x34e   : > { %2309 = vst [vmem:[%s3884_s7 + $0xe0] sm:$0xff] %v2263_v17  ;;  %v1057_v62 = vsel %vm1055_vm13, %v1056_v58, %v1054_v2  ;;  %1845 = vadd.xlane.f32.xlu1 %v1807_v7  ;;  %2976 = vrsqrt.f32 %v4585_v19  ;;  %v1070_v7 = vand.u32 2147483648, %v917_v35  ;;  %v4679_v5 = vpop.xlane.xlu0 %1705  ;;  %v833_v17 = vmul.f32 0.125, %v4600_v38 }
 0x34f   : > { %v1185_v59 = vadd.f32 1e-06, %v1057_v62  ;;  %v4668_v16 = vpop.xlane.xlu1 %792  ;;  %vm2013_vm1 = vcmp.eq.f32.partialorder %v1866_v4, 0.0 }
 0x351   : > { %2978 = vrcp.f32 %v1185_v59 }
 0x352   : > { %v2969_v54 = vpop.eup %2968  ;;  %2980 = vrsqrt.f32 %v4568_v44  ;;  %1893 = vadd.xlane.f32.xlu1 %v1831_v39 }
 0x353   : > { %v1066_v37 = vmul.f32 %v2969_v54, %v917_v35  ;;  %v1740_v20 = vpop.xlane.xlu1 %1739  ;;  %v2971_v12 = vpop.eup %2970  ;;  %2982 = vrcp.f32 %v1190_v33  ;;  %v5278_v33 = vld [vmem:[#allocation30_spill] sm:$0xff] }
 0x354   : > { %v1786_v0 = vmul.f32 0.125, %v1740_v20  ;;  %v1316_v59 = vmul.f32 0.35355338, %v2971_v12 }
 0x355   : > { %v1068_v1 = vsel %vm1067_vm14, %v917_v35, %v1066_v37 }
 0x356   : > { %v2973_v63 = vpop.eup %2972  ;;  %v1071_v34 = vsel %vm1069_vm15, %v1070_v7, %v1068_v1  ;;  %v2234_v32 = vsub.f32 %v5276_v40, %v1786_v0  ;;  %1719 = vadd.xlane.f32.xlu1 %v5277_v28  ;;  %v5279_v0 = vld [vmem:[#allocation33_spill] sm:$0xff]  ;;  %v5280_v40 = vld [vmem:[#allocation38_spill] sm:$0xff] }
 0x357   : > { %v2975_v31 = vpop.eup %2974  ;;  %v1187_v58 = vadd.f32 1e-06, %v1071_v34  ;;  %v2010_v2 = vmul.f32 %v2973_v63, %v1866_v4  ;;  %v791_v62 = vpop.xlane.xlu1 %790 }
 0x358   : > { %v2266_v35 = vmul.f32 %v2975_v31, %v2234_v32  ;;  %v836_v39 = vmul.f32 0.125, %v791_v62  ;;  %v2977_v54 = vpop.eup %2976  ;;  %v1281_v32 = vsub.f32 %v5280_v40, %v833_v17 }
 0x359   : > { %2984 = vrcp.f32 %v1187_v58  ;;  %v2012_v37 = vsel %vm2011_vm0, %v1866_v4, %v2010_v2  ;;  %v1101_v34 = vmul.f32 %v2977_v54, %v4585_v19  ;;  %v4691_v58 = vpop.xlane.xlu0 %1835  ;;  %vm1132_vm0 = vcmp.eq.f32.partialorder %v4629_v45, 0.0 }
 0x35a   : > { %v2015_v20 = vsel %vm2013_vm1, %v2014_v30, %v2012_v37  ;;  %2315 = vst [vmem:[%s3884_s7 + $0x110] sm:$0xff] %v2266_v35  ;;  %v1284_v7 = vsub.f32 %v5278_v33, %v836_v39  ;;  %1747 = vadd.xlane.f32.xlu1 %v5279_v0  ;;  %2986 = vrsqrt.f32 %v4598_v53  ;;  %v5281_v30 = vld [vmem:[#allocation35_spill] sm:$0xff]  ;;  %v835_v35 = vmul.f32 0.125, %v4428_v49 }
 0x35b   : > { %v2979_v1 = vpop.eup %2978  ;;  %v2137_v38 = vadd.f32 1e-06, %v2015_v20  ;;  %v4686_v63 = vpop.xlane.xlu1 %920  ;;  %v1103_v37 = vsel %vm1102_vm2, %v4585_v19, %v1101_v34  ;;  %v1785_v33 = vmul.f32 0.125, %v4443_v13  ;;  %v2035_v49 = vand.u32 2147483648, %v4568_v44 }
 0x35c   : > { %v2981_v12 = vpop.eup %2980  ;;  %v1313_v31 = vmul.f32 0.35355338, %v2979_v1  ;;  %v1348_v4 = vmul.f32 %v1316_v59, %v1284_v7  ;;  %v1105_v59 = vand.u32 2147483648, %v4585_v19  ;;  %v5282_v7 = vld [vmem:[#allocation37_spill] sm:$0xff]  ;;  %v5283_v19 = vld [vmem:[#allocation26_spill] sm:$0xff]  ;;  %vm1081_vm8 = vcmp.eq.f32.partialorder %v4686_v63, inf }
 0x35d   : > { %2988 = vrcp.f32 %v2137_v38  ;;  %v2031_v17 = vmul.f32 %v2981_v12, %v4568_v44  ;;  %v2983_v54 = vpop.eup %2982  ;;  %v4714_v12 = vpop.xlane.xlu0 %1883  ;;  %vm1083_vm9 = vcmp.eq.f32.partialorder %v4686_v63, 0.0  ;;  %vm1144_vm1 = vcmp.eq.f32.partialorder %v4643_v52, inf }
 0x35e   : > { %v1345_v2 = vmul.f32 %v1313_v31, %v1281_v32  ;;  %v1383_v62 = vsel %vm1364_vm7, %v1348_v4, 0.0  ;;  %2990 = vrsqrt.f32 %v4686_v63  ;;  %1751 = vadd.xlane.f32.xlu1 %v5281_v30  ;;  %v1106_v40 = vsel %vm1104_vm4, %v1105_v59, %v1103_v37 }
 0x35f   : > { %1415 = vst [vmem:[%s4313_s10 + $0x90] sm:$0xff] %v1383_v62  ;;  %v4701_v39 = vpop.xlane.xlu1 %796  ;;  %v2033_v38 = vsel %vm2032_vm3, %v4568_v44, %v2031_v17  ;;  %v1283_v32 = vsub.f32 %v5283_v19, %v835_v35  ;;  %v5284_v62 = vld [vmem:[#allocation27_spill] sm:$0xff]  ;;  %v5285_v17 = vld [vmem:[#allocation41_spill] sm:$0xff]  ;;  %v1192_v44 = vadd.f32 1e-06, %v1106_v40  ;;  %vm1146_vm2 = vcmp.eq.f32.partialorder %v4643_v52, 0.0 }
 0x360   : > { %v1380_v20 = vsel %vm1364_vm7, %v1345_v2, 0.0  ;;  %v1318_v2 = vmul.f32 0.35355338, %v2983_v54  ;;  %v2036_v23 = vsel %vm2034_vm5, %v2035_v49, %v2033_v38  ;;  %v1084_v38 = vand.u32 2147483648, %v4686_v63 }
 0x361   : > { %1412 = vst [vmem:[%s4313_s10 + $0x78] sm:$0xff] %v1380_v20  ;;  %v2233_v20 = vsub.f32 %v5284_v62, %v1785_v33  ;;  %v2140_v33 = vadd.f32 1e-06, %v2036_v23  ;;  %v4724_v49 = vpop.xlane.xlu0 %1709  ;;  %v1119_v23 = vand.u32 2147483648, %v4598_v53  ;;  %vm1158_vm5 = vcmp.eq.f32.partialorder %v4674_v51, inf }
 0x362   : > { %1755 = vadd.xlane.f32.xlu1 %v5282_v7 }
 0x363   : > { %v2985_v1 = vpop.eup %2984  ;;  %v795_v34 = vpop.xlane.xlu1 %794 }
 0x364   : > { %v1315_v31 = vmul.f32 0.35355338, %v2985_v1  ;;  %v838_v4 = vmul.f32 0.125, %v795_v34  ;;  %v2987_v13 = vpop.eup %2986 }
 0x365   : > { %v1115_v35 = vmul.f32 %v2987_v13, %v4598_v53 }
 0x366   : > { %v1347_v60 = vmul.f32 %v1315_v31, %v1283_v32  ;;  %v1286_v7 = vsub.f32 %v4049_v9, %v838_v4  ;;  %1759 = vadd.xlane.f32.xlu1 %v5285_v17  ;;  %v5287_v31 = vld [vmem:[#allocation47_spill] sm:$0xff]  ;;  %v4744_v4 = vpop.xlane.xlu0 %1839 }
 0x367   : > { %v2989_v30 = vpop.eup %2988  ;;  %v925_v56 = vpop.xlane.xlu1 %924  ;;  %v1117_v40 = vsel %vm1116_vm6, %v4598_v53, %v1115_v35 }
 0x368   : > { %v2991_v59 = vpop.eup %2990  ;;  %v1382_v54 = vsel %vm1364_vm7, %v1347_v60, 0.0  ;;  %v2265_v37 = vmul.f32 %v2989_v30, %v2233_v20  ;;  %v1350_v1 = vmul.f32 %v1318_v2, %v1286_v7  ;;  %2992 = vrsqrt.f32 %v925_v56  ;;  %v5286_v30 = vld [vmem:[#allocation43_spill] sm:$0xff] }
 0x369   : > { %1414 = vst [vmem:[%s4313_s10 + $0x88] sm:$0xff] %v1382_v54  ;;  %v1080_v9 = vmul.f32 %v2991_v59, %v4686_v63  ;;  %2994 = vrcp.f32 %v1192_v44  ;;  %vm1095_vm12 = vcmp.eq.f32.partialorder %v925_v56, inf  ;;  %vm1097_vm13 = vcmp.eq.f32.partialorder %v925_v56, 0.0 }
 0x36a   : > { %2313 = vst [vmem:[%s3884_s7 + $0x100] sm:$0xff] %v2265_v37  ;;  %v1385_v60 = vsel %vm1364_vm7, %v1350_v1, 0.0  ;;  %1763 = vadd.xlane.f32.xlu1 %v5286_v30  ;;  %2996 = vrsqrt.f32 %v4629_v45  ;;  %v4750_v54 = vpop.xlane.xlu0 %1887  ;;  %v837_v37 = vmul.f32 0.125, %v4668_v16  ;;  %v1098_v1 = vand.u32 2147483648, %v925_v56  ;;  %v5288_v30 = vld [vmem:[#allocation44_spill] sm:$0xff] }
 0x36b   : > { %v1082_v7 = vsel %vm1081_vm8, %v4686_v63, %v1080_v9  ;;  %1417 = vst [vmem:[%s4313_s10 + $0xa0] sm:$0xff] %v1385_v60  ;;  %v1870_v34 = vpop.xlane.xlu1 %1869  ;;  %v1120_v63 = vsel %vm1118_vm10, %v1119_v23, %v1117_v40  ;;  %vm1160_vm8 = vcmp.eq.f32.partialorder %v4674_v51, 0.0 }
 0x36c   : > { %v1085_v19 = vsel %vm1083_vm9, %v1084_v38, %v1082_v7  ;;  %2998 = vrsqrt.f32 %v1870_v34  ;;  %v1194_v13 = vadd.f32 1e-06, %v1120_v63  ;;  %vm2025_vm14 = vcmp.eq.f32.partialorder %v1870_v34, inf }
 0x36d   : > { %3000 = vrcp.f32 %v2140_v33  ;;  %v1189_v32 = vadd.f32 1e-06, %v1085_v19  ;;  %v2028_v63 = vand.u32 2147483648, %v1870_v34  ;;  %vm2027_vm15 = vcmp.eq.f32.partialorder %v1870_v34, 0.0 }
 0x36e   : > { %1767 = vadd.xlane.f32.xlu1 %v5287_v31 }
 0x36f   : > { %3002 = vrcp.f32 %v1189_v32  ;;  %v4746_v2 = vpop.xlane.xlu1 %800 }
 0x370   : > { %3004 = vrsqrt.f32 %v4643_v52 }
 0x371   : > { %3006 = vrcp.f32 %v1194_v13 }
 0x372   : > { %v2993_v62 = vpop.eup %2992 }
 0x373   : > { %v1744_v20 = vpop.xlane.xlu1 %1743  ;;  %v2995_v44 = vpop.eup %2994  ;;  %v1094_v59 = vmul.f32 %v2993_v62, %v925_v56 }
 0x374   : > { %v1788_v53 = vmul.f32 0.125, %v1744_v20  ;;  %v2997_v35 = vpop.eup %2996  ;;  %v1320_v19 = vmul.f32 0.35355338, %v2995_v44  ;;  %v4758_v44 = vpop.xlane.xlu0 %1713 }
 0x375   : > { %v1096_v9 = vsel %vm1095_vm12, %v925_v56, %v1094_v59  ;;  %v1129_v31 = vmul.f32 %v2997_v35, %v4629_v45  ;;  %v1285_v59 = vsub.f32 %v5288_v30, %v837_v37 }
 0x376   : > { %v2999_v33 = vpop.eup %2998  ;;  %v2236_v38 = vsub.f32 %v4061_v15, %v1788_v53  ;;  %v1099_v23 = vsel %vm1097_vm13, %v1098_v1, %v1096_v9  ;;  %v1133_v9 = vand.u32 2147483648, %v4629_v45 }
 0x377   : > { %v3001_v60 = vpop.eup %3000  ;;  %v2024_v7 = vmul.f32 %v2999_v33, %v1870_v34  ;;  %v799_v40 = vpop.xlane.xlu1 %798  ;;  %v1191_v32 = vadd.f32 1e-06, %v1099_v23  ;;  %v1131_v30 = vsel %vm1130_vm11, %v4629_v45, %v1129_v31  ;;  %v839_v45 = vmul.f32 0.125, %v4701_v39 }
 0x378   : > { %v2268_v62 = vmul.f32 %v3001_v60, %v2236_v38  ;;  %v840_v20 = vmul.f32 0.125, %v799_v40  ;;  %v1134_v40 = vsel %vm1132_vm0, %v1133_v9, %v1131_v30  ;;  %v1147_v39 = vand.u32 2147483648, %v4643_v52 }
 0x379   : > { %v3003_v16 = vpop.eup %3002  ;;  %v2026_v56 = vsel %vm2025_vm14, %v1870_v34, %v2024_v7  ;;  %3008 = vrcp.f32 %v1191_v32  ;;  %v1787_v7 = vmul.f32 0.125, %v4517_v14  ;;  %v1196_v32 = vadd.f32 1e-06, %v1134_v40 }
 0x37a   : > { %v1317_v15 = vmul.f32 0.35355338, %v3003_v16  ;;  %v2029_v13 = vsel %vm2027_vm15, %v2028_v63, %v2026_v56  ;;  %2319 = vst [vmem:[%s3884_s7 + $0x130] sm:$0xff] %v2268_v62  ;;  %v1288_v53 = vsub.f32 %v4073_v41, %v840_v20  ;;  %v3005_v37 = vpop.eup %3004  ;;  %v1287_v56 = vsub.f32 %v4284_v18, %v839_v45 }
 0x37b   : > { %v2139_v1 = vadd.f32 1e-06, %v2029_v13  ;;  %v929_v33 = vpop.xlane.xlu1 %928  ;;  %v3007_v23 = vpop.eup %3006  ;;  %v2235_v62 = vsub.f32 %v4046_v8, %v1787_v7  ;;  %vm1906_vm14 = vcmp.eq.f32.partialorder %v4691_v58, inf  ;;  %vm1908_vm15 = vcmp.eq.f32.partialorder %v4691_v58, 0.0 }
 0x37c   : > { %v1349_v38 = vmul.f32 %v1317_v15, %v1285_v59  ;;  %v1352_v35 = vmul.f32 %v1320_v19, %v1288_v53  ;;  %3010 = vrsqrt.f32 %v929_v33  ;;  %v4774_v19 = vpop.xlane.xlu0 %1843  ;;  %v1322_v16 = vmul.f32 0.35355338, %v3007_v23 }
 0x37d   : > { %3012 = vrcp.f32 %v2139_v1  ;;  %v1143_v59 = vmul.f32 %v3005_v37, %v4643_v52  ;;  %vm1109_vm3 = vcmp.eq.f32.partialorder %v929_v33, inf  ;;  %vm1111_vm4 = vcmp.eq.f32.partialorder %v929_v33, 0.0 }
 0x37e   : > { %v1384_v34 = vsel %vm1364_vm7, %v1349_v38, 0.0  ;;  %v1387_v41 = vsel %vm1364_vm7, %v1352_v35, 0.0  ;;  %3014 = vrsqrt.f32 %v4674_v51  ;;  %v1112_v35 = vand.u32 2147483648, %v929_v33 }
 0x37f   : > { %1416 = vst [vmem:[%s4313_s10 + $0x98] sm:$0xff] %v1384_v34  ;;  %1419 = vst [vmem:[%s4313_s10 + $0xb0] sm:$0xff] %v1387_v41  ;;  %v4771_v60 = vpop.xlane.xlu1 %804  ;;  %3016 = vrcp.f32 %v1196_v32  ;;  %v1145_v34 = vsel %vm1144_vm1, %v4643_v52, %v1143_v59  ;;  %vm1920_vm1 = vcmp.eq.f32.partialorder %v4744_v4, inf }
 0x380   : > { %v4785_v53 = vpop.xlane.xlu0 %1891  ;;  %v1148_v45 = vsel %vm1146_vm2, %v1147_v39, %v1145_v34  ;;  %v5289_v34 = vld [vmem:[#allocation49_spill] sm:$0xff] }
 0x383   : > { %v803_v31 = vpop.xlane.xlu1 %802  ;;  %v3009_v63 = vpop.eup %3008 }
 0x384   : > { %v842_v20 = vmul.f32 0.125, %v803_v31  ;;  %v1319_v15 = vmul.f32 0.35355338, %v3009_v63  ;;  %v4797_v31 = vpop.xlane.xlu0 %1717 }
 0x386   : > { %v3011_v14 = vpop.eup %3010  ;;  %v1290_v13 = vsub.f32 %v4087_v57, %v842_v20  ;;  %v1351_v1 = vmul.f32 %v1319_v15, %v1287_v56  ;;  %v841_v56 = vmul.f32 0.125, %v4746_v2 }
 0x387   : > { %v3013_v8 = vpop.eup %3012  ;;  %v1108_v9 = vmul.f32 %v3011_v14, %v929_v33  ;;  %v933_v18 = vpop.xlane.xlu1 %932 }
 0x388   : > { %v2267_v38 = vmul.f32 %v3013_v8, %v2235_v62  ;;  %v1354_v30 = vmul.f32 %v1322_v16, %v1290_v13  ;;  %3018 = vrsqrt.f32 %v933_v18  ;;  %v1386_v57 = vsel %vm1364_vm7, %v1351_v1, 0.0  ;;  %v3015_v32 = vpop.eup %3014  ;;  %v4803_v59 = vpop.xlane.xlu0 %1847 }
 0x389   : > { %v1110_v41 = vsel %vm1109_vm3, %v929_v33, %v1108_v9  ;;  %1418 = vst [vmem:[%s4313_s10 + $0xa8] sm:$0xff] %v1386_v57  ;;  %v1198_v33 = vadd.f32 1e-06, %v1148_v45  ;;  %v3017_v62 = vpop.eup %3016  ;;  %v1157_v16 = vmul.f32 %v3015_v32, %v4674_v51  ;;  %vm1123_vm6 = vcmp.eq.f32.partialorder %v933_v18, inf }
 0x38a   : > { %2317 = vst [vmem:[%s3884_s7 + $0x120] sm:$0xff] %v2267_v38  ;;  %v1113_v37 = vsel %vm1111_vm4, %v1112_v35, %v1110_v41  ;;  %v1389_v23 = vsel %vm1364_vm7, %v1354_v30, 0.0  ;;  %v1126_v14 = vand.u32 2147483648, %v933_v18  ;;  %v1324_v13 = vmul.f32 0.35355338, %v3017_v62 }
 0x38b   : > { %v1193_v7 = vadd.f32 1e-06, %v1113_v37  ;;  %1421 = vst [vmem:[%s4313_s10 + $0xc0] sm:$0xff] %v1389_v23  ;;  %v1874_v40 = vpop.xlane.xlu1 %1873  ;;  %vm1125_vm9 = vcmp.eq.f32.partialorder %v933_v18, 0.0  ;;  %v1159_v9 = vsel %vm1158_vm5, %v4674_v51, %v1157_v16  ;;  %v1161_v38 = vand.u32 2147483648, %v4674_v51 }
 0x38c   : > { %3020 = vrsqrt.f32 %v1874_v40  ;;  %v1289_v57 = vsub.f32 %v5289_v34, %v841_v56  ;;  %vm2039_vm10 = vcmp.eq.f32.partialorder %v1874_v40, inf  ;;  %v2042_v45 = vand.u32 2147483648, %v1874_v40 }
 0x38d   : > { %3022 = vrcp.f32 %v1193_v7  ;;  %vm2041_vm11 = vcmp.eq.f32.partialorder %v1874_v40, 0.0  ;;  %vm1922_vm5 = vcmp.eq.f32.partialorder %v4744_v4, 0.0 }
 0x38e   : > { %3024 = vrcp.f32 %v1198_v33 }
 0x38f   : > { %v4799_v63 = vpop.xlane.xlu1 %808 }
 0x392   : > { %v3019_v20 = vpop.eup %3018 }
 0x393   : > { %v1122_v15 = vmul.f32 %v3019_v20, %v933_v18  ;;  %v807_v52 = vpop.xlane.xlu1 %806 }
 0x394   : > { %v844_v39 = vmul.f32 0.125, %v807_v52 }
 0x395   : > { %v1124_v8 = vsel %vm1123_vm6, %v933_v18, %v1122_v15  ;;  %v4811_v18 = vpop.xlane.xlu0 %1895  ;;  %v1162_v15 = vsel %vm1160_vm8, %v1161_v38, %v1159_v9  ;;  %vm2046_vm6 = vcmp.eq.f32.partialorder %v4614_v11, inf  ;;  %vm2048_vm8 = vcmp.eq.f32.partialorder %v4614_v11, 0.0 }
 0x396   : > { %v3021_v1 = vpop.eup %3020  ;;  %v1127_v35 = vsel %vm1125_vm9, %v1126_v14, %v1124_v8  ;;  %v1292_v30 = vsub.f32 %v4112_v50, %v844_v39  ;;  %vm2060_vm9 = vcmp.eq.f32.partialorder %v4660_v42, inf }
 0x397   : > { %v3023_v2 = vpop.eup %3022  ;;  %v1195_v41 = vadd.f32 1e-06, %v1127_v35  ;;  %v2038_v37 = vmul.f32 %v3021_v1, %v1874_v40  ;;  %v937_v23 = vpop.xlane.xlu1 %936 }
 0x398   : > { %v1321_v7 = vmul.f32 0.35355338, %v3023_v2  ;;  %v1356_v32 = vmul.f32 %v1324_v13, %v1292_v30  ;;  %3026 = vrsqrt.f32 %v937_v23  ;;  %v3025_v14 = vpop.eup %3024  ;;  %v843_v13 = vmul.f32 0.125, %v4771_v60 }
 0x399   : > { %3028 = vrcp.f32 %v1195_v41  ;;  %v2040_v33 = vsel %vm2039_vm10, %v1874_v40, %v2038_v37  ;;  %v1200_v40 = vadd.f32 1e-06, %v1162_v15  ;;  %v1746_v39 = vpop.xlane.xlu0 %1745  ;;  %v1326_v35 = vmul.f32 0.35355338, %v3025_v14 }
 0x39a   : > { %v1353_v62 = vmul.f32 %v1321_v7, %v1289_v57  ;;  %v2043_v50 = vsel %vm2041_vm11, %v2042_v45, %v2040_v33  ;;  %v1391_v20 = vsel %vm1364_vm7, %v1356_v32, 0.0  ;;  %3030 = vrsqrt.f32 %v4691_v58 }
 0x39b   : > { %v2141_v16 = vadd.f32 1e-06, %v2043_v50  ;;  %1423 = vst [vmem:[%s4313_s10 + $0xd0] sm:$0xff] %v1391_v20  ;;  %v4817_v56 = vpop.xlane.xlu1 %812  ;;  %v1789_v2 = vmul.f32 0.125, %v1746_v39  ;;  %v1291_v9 = vsub.f32 %v4387_v27, %v843_v13  ;;  %vm1137_vm12 = vcmp.eq.f32.partialorder %v937_v23, inf }
 0x39c   : > { %v1388_v52 = vsel %vm1364_vm7, %v1353_v62, 0.0  ;;  %v1140_v37 = vand.u32 2147483648, %v937_v23  ;;  %vm1139_vm13 = vcmp.eq.f32.partialorder %v937_v23, 0.0  ;;  %v1909_v39 = vand.u32 2147483648, %v4691_v58 }
 0x39d   : > { %1420 = vst [vmem:[%s4313_s10 + $0xb8] sm:$0xff] %v1388_v52  ;;  %3032 = vrcp.f32 %v2141_v16  ;;  %vm2062_vm10 = vcmp.eq.f32.partialorder %v4660_v42, 0.0 }
 0x39e   : > { %3034 = vrcp.f32 %v1200_v40 }
 0x39f   : > { %v811_v8 = vpop.xlane.xlu1 %810  ;;  %3036 = vrsqrt.f32 %v4744_v4 }
 0x3a0   : > { %v846_v1 = vmul.f32 0.125, %v811_v8 }
 0x3a2   : > { %v3027_v30 = vpop.eup %3026  ;;  %v1294_v34 = vsub.f32 %v4127_v36, %v846_v1  ;;  %v2237_v36 = vsub.f32 %v4288_v47, %v1789_v2  ;;  %v845_v1 = vmul.f32 0.125, %v4799_v63 }
 0x3a3   : > { %v3029_v51 = vpop.eup %3028  ;;  %v1136_v38 = vmul.f32 %v3027_v30, %v937_v23  ;;  %v941_v57 = vpop.xlane.xlu1 %940 }
 0x3a4   : > { %v1323_v41 = vmul.f32 0.35355338, %v3029_v51  ;;  %v1358_v60 = vmul.f32 %v1326_v35, %v1294_v34  ;;  %3038 = vrsqrt.f32 %v941_v57  ;;  %v3031_v7 = vpop.eup %3030  ;;  %vm1151_vm0 = vcmp.eq.f32.partialorder %v941_v57, inf }
 0x3a5   : > { %v1138_v45 = vsel %vm1137_vm12, %v937_v23, %v1136_v38  ;;  %v1905_v16 = vmul.f32 %v3031_v7, %v4691_v58  ;;  %v1154_v2 = vand.u32 2147483648, %v941_v57  ;;  %vm1153_vm2 = vcmp.eq.f32.partialorder %v941_v57, 0.0 }
 0x3a6   : > { %v1355_v32 = vmul.f32 %v1323_v41, %v1291_v9  ;;  %v1141_v33 = vsel %vm1139_vm13, %v1140_v37, %v1138_v45  ;;  %v1393_v27 = vsel %vm1364_vm7, %v1358_v60, 0.0  ;;  %v1293_v7 = vsub.f32 %v4434_v48, %v845_v1 }
 0x3a7   : > { %v3033_v62 = vpop.eup %3032  ;;  %v1197_v50 = vadd.f32 1e-06, %v1141_v33  ;;  %1425 = vst [vmem:[%s4313_s10 + $0xe0] sm:$0xff] %v1393_v27  ;;  %v1878_v20 = vpop.xlane.xlu1 %1877  ;;  %v1907_v14 = vsel %vm1906_vm14, %v4691_v58, %v1905_v16 }
 0x3a8   : > { %v1390_v15 = vsel %vm1364_vm7, %v1355_v32, 0.0  ;;  %v2269_v52 = vmul.f32 %v3033_v62, %v2237_v36  ;;  %3040 = vrsqrt.f32 %v1878_v20  ;;  %v3035_v23 = vpop.eup %3034  ;;  %v1910_v8 = vsel %vm1908_vm15, %v1909_v39, %v1907_v14 }
 0x3a9   : > { %1422 = vst [vmem:[%s4313_s10 + $0xc8] sm:$0xff] %v1390_v15  ;;  %3042 = vrcp.f32 %v1197_v50  ;;  %v3037_v40 = vpop.eup %3036  ;;  %v1328_v51 = vmul.f32 0.35355338, %v3035_v23  ;;  %v2122_v37 = vadd.f32 1e-06, %v1910_v8  ;;  %vm2053_vm3 = vcmp.eq.f32.partialorder %v1878_v20, inf }
 0x3aa   : > { %3044 = vrsqrt.f32 %v4614_v11  ;;  %2321 = vst [vmem:[%s3884_s7 + $0x140] sm:$0xff] %v2269_v52  ;;  %v1919_v9 = vmul.f32 %v3037_v40, %v4744_v4  ;;  %v2056_v62 = vand.u32 2147483648, %v1878_v20  ;;  %vm2055_vm4 = vcmp.eq.f32.partialorder %v1878_v20, 0.0 }
 0x3ab   : > { %v4839_v47 = vpop.xlane.xlu1 %816  ;;  %3046 = vrsqrt.f32 %v4660_v42  ;;  %v2049_v8 = vand.u32 2147483648, %v4614_v11  ;;  %vm1934_vm15 = vcmp.eq.f32.partialorder %v4774_v19, inf }
 0x3ac   : > { %3048 = vrsqrt.f32 %v4774_v19 }
 0x3ae   : > { %v3039_v13 = vpop.eup %3038 }
 0x3af   : > { %v1150_v35 = vmul.f32 %v3039_v13, %v941_v57  ;;  %v815_v30 = vpop.xlane.xlu1 %814 }
 0x3b0   : > { %v848_v34 = vmul.f32 0.125, %v815_v30  ;;  %v847_v30 = vmul.f32 0.125, %v4817_v56 }
 0x3b1   : > { %v1152_v38 = vsel %vm1151_vm0, %v941_v57, %v1150_v35  ;;  %v1921_v57 = vsel %vm1920_vm1, %v4744_v4, %v1919_v9  ;;  %v1750_v35 = vpop.xlane.xlu0 %1749  ;;  %vm1936_vm1 = vcmp.eq.f32.partialorder %v4774_v19, 0.0 }
 0x3b2   : > { %v3041_v41 = vpop.eup %3040  ;;  %v1155_v58 = vsel %vm1153_vm2, %v1154_v2, %v1152_v38  ;;  %v1296_v60 = vsub.f32 %v4153_v29, %v848_v34  ;;  %v1923_v29 = vand.u32 2147483648, %v4744_v4  ;;  %v1791_v38 = vmul.f32 0.125, %v1750_v35 }
 0x3b3   : > { %v3043_v63 = vpop.eup %3042  ;;  %v1199_v45 = vadd.f32 1e-06, %v1155_v58  ;;  %v2052_v36 = vmul.f32 %v3041_v41, %v1878_v20  ;;  %v945_v32 = vpop.xlane.xlu1 %944 }
 0x3b4   : > { %v3045_v33 = vpop.eup %3044  ;;  %v1325_v27 = vmul.f32 0.35355338, %v3043_v63  ;;  %v1360_v50 = vmul.f32 %v1328_v51, %v1296_v60  ;;  %3050 = vrsqrt.f32 %v945_v32  ;;  %vm1165_vm11 = vcmp.eq.f32.partialorder %v945_v32, inf }
 0x3b5   : > { %3052 = vrcp.f32 %v1199_v45  ;;  %v2054_v16 = vsel %vm2053_vm3, %v1878_v20, %v2052_v36  ;;  %v2045_v23 = vmul.f32 %v3045_v33, %v4614_v11  ;;  %v1924_v20 = vsel %vm1922_vm5, %v1923_v29, %v1921_v57  ;;  %v3047_v13 = vpop.eup %3046 }
 0x3b6   : > { %v1357_v48 = vmul.f32 %v1325_v27, %v1293_v7  ;;  %v2057_v15 = vsel %vm2055_vm4, %v2056_v62, %v2054_v16  ;;  %v1395_v52 = vsel %vm1364_vm7, %v1360_v50, 0.0  ;;  %3054 = vrcp.f32 %v2122_v37  ;;  %v3049_v34 = vpop.eup %3048 }
 0x3b7   : > { %v2143_v14 = vadd.f32 1e-06, %v2057_v15  ;;  %1427 = vst [vmem:[%s4313_s10 + $0xf0] sm:$0xff] %v1395_v52  ;;  %v4860_v40 = vpop.xlane.xlu1 %1833  ;;  %v2047_v1 = vsel %vm2046_vm6, %v4614_v11, %v2045_v23  ;;  %v2124_v4 = vadd.f32 1e-06, %v1924_v20  ;;  %v2059_v37 = vmul.f32 %v3047_v13, %v4660_v42 }
 0x3b8   : > { %v1392_v39 = vsel %vm1364_vm7, %v1357_v48, 0.0  ;;  %3056 = vrsqrt.f32 %v4860_v40  ;;  %v2050_v9 = vsel %vm2048_vm8, %v2049_v8, %v2047_v1  ;;  %v1295_v11 = vsub.f32 %v4465_v25, %v847_v30 }
 0x3b9   : > { %1424 = vst [vmem:[%s4313_s10 + $0xd8] sm:$0xff] %v1392_v39  ;;  %3058 = vrcp.f32 %v2143_v14  ;;  %v1168_v63 = vand.u32 2147483648, %v945_v32  ;;  %v1933_v36 = vmul.f32 %v3049_v34, %v4774_v19  ;;  %vm1167_vm12 = vcmp.eq.f32.partialorder %v945_v32, 0.0 }
 0x3ba   : > { %v2239_v62 = vsub.f32 %v4292_v24, %v1791_v38  ;;  %vm1899_vm13 = vcmp.eq.f32.partialorder %v4860_v40, inf  ;;  %v1902_v15 = vand.u32 2147483648, %v4860_v40  ;;  %vm1901_vm14 = vcmp.eq.f32.partialorder %v4860_v40, 0.0 }
 0x3bb   : > { %v4871_v2 = vpop.xlane.xlu1 %1881  ;;  %v2142_v39 = vadd.f32 1e-06, %v2050_v9  ;;  %v4896_v13 = vmul.f32 0.125, %v4679_v5  ;;  %v2061_v1 = vsel %vm2060_vm9, %v4660_v42, %v2059_v37  ;;  %v1937_v34 = vand.u32 2147483648, %v4774_v19 }
 0x3bc   : > { %3060 = vrsqrt.f32 %v4871_v2  ;;  %vm2067_vm0 = vcmp.eq.f32.partialorder %v4871_v2, inf  ;;  %vm2069_vm2 = vcmp.eq.f32.partialorder %v4871_v2, 0.0  ;;  %vm2074_vm3 = vcmp.eq.f32.partialorder %v4714_v12, inf }
 0x3bd   : > { %3062 = vrsqrt.f32 %v4714_v12  ;;  %vm1948_vm5 = vcmp.eq.f32.partialorder %v4803_v59, inf  ;;  %vm1950_vm9 = vcmp.eq.f32.partialorder %v4803_v59, 0.0 }
 0x3be   : > { %v3051_v51 = vpop.eup %3050  ;;  %3064 = vrcp.f32 %v2124_v4  ;;  %v1935_v4 = vsel %vm1934_vm15, %v4774_v19, %v1933_v36 }
 0x3bf   : > { %v3053_v41 = vpop.eup %3052  ;;  %v1164_v56 = vmul.f32 %v3051_v51, %v945_v32  ;;  %v1708_v58 = vpop.xlane.xlu1 %1707  ;;  %3066 = vrsqrt.f32 %v4803_v59  ;;  %v2070_v51 = vand.u32 2147483648, %v4871_v2  ;;  %v1938_v37 = vsel %vm1936_vm1, %v1937_v34, %v1935_v4 }
 0x3c0   : > { %v1327_v60 = vmul.f32 0.35355338, %v3053_v41  ;;  %v1770_v7 = vmul.f32 0.125, %v1708_v58  ;;  %v3055_v45 = vpop.eup %3054  ;;  %v849_v58 = vmul.f32 0.125, %v4839_v47 }
 0x3c1   : > { %v1166_v33 = vsel %vm1165_vm11, %v945_v32, %v1164_v56 }
 0x3c2   : > { %v3057_v27 = vpop.eup %3056  ;;  %v1359_v50 = vmul.f32 %v1327_v60, %v1295_v11  ;;  %v1169_v57 = vsel %vm1167_vm12, %v1168_v63, %v1166_v33  ;;  %v2218_v25 = vsub.f32 %v5264_v55, %v1770_v7  ;;  %v2063_v55 = vand.u32 2147483648, %v4660_v42 }
 0x3c3   : > { %v3059_v16 = vpop.eup %3058  ;;  %v1201_v29 = vadd.f32 1e-06, %v1169_v57  ;;  %v1898_v48 = vmul.f32 %v3057_v27, %v4860_v40  ;;  %v4886_v52 = vpop.xlane.xlu1 %1837  ;;  %v2126_v42 = vadd.f32 1e-06, %v1938_v37 }
 0x3c4   : > { %v1394_v32 = vsel %vm1364_vm7, %v1359_v50, 0.0  ;;  %v2271_v24 = vmul.f32 %v3059_v16, %v2239_v62  ;;  %v2250_v23 = vmul.f32 %v3055_v45, %v2218_v25  ;;  %3068 = vrsqrt.f32 %v4886_v52 }
 0x3c5   : > { %1426 = vst [vmem:[%s4313_s10 + $0xe8] sm:$0xff] %v1394_v32  ;;  %3070 = vrcp.f32 %v1201_v29  ;;  %v1900_v14 = vsel %vm1899_vm13, %v4860_v40, %v1898_v48  ;;  %v2064_v41 = vsel %vm2062_vm10, %v2063_v55, %v2061_v1  ;;  %v1297_v62 = vsub.f32 %v4513_v26, %v849_v58 }
 0x3c6   : > { %v3061_v20 = vpop.eup %3060  ;;  %2325 = vst [vmem:[%s3884_s7 + $0x160] sm:$0xff] %v2271_v24  ;;  %v1903_v8 = vsel %vm1901_vm14, %v1902_v15, %v1900_v14  ;;  %2283 = vst [vmem:[%s3884_s7 + $0x10] sm:$0xff] %v2250_v23  ;;  %v2144_v7 = vadd.f32 1e-06, %v2064_v41  ;;  %vm1913_vm4 = vcmp.eq.f32.partialorder %v4886_v52, inf  ;;  %v1916_v16 = vand.u32 2147483648, %v4886_v52 }
 0x3c7   : > { %v2121_v35 = vadd.f32 1e-06, %v1903_v8  ;;  %v2066_v30 = vmul.f32 %v3061_v20, %v4871_v2  ;;  %v4906_v40 = vpop.xlane.xlu1 %1885  ;;  %v3063_v5 = vpop.eup %3062  ;;  %vm1915_vm6 = vcmp.eq.f32.partialorder %v4886_v52, 0.0  ;;  %v1951_v48 = vand.u32 2147483648, %v4803_v59 }
 0x3c8   : > { %3072 = vrsqrt.f32 %v4906_v40  ;;  %v3065_v9 = vpop.eup %3064  ;;  %v4926_v36 = vmul.f32 %v3063_v5, %v4714_v12  ;;  %vm2081_vm8 = vcmp.eq.f32.partialorder %v4906_v40, inf  ;;  %v2084_v1 = vand.u32 2147483648, %v4906_v40 }
 0x3c9   : > { %3074 = vrcp.f32 %v2121_v35  ;;  %v2068_v38 = vsel %vm2067_vm0, %v4871_v2, %v2066_v30  ;;  %v3067_v56 = vpop.eup %3066  ;;  %v2217_v2 = vsub.f32 %v4165_v6, %v4896_v13  ;;  %v1754_v6 = vpop.xlane.xlu0 %1753  ;;  %vm2083_vm10 = vcmp.eq.f32.partialorder %v4906_v40, 0.0 }
 0x3ca   : > { %3076 = vrsqrt.f32 %v4750_v54  ;;  %v2071_v11 = vsel %vm2069_vm2, %v2070_v51, %v2068_v38  ;;  %v1947_v27 = vmul.f32 %v3067_v56, %v4803_v59  ;;  %v4945_v15 = vmul.f32 0.125, %v1754_v6 }
 0x3cb   : > { %v2145_v60 = vadd.f32 1e-06, %v2071_v11  ;;  %v1712_v63 = vpop.xlane.xlu1 %1711  ;;  %3078 = vrcp.f32 %v2142_v39 }
 0x3cc   : > { %v1772_v19 = vmul.f32 0.125, %v1712_v63  ;;  %v1949_v55 = vsel %vm1948_vm5, %v4803_v59, %v1947_v27  ;;  %v2241_v30 = vsub.f32 %v4305_v46, %v4945_v15 }
 0x3cd   : > { %3080 = vrcp.f32 %v2145_v60  ;;  %v1952_v35 = vsel %vm1950_vm9, %v1951_v48, %v1949_v55 }
 0x3ce   : > { %v3069_v45 = vpop.eup %3068  ;;  %3082 = vrsqrt.f32 %v4785_v53  ;;  %v2220_v47 = vsub.f32 %v5270_v61, %v1772_v19 }
 0x3cf   : > { %v3071_v33 = vpop.eup %3070  ;;  %v1912_v50 = vmul.f32 %v3069_v45, %v4886_v52  ;;  %v4935_v57 = vpop.xlane.xlu1 %1841 }
 0x3d0   : > { %v1329_v25 = vmul.f32 0.35355338, %v3071_v33  ;;  %v2252_v29 = vmul.f32 %v3065_v9, %v2220_v47  ;;  %3084 = vrsqrt.f32 %v4935_v57 }
 0x3d1   : > { %3086 = vrcp.f32 %v2126_v42  ;;  %v1914_v26 = vsel %vm1913_vm4, %v4886_v52, %v1912_v50 }
 0x3d2   : > { %v3073_v61 = vpop.eup %3072  ;;  %v1361_v32 = vmul.f32 %v1329_v25, %v1297_v62  ;;  %v1917_v24 = vsel %vm1915_vm6, %v1916_v16, %v1914_v26  ;;  %2287 = vst [vmem:[%s3884_s7 + $0x30] sm:$0xff] %v2252_v29 }
 0x3d3   : > { %v3075_v23 = vpop.eup %3074  ;;  %v2123_v14 = vadd.f32 1e-06, %v1917_v24  ;;  %v2080_v20 = vmul.f32 %v3073_v61, %v4906_v40  ;;  %v4953_v52 = vpop.xlane.xlu1 %1889 }
 0x3d4   : > { %v3077_v39 = vpop.eup %3076  ;;  %v1396_v13 = vsel %vm1364_vm7, %v1361_v32, 0.0  ;;  %v2249_v8 = vmul.f32 %v3075_v23, %v2217_v2  ;;  %3088 = vrsqrt.f32 %v4953_v52 }
 0x3d5   : > { %1428 = vst [vmem:[%s4313_s10 + $0xf8] sm:$0xff] %v1396_v13  ;;  %3090 = vrcp.f32 %v2123_v14  ;;  %v2082_v4 = vsel %vm2081_vm8, %v4906_v40, %v2080_v20  ;;  %v4968_v22 = vpop.eup %3078 }
 0x3d6   : > { %3092 = vrcp.f32 %v2144_v7  ;;  %2281 = vst [vmem:[%s3884_s7] sm:$0xff] %v2249_v8  ;;  %v2085_v5 = vsel %vm2083_vm10, %v2084_v1, %v2082_v4 }
 0x3d7   : > { %3276 = shalt.err (!%p3273_p6)
}
 0x3d8   : > { %s3277_s16 = scalar_lea.hbm %s4958_s20, 4096  ;;  %s3281_s18 = scalar_lea.hbm %s5156_s5, 16384 }
 0x3d9   : > { %p3278_p9 = scmp.ne.s32.totalorder %s4958_s20, %s3277_s16  ;;  %p3282_p10 = scmp.lt.u32.totalorder %s4958_s20, %s5156_s5 }
 0x3da   : > { %p3283_p5 = scmp.lt.u32.totalorder %s3281_s18, %s3277_s16  ;;  %p3285_p11 = scmp.lt.u32.totalorder %s3277_s16, %s4958_s20 }
 0x3db   : > { %p3279_p1 = pnand %p3278_p9, %p5290_p4 }
 0x3dc   : > { %p3284_p12 = por %p3283_p5, %p3282_p10 }
 0x3dd   : > { %p3280_p3 = pneg %p3279_p1 }
 0x3de   : > { %p3286_p7 = por %p3285_p11, %p3284_p12 }
 0x3e0   : > { %p3287_p8 = pnand %p3286_p7, %p3280_p3 }
 0x3e2   : > { %3290 = shalt.err (!%p3287_p8)
}
 0x3e3   : > { %s3410_s29 = smov 128   ;;  %s3411_s15 = smov 8   ;;  %v3081_v46 = vpop.eup %3080  ;;  %vm2076_vm7 = vcmp.eq.f32.partialorder %v4714_v12, 0.0  ;;  %v2077_v59 = vand.u32 2147483648, %v4714_v12  ;;  %v2087_v40 = vmul.f32 %v3077_v39, %v4750_v54  ;;  %v2147_v34 = vadd.f32 1e-06, %v2085_v5  ;;  %v1716_v51 = vpop.xlane.xlu1 %1715 }
 0x3e4   : > { %2751 = dma.vmem_to_hbm [thread:$0]  (%p5290_p4), %s4948_s17, 4096, %s4958_s20, %s2346_s19, %s3410_s29, %s3410_s29, %s3411_s15   ;;  %v3083_v9 = vpop.eup %3082  ;;  %v2075_v38 = vsel %vm2074_vm3, %v4714_v12, %v4926_v36  ;;  %vm2088_vm11 = vcmp.eq.f32.partialorder %v4750_v54, inf  ;;  %v2273_v41 = vmul.f32 %v3081_v46, %v2241_v30  ;;  %v1774_v37 = vmul.f32 0.125, %v1716_v51  ;;  %v1758_v42 = vpop.xlane.xlu0 %1757 }
 0x3e5   : > { %v2128_v11 = vadd.f32 1e-06, %v1952_v35  ;;  %3094 = vrcp.f32 %v2147_v34  ;;  %v3085_v56 = vpop.eup %3084  ;;  %v1771_v58 = vmul.f32 0.125, %v4724_v49  ;;  %vm2090_vm12 = vcmp.eq.f32.partialorder %v4750_v54, 0.0  ;;  %s2647_s17 = sshll.u32 %s3385_s24, 6  ;;  %s2643_s20 = sshll.u32 %s3389_s25, 7 }
 0x3e6   : > { %3096 = vrsqrt.f32 %v4811_v18  ;;  %2329 = vst [vmem:[%s3884_s7 + $0x180] sm:$0xff] %v2273_v41  ;;  %v2222_v60 = vsub.f32 %v5275_v3, %v1774_v37  ;;  %v3087_v63 = vpop.eup %3086  ;;  %v2078_v19 = vsel %vm2076_vm7, %v2077_v59, %v2075_v38  ;;  %v2089_v7 = vsel %vm2088_vm11, %v4750_v54, %v2087_v40  ;;  %s2382_s19 = sadd.s32 %s2647_s17, %s2643_s20  ;;  %s2385_s24 = sshll.u32 %s3884_s7, 4  ;;  %s5091_s24 = int_to_ptr.vmem [resolvable:$true] %s2385_s24 }
 0x3e7   : > { %v2091_v2 = vand.u32 2147483648, %v4750_v54  ;;  %v1926_v45 = vmul.f32 %v3085_v56, %v4935_v57  ;;  %v5015_v49 = vpop.xlane.xlu1 %1845  ;;  %vm1927_vm13 = vcmp.eq.f32.partialorder %v4935_v57, inf  ;;  %v1930_v36 = vand.u32 2147483648, %v4935_v57  ;;  %v3089_v12 = vpop.eup %3088  ;;  %s2644_s25 = sshll.u32 %s2382_s19, 7  ;;  %s2351_s30 = scalar_lea.sflag [#allocation13], %s3692_s2 }
 0x3e8   : > { %v2254_v47 = vmul.f32 %v3087_v63, %v2222_v60  ;;  %3098 = vrsqrt.f32 %v5015_v49  ;;  %vm1929_vm14 = vcmp.eq.f32.partialorder %v4935_v57, 0.0  ;;  %v2146_v33 = vadd.f32 1e-06, %v2078_v19  ;;  %v3091_v50 = vpop.eup %3090  ;;  %v1762_v46 = vpop.xlane.xlu0 %1761  ;;  %s5096_s12 = scalar_lea.hbm %s5157_s6, %s2644_s25  ;;  %s3291_s16 = scalar_lea.vmem %s5091_s24, 8192 }
 0x3e9   : > { %3100 = vrcp.f32 %v2128_v11  ;;  %v1928_v3 = vsel %vm1927_vm13, %v4935_v57, %v1926_v45  ;;  %v2219_v27 = vsub.f32 %v5266_v10, %v1771_v58  ;;  %v1795_v6 = vmul.f32 0.125, %v1758_v42  ;;  %v5030_v57 = vpop.eup %3092  ;;  %p3292_p13 = scmp.ne.s32.totalorder %s5091_s24, %s3291_s16  ;;  %s3412_s10 = smov [#allocation12]  }
 0x3ea   : > { %v1931_v62 = vsel %vm1929_vm14, %v1930_v36, %v1928_v3  ;;  %2291 = vst [vmem:[%s3884_s7 + $0x50] sm:$0xff] %v2254_v47  ;;  %v2092_v25 = vsel %vm2090_vm12, %v2091_v2, %v2089_v7  ;;  %v2101_v16 = vmul.f32 %v3083_v9, %v4785_v53  ;;  %v2094_v26 = vmul.f32 %v3089_v12, %v4953_v52  ;;  %v5291_v47 = vld [vmem:[#allocation48_spill] sm:$0xff]  ;;  %s3295_s11 = sshll.u32 %s3412_s10, 4  ;;  %s3296_s11 = int_to_ptr.vmem [resolvable:$false] %s3295_s11 }
 0x3eb   : > { %v2125_v29 = vadd.f32 1e-06, %v1931_v62  ;;  %v5028_v61 = vpop.xlane.xlu1 %1893  ;;  %v2251_v48 = vmul.f32 %v3091_v50, %v2219_v27  ;;  %vm2095_vm15 = vcmp.eq.f32.partialorder %v4953_v52, inf  ;;  %v2098_v10 = vand.u32 2147483648, %v4953_v52  ;;  %p3293_p0 = pnand %p3292_p13, %p5290_p4  ;;  %s3297_s18 = scalar_lea.vmem %s3296_s11, 16384 }
 0x3ec   : > { %3102 = vrsqrt.f32 %v5028_v61  ;;  %vm2102_vm0 = vcmp.eq.f32.partialorder %v4785_v53, inf  ;;  %v2096_v54 = vsel %vm2095_vm15, %v4953_v52, %v2094_v26  ;;  %vm2097_vm1 = vcmp.eq.f32.partialorder %v4953_v52, 0.0  ;;  %p3298_p6 = scmp.lt.s32.totalorder %s5091_s24, %s3296_s11  ;;  %p3299_p9 = scmp.lt.s32.totalorder %s3297_s18, %s3291_s16 }
 0x3ed   : > { %3104 = vrcp.f32 %v2125_v29  ;;  %v2148_v15 = vadd.f32 1e-06, %v2092_v25  ;;  %v1773_v32 = vmul.f32 0.125, %v4758_v44  ;;  %v2243_v24 = vsub.f32 %v4321_v43, %v1795_v6  ;;  %2285 = vst [vmem:[%s3884_s7 + $0x20] sm:$0xff] %v2251_v48  ;;  %p3294_p2 = pneg %p3293_p0 }
 0x3ee   : > { %v2099_v23 = vsel %vm2097_vm1, %v2098_v10, %v2096_v54  ;;  %3106 = vrcp.f32 %v2146_v33  ;;  %v2105_v14 = vand.u32 2147483648, %v4785_v53  ;;  %v2103_v8 = vsel %vm2102_vm0, %v4785_v53, %v2101_v16  ;;  %v5292_v33 = vld [vmem:[#allocation35_spill] sm:$0xff]  ;;  %v1766_v10 = vpop.xlane.xlu0 %1765  ;;  %p3300_p1 = por %p3299_p9, %p3298_p6 }
 0x3ef   : > { %v3095_v55 = vpop.eup %3094  ;;  %v2149_v20 = vadd.f32 1e-06, %v2099_v23  ;;  %v1720_v39 = vpop.xlane.xlu1 %1719  ;;  %vm2104_vm2 = vcmp.eq.f32.partialorder %v4785_v53, 0.0  ;;  %v2221_v43 = vsub.f32 %v4224_v21, %v1773_v32  ;;  %vm2116_vm3 = vcmp.eq.f32.partialorder %v4811_v18, inf }
 0x3f0   : > { %v3097_v13 = vpop.eup %3096  ;;  %v2275_v52 = vmul.f32 %v3095_v55, %v2243_v24  ;;  %v1776_v1 = vmul.f32 0.125, %v1720_v39  ;;  %v2106_v30 = vsel %vm2104_vm2, %v2105_v14, %v2103_v8  ;;  %vm1941_vm4 = vcmp.eq.f32.partialorder %v5015_v49, inf  ;;  %v5294_v24 = vld [vmem:[#allocation45_spill] sm:$0xff]  ;;  %p3301_p3 = pnand %p3300_p1, %p3294_p2 }
 0x3f1   : > { %3108 = vrcp.f32 %v2149_v20  ;;  %v2115_v5 = vmul.f32 %v3097_v13, %v4811_v18  ;;  %v1944_v40 = vand.u32 2147483648, %v5015_v49  ;;  %vm2118_vm5 = vcmp.eq.f32.partialorder %v4811_v18, 0.0 }
 0x3f2   : > { %v3099_v44 = vpop.eup %3098  ;;  %3110 = vrcp.f32 %v2148_v15  ;;  %2333 = vst [vmem:[%s3884_s7 + $0x1a0] sm:$0xff] %v2275_v52  ;;  %v2224_v4 = vsub.f32 %v5277_v28, %v1776_v1  ;;  %v2119_v28 = vand.u32 2147483648, %v4811_v18  ;;  %vm1943_vm6 = vcmp.eq.f32.partialorder %v5015_v49, 0.0  ;;  %v5295_v52 = vld [vmem:[#allocation50_spill] sm:$0xff] }
 0x3f3   : > { %v3101_v35 = vpop.eup %3100  ;;  %v1940_v53 = vmul.f32 %v3099_v44, %v5015_v49  ;;  %v1748_v59 = vpop.xlane.xlu1 %1747  ;;  %v2150_v38 = vadd.f32 1e-06, %v2106_v30  ;;  %v1797_v41 = vmul.f32 0.125, %v1762_v46  ;;  %v2117_v58 = vsel %vm2116_vm3, %v4811_v18, %v2115_v5  ;;  %v5296_v44 = vld [vmem:[#allocation43_spill] sm:$0xff] }
 0x3f4   : > { %v2256_v34 = vmul.f32 %v3101_v35, %v2224_v4  ;;  %v1790_v21 = vmul.f32 0.125, %v1748_v59  ;;  %vm2109_vm8 = vcmp.eq.f32.partialorder %v5028_v61, inf  ;;  %v2112_v2 = vand.u32 2147483648, %v5028_v61  ;;  %v5297_v46 = vld [vmem:[#allocation47_spill] sm:$0xff] }
 0x3f5   : > { %v1942_v51 = vsel %vm1941_vm4, %v5015_v49, %v1940_v53  ;;  %vm2111_vm9 = vcmp.eq.f32.partialorder %v5028_v61, 0.0  ;;  %v2120_v36 = vsel %vm2118_vm5, %v2119_v28, %v2117_v58  ;;  %v2245_v3 = vsub.f32 %v5291_v47, %v1797_v41 }
 0x3f6   : > { %v3103_v9 = vpop.eup %3102  ;;  %v1945_v37 = vsel %vm1943_vm6, %v1944_v40, %v1942_v51  ;;  %2295 = vst [vmem:[%s3884_s7 + $0x70] sm:$0xff] %v2256_v34  ;;  %v2238_v11 = vsub.f32 %v5279_v0, %v1790_v21  ;;  %v2152_v29 = vadd.f32 1e-06, %v2120_v36  ;;  %v1775_v26 = vmul.f32 0.125, %v4797_v31 }
 0x3f7   : > { %v3105_v56 = vpop.eup %3104  ;;  %v2127_v60 = vadd.f32 1e-06, %v1945_v37  ;;  %v2108_v63 = vmul.f32 %v3103_v9, %v5028_v61  ;;  %v1752_v19 = vpop.xlane.xlu1 %1751  ;;  %v1799_v23 = vmul.f32 0.125, %v1766_v10 }
 0x3f8   : > { %v2253_v7 = vmul.f32 %v3105_v56, %v2221_v43  ;;  %v2270_v42 = vmul.f32 %v4968_v22, %v2238_v11  ;;  %v1792_v45 = vmul.f32 0.125, %v1752_v19  ;;  %v3107_v0 = vpop.eup %3106 }
 0x3f9   : > { %3112 = vrcp.f32 %v2127_v60  ;;  %v2110_v49 = vsel %vm2109_vm8, %v5028_v61, %v2108_v63  ;;  %v5293_v61 = vld [vmem:[#allocation37_spill] sm:$0xff]  ;;  %v2247_v1 = vsub.f32 %v5295_v52, %v1799_v23 }
 0x3fa   : > { %2289 = vst [vmem:[%s3884_s7 + $0x40] sm:$0xff] %v2253_v7  ;;  %v2113_v12 = vsel %vm2111_vm9, %v2112_v2, %v2110_v49  ;;  %2323 = vst [vmem:[%s3884_s7 + $0x150] sm:$0xff] %v2270_v42  ;;  %v2240_v27 = vsub.f32 %v5292_v33, %v1792_v45  ;;  %3114 = vrcp.f32 %v2150_v38 }
 0x3fb   : > { %v3109_v22 = vpop.eup %3108  ;;  %v2151_v6 = vadd.f32 1e-06, %v2113_v12  ;;  %v1756_v62 = vpop.xlane.xlu1 %1755 }
 0x3fc   : > { %v3111_v50 = vpop.eup %3110  ;;  %v2277_v25 = vmul.f32 %v3109_v22, %v2245_v3  ;;  %v2272_v16 = vmul.f32 %v5030_v57, %v2240_v27  ;;  %v1794_v18 = vmul.f32 0.125, %v1756_v62  ;;  %v2223_v57 = vsub.f32 %v5294_v24, %v1775_v26 }
 0x3fd   : > { %3116 = vrcp.f32 %v2151_v6 }
 0x3fe   : > { %2337 = vst [vmem:[%s3884_s7 + $0x1c0] sm:$0xff] %v2277_v25  ;;  %2327 = vst [vmem:[%s3884_s7 + $0x170] sm:$0xff] %v2272_v16  ;;  %v2242_v48 = vsub.f32 %v5293_v61, %v1794_v18  ;;  %3118 = vrcp.f32 %v2152_v29 }
 0x3ff   : > { %v1760_v54 = vpop.xlane.xlu1 %1759 }
 0x400   : > { %v2274_v15 = vmul.f32 %v3107_v0, %v2242_v48  ;;  %v1796_v32 = vmul.f32 0.125, %v1760_v54 }
 0x402   : > { %2331 = vst [vmem:[%s3884_s7 + $0x190] sm:$0xff] %v2274_v15  ;;  %v2244_v55 = vsub.f32 %v5285_v17, %v1796_v32 }
 0x403   : > { %v3113_v14 = vpop.eup %3112  ;;  %v1764_v31 = vpop.xlane.xlu1 %1763 }
 0x404   : > { %v2255_v20 = vmul.f32 %v3113_v14, %v2223_v57  ;;  %v2276_v39 = vmul.f32 %v3111_v50, %v2244_v55  ;;  %v1798_v13 = vmul.f32 0.125, %v1764_v31  ;;  %v3115_v8 = vpop.eup %3114 }
 0x406   : > { %2293 = vst [vmem:[%s3884_s7 + $0x60] sm:$0xff] %v2255_v20  ;;  %2335 = vst [vmem:[%s3884_s7 + $0x1b0] sm:$0xff] %v2276_v39  ;;  %v2246_v43 = vsub.f32 %v5296_v44, %v1798_v13 }
 0x407   : > { %v3117_v17 = vpop.eup %3116  ;;  %v1768_v4 = vpop.xlane.xlu1 %1767 }
 0x408   : > { %v2279_v35 = vmul.f32 %v3117_v17, %v2247_v1  ;;  %v2278_v30 = vmul.f32 %v3115_v8, %v2246_v43  ;;  %v1800_v5 = vmul.f32 0.125, %v1768_v4  ;;  %v3119_v59 = vpop.eup %3118 }
 0x40a   : > { %2341 = vst [vmem:[%s3884_s7 + $0x1e0] sm:$0xff] %v2279_v35  ;;  %2339 = vst [vmem:[%s3884_s7 + $0x1d0] sm:$0xff] %v2278_v30  ;;  %v2248_v53 = vsub.f32 %v5297_v46, %v1800_v5 }
 0x40c   : > { %v2280_v40 = vmul.f32 %v3119_v59, %v2248_v53 }
 0x40e   : > { %2343 = vst [vmem:[%s3884_s7 + $0x1f0] sm:$0xff] %v2280_v40 }
 0x40f   : > { %3304 = shalt.err (!%p3301_p3)
}
 0x410   : > { %s3305_s7 = scalar_lea.hbm %s5096_s12, 8192  ;;  %s3309_s29 = scalar_lea.hbm %s5157_s6, 32768 }
 0x411   : > { %p3306_p10 = scmp.ne.s32.totalorder %s5096_s12, %s3305_s7  ;;  %p3310_p11 = scmp.lt.u32.totalorder %s5096_s12, %s5157_s6 }
 0x412   : > { %p3311_p7 = scmp.lt.u32.totalorder %s3309_s29, %s3305_s7  ;;  %p3313_p13 = scmp.lt.u32.totalorder %s3305_s7, %s5096_s12 }
 0x413   : > { %p3307_p5 = pnand %p3306_p10, %p5290_p4 }
 0x414   : > { %p3312_p8 = por %p3311_p7, %p3310_p11 }
 0x415   : > { %p3308_p12 = pneg %p3307_p5 }
 0x416   : > { %p3314_p0 = por %p3313_p13, %p3312_p8 }
 0x418   : > { %p3315_p2 = pnand %p3314_p0, %p3308_p12 }
 0x41a   : > { %3318 = shalt.err (!%p3315_p2)
}
 0x41b   : > { %s3413_s20 = smov 256   ;;  %s3414_s19 = smov 16  }
 0x41c   : > { %2752 = dma.vmem_to_hbm [thread:$0]  (%p5290_p4), %s5091_s24, 8192, %s5096_s12, %s2351_s30, %s3413_s20, %s3413_s20, %s3414_s19  }
 0x41d PF: > { %p2788_p6 = scmp.ge.s32.totalorder %s3401_s28, 2  ;;  %s2400_s25 = sand.u32 1, %s3373_s21  }
 0x41e   : > { %p5298_p9 = scmp.ne.s32.totalorder %s5227_s14, 0  ;;  %s2401_s3 = scalar_lea.sflag [#allocation4], %s2400_s25 }
 0x420   : > { %p2773_p1 = pnand %p2788_p6, %p5298_p9 }
 0x422   : > { %3364 = dma.done.wait (!%p2773_p1), %s2401_s3, 4096  }
 0x423   : > { %3366 = vsyncadd (!%p2773_p1), %s2401_s3, 4294963200  ;;  %s2410_s4 = scalar_lea.sflag [#allocation13], %s2400_s25 }
 0x424   : > { %3368 = dma.done.wait (!%p2773_p1), %s2410_s4, 8192  }
 0x425   : > { %3370 = vsyncadd (!%p2773_p1), %s2410_s4, 4294959104  ;;  %s28_s28 = sadd.s32 1, %s3401_s28   ;;  %s5299_s13 = sld [smem:[#allocation19_spill]] }
 0x426   : > { %p25_p3 = scmp.ge.s32.totalorder %s28_s28, 6   ;;  %s5300_s2 = sld [smem:[#allocation20_spill]] }
 0x427   : > { %s5301_s21 = smov %s3377_s22  ;;  %s5302_s22 = smov %s3381_s23 }
 0x428   : > { %s5303_s23 = smov %s3646_s8  ;;  %s5304_s24 = smov %s3393_s26 }
 0x429   : > { %s5305_s25 = smov %s3397_s27  ;;  %27 = sbr.rel (!%p25_p3) target bundleno = 16 (0x10), region = 118 }
 0x42b   : > { %s5306_s26 = smov %s5299_s13 }
 0x42c   : > { %s5307_s27 = smov %s5300_s2 }
 0x430   :  { %2415 = vsyncpa [#allocation3], 1 }
 0x431   :  { %2417 = vsyncpa [#allocation3 + $0x1], 1 }
 0x432   :  { %2418 = vsyncpa [#allocation6], 1 }
 0x433   :  { %2419 = vsyncpa [#allocation9], 1 }
 0x434   :  { %2420 = vsyncpa [#allocation4], 1 }
 0x435   :  { %2422 = vsyncpa [#allocation4 + $0x1], 1 }
 0x436   :  { %2423 = vsyncpa [#allocation13], 1 }
 0x437   :  { %2425 = vsyncpa [#allocation13 + $0x1], 1 }

</bundles_post_ra>
